<compile_context>
chip_gen: v7x
topology: tpu7x:2x2x1
jax: 0.10.0
libtpu: 0.0.40
codegen_flags: <defaults>
</compile_context>

<pallas_src>
import functools

import jax
import jax.numpy as jnp
from jax import lax
from jax.experimental import pallas as pl
from jax.experimental.pallas import tpu as pltpu


def _round_up(x, m):
    return ((x + m - 1) // m) * m


# ----------------------------- kernel ----------------------------------------

def _lstm_kernel(x0_ref, emb_ref, w12_ref, b12_ref, wih0_ref, wihr_ref,
                 whh_ref, bias_ref, out_ref, gi_ref, *, seq, Bp, Hp):
    """One grid step == one LSTM layer.  All feature dims padded to 128 lanes.

    Layouts (2-D, no in-kernel reshapes):
      x0_ref   (Bp, Np)            emb_ref  (seq*Bp, Ep)
      w12_ref  (1, Np, 2Hp)        b12_ref  (1, 1, 2Hp)
      wih0_ref (Ep, 4Hp)           wihr_ref (1, Hp, 4Hp)   (layer>0 input proj)
      whh_ref  (1, Hp, 4Hp)        bias_ref (1, 1, 4Hp)    (b_ih + b_hh)
      out_ref  (seq*Bp, Hp)   VMEM-resident across layers (inter-layer activations)
      gi_ref   (seq*Bp, 4Hp)  hoisted input-projection scratch
    The 'g' gate columns of wih/whh/bias are pre-scaled by 2 in the wrapper so a single
    full-width sigmoid covers all four gates (tanh(x) == 2*sigmoid(2x) - 1).
    """
    layer = pl.program_id(0)

    # Fused init-hidden: [h0 | c0] = x0 @ W12[l] + b12[l]   (one matmul per layer).
    hc0 = (jnp.dot(x0_ref[...], w12_ref[0], preferred_element_type=jnp.float32)
           + b12_ref[0])
    h0 = hc0[:, :Hp]
    c0 = hc0[:, Hp:2 * Hp]

    # Hoisted input projection: one (seq*Bp, D) @ (D, 4Hp) matmul per layer, bias folded in,
    # predicated on the layer index (no double-dot, no read of uninit out_ref at layer 0).
    @pl.when(layer == 0)
    def _():
        gi = jnp.dot(emb_ref[...], wih0_ref[...], preferred_element_type=jnp.float32)
        gi_ref[...] = gi + bias_ref[0]

    @pl.when(layer > 0)
    def _():
        gi = jnp.dot(out_ref[...], wihr_ref[0], preferred_element_type=jnp.float32)
        gi_ref[...] = gi + bias_ref[0]

    whh = whh_ref[0]                               # (Hp, 4Hp), loop-invariant

    def step(t, carry):
        h, c = carry
        row = pl.multiple_of(t * Bp, 8)            # Bp is a static multiple of 8
        gates = (gi_ref[pl.ds(row, Bp), :]
                 + jnp.dot(h, whh, preferred_element_type=jnp.float32))
        s = jax.nn.sigmoid(gates)                  # one full-width (Bp, 4Hp) sigmoid
        i = s[:, 0 * Hp:1 * Hp]
        f = s[:, 1 * Hp:2 * Hp]
        g = 2.0 * s[:, 2 * Hp:3 * Hp] - 1.0        # == tanh of the original g pre-activation
        o = s[:, 3 * Hp:4 * Hp]
        c_new = f * c + i * g
        h_new = o * jnp.tanh(c_new)
        out_ref[pl.ds(row, Bp), :] = h_new         # lane-dense store; feeds the next layer
        return h_new, c_new

    # Bounded unroll: scheduler visibility without exploding live ranges at long seq.
    lax.fori_loop(0, seq, step, (h0, c0), unroll=min(seq, 8))


# ----------------------------- wrapper ----------------------------------------

def _pad_gate_w(w, nhid, Hp, d_pad):
    """(4*nhid, d) PyTorch-layout gate weight -> (d_pad, 4*Hp) transposed, zero-padded,
    with the g-gate columns pre-scaled by 2 (tanh-via-sigmoid trick)."""
    d = w.shape[1]
    out = jnp.zeros((d_pad, 4 * Hp), w.dtype)
    for k in range(4):
        blk = w[k * nhid:(k + 1) * nhid, :].T
        if k == 2:
            blk = 2.0 * blk
        out = out.at[:d, k * Hp:k * Hp + nhid].set(blk)
    return out


def _pad_gate_b(b, nhid, Hp):
    out = jnp.zeros((4 * Hp,), b.dtype)
    for k in range(4):
        blk = b[k * nhid:(k + 1) * nhid]
        if k == 2:
            blk = 2.0 * blk
        out = out.at[k * Hp:k * Hp + nhid].set(blk)
    return out


def _vmem_limit_bytes():
    # ~75% of physical VMEM, capped (v5e/v6e: 128 MiB physical, v7x: 64 MiB).
    try:
        cap = int(pltpu.get_tpu_info().vmem_capacity_bytes)
    except Exception:
        cap = 64 * 1024 * 1024
    return min(cap * 3 // 4, 100 * 1024 * 1024)


def rnn_decoder_forward(input_init, emb, params):
    """One RNN_decoder (LSTM) forward: (seq, B, emb_dim) -> (seq, B, nhid)."""
    nlayers, nhid, ninp = params["w1"].shape
    B = input_init.shape[0]
    seq, _, emb_dim = emb.shape
    f32 = jnp.float32

    # Pad batch to a sublane tile and all feature dims to full 128-lane tiles so every gate
    # slice, the h0/c0 split and the per-timestep store are aligned, unmasked ops.  Padded
    # weight/bias entries are zero, which keeps the padded h/c columns exactly zero.
    Bp = _round_up(B, 8)
    Hp = _round_up(nhid, 128)
    Ep = _round_up(emb_dim, 128)
    Np = _round_up(ninp, 128)

    x0 = jnp.zeros((Bp, Np), f32).at[:B, :ninp].set(input_init.astype(f32))
    emb2d = (jnp.zeros((seq, Bp, Ep), f32)
             .at[:, :B, :emb_dim].set(emb.astype(f32))
             .reshape(seq * Bp, Ep))

    # Fused init-hidden weights: one (Np, 2Hp) matmul per layer produces [h0 | c0].
    w1t = jnp.zeros((nlayers, Np, Hp), f32).at[:, :ninp, :nhid].set(
        jnp.transpose(params["w1"].astype(f32), (0, 2, 1)))
    w2t = jnp.zeros((nlayers, Np, Hp), f32).at[:, :ninp, :nhid].set(
        jnp.transpose(params["w2"].astype(f32), (0, 2, 1)))
    w12 = jnp.concatenate([w1t, w2t], axis=-1)                                # (L, Np, 2Hp)
    b12 = (jnp.zeros((nlayers, 1, 2 * Hp), f32)
           .at[:, 0, :nhid].set(params["b1"].astype(f32))
           .at[:, 0, Hp:Hp + nhid].set(params["b2"].astype(f32)))             # (L, 1, 2Hp)

    # LSTM weights: transposed, zero-padded to lane tiles, g-gate pre-scaled by 2.
    wih0_t = _pad_gate_w(params["w_ih"][0].astype(f32), nhid, Hp, Ep)         # (Ep, 4Hp)
    whh_t = jnp.stack([_pad_gate_w(params["w_hh"][l].astype(f32), nhid, Hp, Hp)
                       for l in range(nlayers)])                              # (L, Hp, 4Hp)
    if nlayers > 1:
        wihr_t = jnp.stack([_pad_gate_w(params["w_ih"][l].astype(f32), nhid, Hp, Hp)
                            for l in range(1, nlayers)])                      # (L-1, Hp, 4Hp)
    else:
        wihr_t = whh_t            # never read when nlayers == 1; avoids a dummy HBM array
    bias = jnp.stack([_pad_gate_b((params["b_ih"][l] + params["b_hh"][l]).astype(f32),
                                  nhid, Hp)
                      for l in range(nlayers)])[:, None, :]                   # (L, 1, 4Hp)

    kernel = functools.partial(_lstm_kernel, seq=seq, Bp=Bp, Hp=Hp)
    out2d = pl.pallas_call(
        kernel,
        out_shape=jax.ShapeDtypeStruct((seq * Bp, Hp), f32),
        grid=(nlayers,),
        in_specs=[
            pl.BlockSpec((Bp, Np), lambda l: (0, 0)),                         # x0
            pl.BlockSpec((seq * Bp, Ep), lambda l: (0, 0)),                   # emb (flattened)
            pl.BlockSpec((1, Np, 2 * Hp), lambda l: (l, 0, 0)),               # w12
            pl.BlockSpec((1, 1, 2 * Hp), lambda l: (l, 0, 0)),                # b12
            pl.BlockSpec((Ep, 4 * Hp), lambda l: (0, 0)),                     # wih layer 0
            pl.BlockSpec((1, Hp, 4 * Hp), lambda l: (jnp.maximum(l - 1, 0), 0, 0)),  # wih l>0
            pl.BlockSpec((1, Hp, 4 * Hp), lambda l: (l, 0, 0)),               # whh
            pl.BlockSpec((1, 1, 4 * Hp), lambda l: (l, 0, 0)),                # bias
        ],
        out_specs=pl.BlockSpec((seq * Bp, Hp), lambda l: (0, 0)),
        scratch_shapes=[pltpu.VMEM((seq * Bp, 4 * Hp), f32)],
        compiler_params=pltpu.CompilerParams(
            dimension_semantics=("arbitrary",),
            vmem_limit_bytes=_vmem_limit_bytes()),
    )(x0, emb2d, w12, b12, wih0_t, wihr_t, whh_t, bias)

    return out2d.reshape(seq, Bp, Hp)[:, :B, :nhid]


def ext_emb_to_seq_forward(input_init, emb, decoder_params_list):
    """ext_emb_to_seq.forward for a list of LSTM decoders."""
    hidden_states = emb
    for params in decoder_params_list:
        hidden_states = rnn_decoder_forward(input_init, hidden_states, params)
    return hidden_states


# ----------------------- deterministic parameter init -------------------------

def make_decoder_params(key, nlayers, ninp, in_dim, nhid):
    f32 = jnp.float32
    keys = jax.random.split(key, 4 + 4 * nlayers)
    p = {
        "w1": jax.random.uniform(keys[0], (nlayers, nhid, ninp), f32, -0.1, 0.1),
        "b1": jax.random.uniform(keys[1], (nlayers, nhid), f32, -0.5, 0.5),
        "w2": jax.random.uniform(keys[2], (nlayers, nhid, ninp), f32, -0.1, 0.1),
        "b2": jax.random.uniform(keys[3], (nlayers, nhid), f32, -0.5, 0.5),
    }
    k = 1.0 / (nhid ** 0.5)
    w_ih, w_hh, b_ih, b_hh = [], [], [], []
    for l in range(nlayers):
        d = in_dim if l == 0 else nhid
        kk = keys[4 + 4 * l: 8 + 4 * l]
        w_ih.append(jax.random.uniform(kk[0], (4 * nhid, d), f32, -k, k))
        w_hh.append(jax.random.uniform(kk[1], (4 * nhid, nhid), f32, -k, k))
        b_ih.append(jax.random.uniform(kk[2], (4 * nhid,), f32, -k, k))
        b_hh.append(jax.random.uniform(kk[3], (4 * nhid,), f32, -k, k))
    p.update(w_ih=w_ih, w_hh=w_hh, b_ih=b_ih, b_hh=b_hh)
    return p


# ----------------------------- pure-JAX reference ------------------------------

def reference_decoder(input_init, emb, params):
    nlayers, nhid, _ = params["w1"].shape
    h = [input_init @ params["w1"][l].T + params["b1"][l] for l in range(nlayers)]
    c = [input_init @ params["w2"][l].T + params["b2"][l] for l in range(nlayers)]
    x = emb
    for l in range(nlayers):
        wih, whh = params["w_ih"][l], params["w_hh"][l]
        b = params["b_ih"][l] + params["b_hh"][l]
        hl, cl = h[l], c[l]
        outs = []
        for t in range(x.shape[0]):
            gates = x[t] @ wih.T + hl @ whh.T + b
            i = jax.nn.sigmoid(gates[:, 0 * nhid:1 * nhid])
            f = jax.nn.sigmoid(gates[:, 1 * nhid:2 * nhid])
            g = jnp.tanh(gates[:, 2 * nhid:3 * nhid])
            o = jax.nn.sigmoid(gates[:, 3 * nhid:4 * nhid])
            cl = f * cl + i * g
            hl = o * jnp.tanh(cl)
            outs.append(hl)
        x = jnp.stack(outs)
    return x


def reference_forward(input_init, emb, decoder_params_list):
    hidden_states = emb
    for params in decoder_params_list:
        hidden_states = reference_decoder(input_init, hidden_states, params)
    return hidden_states


if __name__ == "__main__":
    # ext_emb_to_seq with model_type_list = ['LSTM', 'LSTM']
    nlayers, ninp, emb_dim, nhid = 2, 16, 48, 32
    B, seq = 2, 8

    root = jax.random.PRNGKey(0)
    kp0, kp1, kx, ke = jax.random.split(root, 4)
    params0 = make_decoder_params(kp0, nlayers, ninp, emb_dim, nhid)   # input_dim = emb_dim
    params1 = make_decoder_params(kp1, nlayers, ninp, nhid, nhid)      # input_dim = nhid
    decoder_params_list = [params0, params1]

    input_init = jax.random.normal(kx, (B, ninp), jnp.float32)
    emb = jax.random.normal(ke, (seq, B, emb_dim), jnp.float32)

    out = ext_emb_to_seq_forward(input_init, emb, decoder_params_list)
    out = jax.block_until_ready(out)

    ref = reference_forward(input_init, emb, decoder_params_list)
    assert out.shape == (seq, B, nhid)
    assert jnp.allclose(out, ref, rtol=2e-3, atol=2e-3), "mismatch vs reference"
    print("KERNEL_OK")
</pallas_src>

<mosaic_0001>
module attributes {stable_mosaic.version = 11 : i64} {
  func.func @_lstm_kernel(%arg0: i32, %arg1: memref<8x128xf32, #tpu.memory_space<vmem>>, %arg2: memref<64x128xf32, #tpu.memory_space<vmem>>, %arg3: memref<1x128x256xf32, #tpu.memory_space<vmem>>, %arg4: memref<1x1x256xf32, #tpu.memory_space<vmem>>, %arg5: memref<128x512xf32, #tpu.memory_space<vmem>>, %arg6: memref<1x128x512xf32, #tpu.memory_space<vmem>>, %arg7: memref<1x128x512xf32, #tpu.memory_space<vmem>>, %arg8: memref<1x1x512xf32, #tpu.memory_space<vmem>>, %arg9: memref<64x128xf32, #tpu.memory_space<vmem>>, %arg10: memref<64x512xf32, #tpu.memory_space<vmem>>) attributes {dimension_semantics = [#tpu.dimension_semantics<arbitrary>], iteration_bounds = array<i64: 2>, scalar_prefetch = 0 : i64, scratch_operands = 1 : i64, tpu.core_type = #tpu.core_type<tc>, window_params = [{pipeline_mode = #tpu.pipeline_mode<synchronous>, transform_indices = @transform_0, window_bounds = array<i64: 8, 128>}, {pipeline_mode = #tpu.pipeline_mode<synchronous>, transform_indices = @transform_1, window_bounds = array<i64: 64, 128>}, {transform_indices = @transform_2, window_bounds = array<i64: 1, 128, 256>}, {transform_indices = @transform_3, window_bounds = array<i64: 1, 1, 256>}, {pipeline_mode = #tpu.pipeline_mode<synchronous>, transform_indices = @transform_4, window_bounds = array<i64: 128, 512>}, {transform_indices = @transform_5, window_bounds = array<i64: 1, 128, 512>}, {transform_indices = @transform_6, window_bounds = array<i64: 1, 128, 512>}, {transform_indices = @transform_7, window_bounds = array<i64: 1, 1, 512>}, {pipeline_mode = #tpu.pipeline_mode<synchronous>, transform_indices = @transform_8, window_bounds = array<i64: 64, 128>}]} {
    %c0 = arith.constant 0 : index
    %c0_0 = arith.constant 0 : index
    %0 = vector.load %arg1[%c0, %c0_0] : memref<8x128xf32, #tpu.memory_space<vmem>>, vector<8x128xf32>
    %c0_1 = arith.constant 0 : index
    %c0_2 = arith.constant 0 : index
    %c0_3 = arith.constant 0 : index
    %1 = vector.load %arg3[%c0_1, %c0_2, %c0_3] : memref<1x128x256xf32, #tpu.memory_space<vmem>>, vector<1x128x256xf32>
    %2 = vector.shape_cast %1 : vector<1x128x256xf32> to vector<128x256xf32>
    %cst = arith.constant dense<0.000000e+00> : vector<8x256xf32>
    %3 = tpu.matmul %0, %2, %cst {dimension_numbers = #tpu.dot_dimension_numbers<[1], [0], [0], [1], [0, 0, 1, 1], [], []>} : vector<8x128xf32>, vector<128x256xf32>, vector<8x256xf32> -> vector<8x256xf32>
    %c0_4 = arith.constant 0 : index
    %c0_5 = arith.constant 0 : index
    %c0_6 = arith.constant 0 : index
    %4 = vector.load %arg4[%c0_4, %c0_5, %c0_6] : memref<1x1x256xf32, #tpu.memory_space<vmem>>, vector<1x1x256xf32>
    %5 = vector.shape_cast %4 : vector<1x1x256xf32> to vector<1x256xf32>
    %6 = vector.broadcast %5 : vector<1x256xf32> to vector<8x256xf32>
    %7 = arith.addf %3, %6 : vector<8x256xf32>
    %8 = vector.extract_strided_slice %7 {offsets = [0, 0], sizes = [8, 128], strides = [1, 1]} : vector<8x256xf32> to vector<8x128xf32>
    %9 = vector.extract_strided_slice %7 {offsets = [0, 128], sizes = [8, 128], strides = [1, 1]} : vector<8x256xf32> to vector<8x128xf32>
    %c0_i32 = arith.constant 0 : i32
    %10 = arith.cmpi eq, %arg0, %c0_i32 : i32
    %11 = arith.extui %10 : i1 to i32
    %c0_i32_7 = arith.constant 0 : i32
    %12 = arith.cmpi ne, %11, %c0_i32_7 : i32
    scf.if %12 {
      %c0_70 = arith.constant 0 : index
      %c0_71 = arith.constant 0 : index
      %226 = vector.load %arg2[%c0_70, %c0_71] : memref<64x128xf32, #tpu.memory_space<vmem>>, vector<64x128xf32>
      %c0_72 = arith.constant 0 : index
      %c0_73 = arith.constant 0 : index
      %227 = vector.load %arg5[%c0_72, %c0_73] : memref<128x512xf32, #tpu.memory_space<vmem>>, vector<128x512xf32>
      %cst_74 = arith.constant dense<0.000000e+00> : vector<64x512xf32>
      %228 = tpu.matmul %226, %227, %cst_74 {dimension_numbers = #tpu.dot_dimension_numbers<[1], [0], [0], [1], [0, 0, 1, 1], [], []>} : vector<64x128xf32>, vector<128x512xf32>, vector<64x512xf32> -> vector<64x512xf32>
      %c0_75 = arith.constant 0 : index
      %c0_76 = arith.constant 0 : index
      %c0_77 = arith.constant 0 : index
      %229 = vector.load %arg8[%c0_75, %c0_76, %c0_77] : memref<1x1x512xf32, #tpu.memory_space<vmem>>, vector<1x1x512xf32>
      %230 = vector.shape_cast %229 : vector<1x1x512xf32> to vector<1x512xf32>
      %231 = vector.broadcast %230 : vector<1x512xf32> to vector<64x512xf32>
      %232 = arith.addf %228, %231 : vector<64x512xf32>
      %c0_78 = arith.constant 0 : index
      %c0_79 = arith.constant 0 : index
      %233 = vector.load %arg10[%c0_78, %c0_79] : memref<64x512xf32, #tpu.memory_space<vmem>>, vector<64x512xf32>
      tpu.vector_store %arg10[%c0_78, %c0_79], %232 {strides = array<i32>} : memref<64x512xf32, #tpu.memory_space<vmem>>, vector<64x512xf32>,
    } else {
    }
    %c0_i32_8 = arith.constant 0 : i32
    %13 = arith.cmpi sgt, %arg0, %c0_i32_8 : i32
    %14 = arith.extui %13 : i1 to i32
    %c0_i32_9 = arith.constant 0 : i32
    %15 = arith.cmpi ne, %14, %c0_i32_9 : i32
    scf.if %15 {
      %c0_70 = arith.constant 0 : index
      %c0_71 = arith.constant 0 : index
      %226 = vector.load %arg9[%c0_70, %c0_71] : memref<64x128xf32, #tpu.memory_space<vmem>>, vector<64x128xf32>
      %c0_72 = arith.constant 0 : index
      %c0_73 = arith.constant 0 : index
      %c0_74 = arith.constant 0 : index
      %227 = vector.load %arg6[%c0_72, %c0_73, %c0_74] : memref<1x128x512xf32, #tpu.memory_space<vmem>>, vector<1x128x512xf32>
      %228 = vector.shape_cast %227 : vector<1x128x512xf32> to vector<128x512xf32>
      %cst_75 = arith.constant dense<0.000000e+00> : vector<64x512xf32>
      %229 = tpu.matmul %226, %228, %cst_75 {dimension_numbers = #tpu.dot_dimension_numbers<[1], [0], [0], [1], [0, 0, 1, 1], [], []>} : vector<64x128xf32>, vector<128x512xf32>, vector<64x512xf32> -> vector<64x512xf32>
      %c0_76 = arith.constant 0 : index
      %c0_77 = arith.constant 0 : index
      %c0_78 = arith.constant 0 : index
      %230 = vector.load %arg8[%c0_76, %c0_77, %c0_78] : memref<1x1x512xf32, #tpu.memory_space<vmem>>, vector<1x1x512xf32>
      %231 = vector.shape_cast %230 : vector<1x1x512xf32> to vector<1x512xf32>
      %232 = vector.broadcast %231 : vector<1x512xf32> to vector<64x512xf32>
      %233 = arith.addf %229, %232 : vector<64x512xf32>
      %c0_79 = arith.constant 0 : index
      %c0_80 = arith.constant 0 : index
      %234 = vector.load %arg10[%c0_79, %c0_80] : memref<64x512xf32, #tpu.memory_space<vmem>>, vector<64x512xf32>
      tpu.vector_store %arg10[%c0_79, %c0_80], %233 {strides = array<i32>} : memref<64x512xf32, #tpu.memory_space<vmem>>, vector<64x512xf32>,
    } else {
    }
    %c0_10 = arith.constant 0 : index
    %c0_11 = arith.constant 0 : index
    %c0_12 = arith.constant 0 : index
    %16 = vector.load %arg7[%c0_10, %c0_11, %c0_12] : memref<1x128x512xf32, #tpu.memory_space<vmem>>, vector<1x128x512xf32>
    %17 = vector.shape_cast %16 : vector<1x128x512xf32> to vector<128x512xf32>
    %c0_i32_13 = arith.constant 0 : i32
    %c8_i32 = arith.constant 8 : i32
    %18 = arith.muli %c0_i32_13, %c8_i32 : i32
    %19 = tpu.assume_multiple %18, 8 : i32
    %20 = arith.index_cast %19 : i32 to index
    %c0_14 = arith.constant 0 : index
    %21 = vector.load %arg10[%20, %c0_14] : memref<64x512xf32, #tpu.memory_space<vmem>>, vector<8x512xf32>
    %cst_15 = arith.constant dense<0.000000e+00> : vector<8x512xf32>
    %22 = tpu.matmul %8, %17, %cst_15 {dimension_numbers = #tpu.dot_dimension_numbers<[1], [0], [0], [1], [0, 0, 1, 1], [], []>} : vector<8x128xf32>, vector<128x512xf32>, vector<8x512xf32> -> vector<8x512xf32>
    %23 = arith.addf %21, %22 : vector<8x512xf32>
    %24 = arith.negf %23 : vector<8x512xf32>
    %25 = math.exp %24 : vector<8x512xf32>
    %cst_16 = arith.constant 1.000000e+00 : f32
    %26 = vector.broadcast %cst_16 : f32 to vector<8x512xf32>
    %27 = arith.addf %26, %25 : vector<8x512xf32>
    %28 = arith.divf %26, %27 : vector<8x512xf32>
    %29 = vector.extract_strided_slice %28 {offsets = [0, 0], sizes = [8, 128], strides = [1, 1]} : vector<8x512xf32> to vector<8x128xf32>
    %30 = vector.extract_strided_slice %28 {offsets = [0, 128], sizes = [8, 128], strides = [1, 1]} : vector<8x512xf32> to vector<8x128xf32>
    %31 = vector.extract_strided_slice %28 {offsets = [0, 256], sizes = [8, 128], strides = [1, 1]} : vector<8x512xf32> to vector<8x128xf32>
    %cst_17 = arith.constant 2.000000e+00 : f32
    %32 = vector.broadcast %cst_17 : f32 to vector<8x128xf32>
    %33 = arith.mulf %32, %31 : vector<8x128xf32>
    %cst_18 = arith.constant 1.000000e+00 : f32
    %34 = vector.broadcast %cst_18 : f32 to vector<8x128xf32>
    %35 = arith.subf %33, %34 : vector<8x128xf32>
    %36 = vector.extract_strided_slice %28 {offsets = [0, 384], sizes = [8, 128], strides = [1, 1]} : vector<8x512xf32> to vector<8x128xf32>
    %37 = arith.mulf %30, %9 : vector<8x128xf32>
    %38 = arith.mulf %29, %35 : vector<8x128xf32>
    %39 = arith.addf %37, %38 : vector<8x128xf32>
    %40 = math.tanh %39 : vector<8x128xf32>
    %41 = arith.mulf %36, %40 : vector<8x128xf32>
    %42 = arith.index_cast %19 : i32 to index
    %c0_19 = arith.constant 0 : index
    %43 = vector.load %arg9[%42, %c0_19] : memref<64x128xf32, #tpu.memory_space<vmem>>, vector<8x128xf32>
    tpu.vector_store %arg9[%42, %c0_19], %41 {strides = array<i32>} : memref<64x128xf32, #tpu.memory_space<vmem>>, vector<8x128xf32>,
    %c1_i32 = arith.constant 1 : i32
    %c8_i32_20 = arith.constant 8 : i32
    %44 = arith.muli %c1_i32, %c8_i32_20 : i32
    %45 = tpu.assume_multiple %44, 8 : i32
    %46 = arith.index_cast %45 : i32 to index
    %c0_21 = arith.constant 0 : index
    %47 = vector.load %arg10[%46, %c0_21] : memref<64x512xf32, #tpu.memory_space<vmem>>, vector<8x512xf32>
    %cst_22 = arith.constant dense<0.000000e+00> : vector<8x512xf32>
    %48 = tpu.matmul %41, %17, %cst_22 {dimension_numbers = #tpu.dot_dimension_numbers<[1], [0], [0], [1], [0, 0, 1, 1], [], []>} : vector<8x128xf32>, vector<128x512xf32>, vector<8x512xf32> -> vector<8x512xf32>
    %49 = arith.addf %47, %48 : vector<8x512xf32>
    %50 = arith.negf %49 : vector<8x512xf32>
    %51 = math.exp %50 : vector<8x512xf32>
    %cst_23 = arith.constant 1.000000e+00 : f32
    %52 = vector.broadcast %cst_23 : f32 to vector<8x512xf32>
    %53 = arith.addf %52, %51 : vector<8x512xf32>
    %54 = arith.divf %52, %53 : vector<8x512xf32>
    %55 = vector.extract_strided_slice %54 {offsets = [0, 0], sizes = [8, 128], strides = [1, 1]} : vector<8x512xf32> to vector<8x128xf32>
    %56 = vector.extract_strided_slice %54 {offsets = [0, 128], sizes = [8, 128], strides = [1, 1]} : vector<8x512xf32> to vector<8x128xf32>
    %57 = vector.extract_strided_slice %54 {offsets = [0, 256], sizes = [8, 128], strides = [1, 1]} : vector<8x512xf32> to vector<8x128xf32>
    %cst_24 = arith.constant 2.000000e+00 : f32
    %58 = vector.broadcast %cst_24 : f32 to vector<8x128xf32>
    %59 = arith.mulf %58, %57 : vector<8x128xf32>
    %cst_25 = arith.constant 1.000000e+00 : f32
    %60 = vector.broadcast %cst_25 : f32 to vector<8x128xf32>
    %61 = arith.subf %59, %60 : vector<8x128xf32>
    %62 = vector.extract_strided_slice %54 {offsets = [0, 384], sizes = [8, 128], strides = [1, 1]} : vector<8x512xf32> to vector<8x128xf32>
    %63 = arith.mulf %56, %39 : vector<8x128xf32>
    %64 = arith.mulf %55, %61 : vector<8x128xf32>
    %65 = arith.addf %63, %64 : vector<8x128xf32>
    %66 = math.tanh %65 : vector<8x128xf32>
    %67 = arith.mulf %62, %66 : vector<8x128xf32>
    %68 = arith.index_cast %45 : i32 to index
    %c0_26 = arith.constant 0 : index
    %69 = vector.load %arg9[%68, %c0_26] : memref<64x128xf32, #tpu.memory_space<vmem>>, vector<8x128xf32>
    tpu.vector_store %arg9[%68, %c0_26], %67 {strides = array<i32>} : memref<64x128xf32, #tpu.memory_space<vmem>>, vector<8x128xf32>,
    %c2_i32 = arith.constant 2 : i32
    %c8_i32_27 = arith.constant 8 : i32
    %70 = arith.muli %c2_i32, %c8_i32_27 : i32
    %71 = tpu.assume_multiple %70, 8 : i32
    %72 = arith.index_cast %71 : i32 to index
    %c0_28 = arith.constant 0 : index
    %73 = vector.load %arg10[%72, %c0_28] : memref<64x512xf32, #tpu.memory_space<vmem>>, vector<8x512xf32>
    %cst_29 = arith.constant dense<0.000000e+00> : vector<8x512xf32>
    %74 = tpu.matmul %67, %17, %cst_29 {dimension_numbers = #tpu.dot_dimension_numbers<[1], [0], [0], [1], [0, 0, 1, 1], [], []>} : vector<8x128xf32>, vector<128x512xf32>, vector<8x512xf32> -> vector<8x512xf32>
    %75 = arith.addf %73, %74 : vector<8x512xf32>
    %76 = arith.negf %75 : vector<8x512xf32>
    %77 = math.exp %76 : vector<8x512xf32>
    %cst_30 = arith.constant 1.000000e+00 : f32
    %78 = vector.broadcast %cst_30 : f32 to vector<8x512xf32>
    %79 = arith.addf %78, %77 : vector<8x512xf32>
    %80 = arith.divf %78, %79 : vector<8x512xf32>
    %81 = vector.extract_strided_slice %80 {offsets = [0, 0], sizes = [8, 128], strides = [1, 1]} : vector<8x512xf32> to vector<8x128xf32>
    %82 = vector.extract_strided_slice %80 {offsets = [0, 128], sizes = [8, 128], strides = [1, 1]} : vector<8x512xf32> to vector<8x128xf32>
    %83 = vector.extract_strided_slice %80 {offsets = [0, 256], sizes = [8, 128], strides = [1, 1]} : vector<8x512xf32> to vector<8x128xf32>
    %cst_31 = arith.constant 2.000000e+00 : f32
    %84 = vector.broadcast %cst_31 : f32 to vector<8x128xf32>
    %85 = arith.mulf %84, %83 : vector<8x128xf32>
    %cst_32 = arith.constant 1.000000e+00 : f32
    %86 = vector.broadcast %cst_32 : f32 to vector<8x128xf32>
    %87 = arith.subf %85, %86 : vector<8x128xf32>
    %88 = vector.extract_strided_slice %80 {offsets = [0, 384], sizes = [8, 128], strides = [1, 1]} : vector<8x512xf32> to vector<8x128xf32>
    %89 = arith.mulf %82, %65 : vector<8x128xf32>
    %90 = arith.mulf %81, %87 : vector<8x128xf32>
    %91 = arith.addf %89, %90 : vector<8x128xf32>
    %92 = math.tanh %91 : vector<8x128xf32>
    %93 = arith.mulf %88, %92 : vector<8x128xf32>
    %94 = arith.index_cast %71 : i32 to index
    %c0_33 = arith.constant 0 : index
    %95 = vector.load %arg9[%94, %c0_33] : memref<64x128xf32, #tpu.memory_space<vmem>>, vector<8x128xf32>
    tpu.vector_store %arg9[%94, %c0_33], %93 {strides = array<i32>} : memref<64x128xf32, #tpu.memory_space<vmem>>, vector<8x128xf32>,
    %c3_i32 = arith.constant 3 : i32
    %c8_i32_34 = arith.constant 8 : i32
    %96 = arith.muli %c3_i32, %c8_i32_34 : i32
    %97 = tpu.assume_multiple %96, 8 : i32
    %98 = arith.index_cast %97 : i32 to index
    %c0_35 = arith.constant 0 : index
    %99 = vector.load %arg10[%98, %c0_35] : memref<64x512xf32, #tpu.memory_space<vmem>>, vector<8x512xf32>
    %cst_36 = arith.constant dense<0.000000e+00> : vector<8x512xf32>
    %100 = tpu.matmul %93, %17, %cst_36 {dimension_numbers = #tpu.dot_dimension_numbers<[1], [0], [0], [1], [0, 0, 1, 1], [], []>} : vector<8x128xf32>, vector<128x512xf32>, vector<8x512xf32> -> vector<8x512xf32>
    %101 = arith.addf %99, %100 : vector<8x512xf32>
    %102 = arith.negf %101 : vector<8x512xf32>
    %103 = math.exp %102 : vector<8x512xf32>
    %cst_37 = arith.constant 1.000000e+00 : f32
    %104 = vector.broadcast %cst_37 : f32 to vector<8x512xf32>
    %105 = arith.addf %104, %103 : vector<8x512xf32>
    %106 = arith.divf %104, %105 : vector<8x512xf32>
    %107 = vector.extract_strided_slice %106 {offsets = [0, 0], sizes = [8, 128], strides = [1, 1]} : vector<8x512xf32> to vector<8x128xf32>
    %108 = vector.extract_strided_slice %106 {offsets = [0, 128], sizes = [8, 128], strides = [1, 1]} : vector<8x512xf32> to vector<8x128xf32>
    %109 = vector.extract_strided_slice %106 {offsets = [0, 256], sizes = [8, 128], strides = [1, 1]} : vector<8x512xf32> to vector<8x128xf32>
    %cst_38 = arith.constant 2.000000e+00 : f32
    %110 = vector.broadcast %cst_38 : f32 to vector<8x128xf32>
    %111 = arith.mulf %110, %109 : vector<8x128xf32>
    %cst_39 = arith.constant 1.000000e+00 : f32
    %112 = vector.broadcast %cst_39 : f32 to vector<8x128xf32>
    %113 = arith.subf %111, %112 : vector<8x128xf32>
    %114 = vector.extract_strided_slice %106 {offsets = [0, 384], sizes = [8, 128], strides = [1, 1]} : vector<8x512xf32> to vector<8x128xf32>
    %115 = arith.mulf %108, %91 : vector<8x128xf32>
    %116 = arith.mulf %107, %113 : vector<8x128xf32>
    %117 = arith.addf %115, %116 : vector<8x128xf32>
    %118 = math.tanh %117 : vector<8x128xf32>
    %119 = arith.mulf %114, %118 : vector<8x128xf32>
    %120 = arith.index_cast %97 : i32 to index
    %c0_40 = arith.constant 0 : index
    %121 = vector.load %arg9[%120, %c0_40] : memref<64x128xf32, #tpu.memory_space<vmem>>, vector<8x128xf32>
    tpu.vector_store %arg9[%120, %c0_40], %119 {strides = array<i32>} : memref<64x128xf32, #tpu.memory_space<vmem>>, vector<8x128xf32>,
    %c4_i32 = arith.constant 4 : i32
    %c8_i32_41 = arith.constant 8 : i32
    %122 = arith.muli %c4_i32, %c8_i32_41 : i32
    %123 = tpu.assume_multiple %122, 8 : i32
    %124 = arith.index_cast %123 : i32 to index
    %c0_42 = arith.constant 0 : index
    %125 = vector.load %arg10[%124, %c0_42] : memref<64x512xf32, #tpu.memory_space<vmem>>, vector<8x512xf32>
    %cst_43 = arith.constant dense<0.000000e+00> : vector<8x512xf32>
    %126 = tpu.matmul %119, %17, %cst_43 {dimension_numbers = #tpu.dot_dimension_numbers<[1], [0], [0], [1], [0, 0, 1, 1], [], []>} : vector<8x128xf32>, vector<128x512xf32>, vector<8x512xf32> -> vector<8x512xf32>
    %127 = arith.addf %125, %126 : vector<8x512xf32>
    %128 = arith.negf %127 : vector<8x512xf32>
    %129 = math.exp %128 : vector<8x512xf32>
    %cst_44 = arith.constant 1.000000e+00 : f32
    %130 = vector.broadcast %cst_44 : f32 to vector<8x512xf32>
    %131 = arith.addf %130, %129 : vector<8x512xf32>
    %132 = arith.divf %130, %131 : vector<8x512xf32>
    %133 = vector.extract_strided_slice %132 {offsets = [0, 0], sizes = [8, 128], strides = [1, 1]} : vector<8x512xf32> to vector<8x128xf32>
    %134 = vector.extract_strided_slice %132 {offsets = [0, 128], sizes = [8, 128], strides = [1, 1]} : vector<8x512xf32> to vector<8x128xf32>
    %135 = vector.extract_strided_slice %132 {offsets = [0, 256], sizes = [8, 128], strides = [1, 1]} : vector<8x512xf32> to vector<8x128xf32>
    %cst_45 = arith.constant 2.000000e+00 : f32
    %136 = vector.broadcast %cst_45 : f32 to vector<8x128xf32>
    %137 = arith.mulf %136, %135 : vector<8x128xf32>
    %cst_46 = arith.constant 1.000000e+00 : f32
    %138 = vector.broadcast %cst_46 : f32 to vector<8x128xf32>
    %139 = arith.subf %137, %138 : vector<8x128xf32>
    %140 = vector.extract_strided_slice %132 {offsets = [0, 384], sizes = [8, 128], strides = [1, 1]} : vector<8x512xf32> to vector<8x128xf32>
    %141 = arith.mulf %134, %117 : vector<8x128xf32>
    %142 = arith.mulf %133, %139 : vector<8x128xf32>
    %143 = arith.addf %141, %142 : vector<8x128xf32>
    %144 = math.tanh %143 : vector<8x128xf32>
    %145 = arith.mulf %140, %144 : vector<8x128xf32>
    %146 = arith.index_cast %123 : i32 to index
    %c0_47 = arith.constant 0 : index
    %147 = vector.load %arg9[%146, %c0_47] : memref<64x128xf32, #tpu.memory_space<vmem>>, vector<8x128xf32>
    tpu.vector_store %arg9[%146, %c0_47], %145 {strides = array<i32>} : memref<64x128xf32, #tpu.memory_space<vmem>>, vector<8x128xf32>,
    %c5_i32 = arith.constant 5 : i32
    %c8_i32_48 = arith.constant 8 : i32
    %148 = arith.muli %c5_i32, %c8_i32_48 : i32
    %149 = tpu.assume_multiple %148, 8 : i32
    %150 = arith.index_cast %149 : i32 to index
    %c0_49 = arith.constant 0 : index
    %151 = vector.load %arg10[%150, %c0_49] : memref<64x512xf32, #tpu.memory_space<vmem>>, vector<8x512xf32>
    %cst_50 = arith.constant dense<0.000000e+00> : vector<8x512xf32>
    %152 = tpu.matmul %145, %17, %cst_50 {dimension_numbers = #tpu.dot_dimension_numbers<[1], [0], [0], [1], [0, 0, 1, 1], [], []>} : vector<8x128xf32>, vector<128x512xf32>, vector<8x512xf32> -> vector<8x512xf32>
    %153 = arith.addf %151, %152 : vector<8x512xf32>
    %154 = arith.negf %153 : vector<8x512xf32>
    %155 = math.exp %154 : vector<8x512xf32>
    %cst_51 = arith.constant 1.000000e+00 : f32
    %156 = vector.broadcast %cst_51 : f32 to vector<8x512xf32>
    %157 = arith.addf %156, %155 : vector<8x512xf32>
    %158 = arith.divf %156, %157 : vector<8x512xf32>
    %159 = vector.extract_strided_slice %158 {offsets = [0, 0], sizes = [8, 128], strides = [1, 1]} : vector<8x512xf32> to vector<8x128xf32>
    %160 = vector.extract_strided_slice %158 {offsets = [0, 128], sizes = [8, 128], strides = [1, 1]} : vector<8x512xf32> to vector<8x128xf32>
    %161 = vector.extract_strided_slice %158 {offsets = [0, 256], sizes = [8, 128], strides = [1, 1]} : vector<8x512xf32> to vector<8x128xf32>
    %cst_52 = arith.constant 2.000000e+00 : f32
    %162 = vector.broadcast %cst_52 : f32 to vector<8x128xf32>
    %163 = arith.mulf %162, %161 : vector<8x128xf32>
    %cst_53 = arith.constant 1.000000e+00 : f32
    %164 = vector.broadcast %cst_53 : f32 to vector<8x128xf32>
    %165 = arith.subf %163, %164 : vector<8x128xf32>
    %166 = vector.extract_strided_slice %158 {offsets = [0, 384], sizes = [8, 128], strides = [1, 1]} : vector<8x512xf32> to vector<8x128xf32>
    %167 = arith.mulf %160, %143 : vector<8x128xf32>
    %168 = arith.mulf %159, %165 : vector<8x128xf32>
    %169 = arith.addf %167, %168 : vector<8x128xf32>
    %170 = math.tanh %169 : vector<8x128xf32>
    %171 = arith.mulf %166, %170 : vector<8x128xf32>
    %172 = arith.index_cast %149 : i32 to index
    %c0_54 = arith.constant 0 : index
    %173 = vector.load %arg9[%172, %c0_54] : memref<64x128xf32, #tpu.memory_space<vmem>>, vector<8x128xf32>
    tpu.vector_store %arg9[%172, %c0_54], %171 {strides = array<i32>} : memref<64x128xf32, #tpu.memory_space<vmem>>, vector<8x128xf32>,
    %c6_i32 = arith.constant 6 : i32
    %c8_i32_55 = arith.constant 8 : i32
    %174 = arith.muli %c6_i32, %c8_i32_55 : i32
    %175 = tpu.assume_multiple %174, 8 : i32
    %176 = arith.index_cast %175 : i32 to index
    %c0_56 = arith.constant 0 : index
    %177 = vector.load %arg10[%176, %c0_56] : memref<64x512xf32, #tpu.memory_space<vmem>>, vector<8x512xf32>
    %cst_57 = arith.constant dense<0.000000e+00> : vector<8x512xf32>
    %178 = tpu.matmul %171, %17, %cst_57 {dimension_numbers = #tpu.dot_dimension_numbers<[1], [0], [0], [1], [0, 0, 1, 1], [], []>} : vector<8x128xf32>, vector<128x512xf32>, vector<8x512xf32> -> vector<8x512xf32>
    %179 = arith.addf %177, %178 : vector<8x512xf32>
    %180 = arith.negf %179 : vector<8x512xf32>
    %181 = math.exp %180 : vector<8x512xf32>
    %cst_58 = arith.constant 1.000000e+00 : f32
    %182 = vector.broadcast %cst_58 : f32 to vector<8x512xf32>
    %183 = arith.addf %182, %181 : vector<8x512xf32>
    %184 = arith.divf %182, %183 : vector<8x512xf32>
    %185 = vector.extract_strided_slice %184 {offsets = [0, 0], sizes = [8, 128], strides = [1, 1]} : vector<8x512xf32> to vector<8x128xf32>
    %186 = vector.extract_strided_slice %184 {offsets = [0, 128], sizes = [8, 128], strides = [1, 1]} : vector<8x512xf32> to vector<8x128xf32>
    %187 = vector.extract_strided_slice %184 {offsets = [0, 256], sizes = [8, 128], strides = [1, 1]} : vector<8x512xf32> to vector<8x128xf32>
    %cst_59 = arith.constant 2.000000e+00 : f32
    %188 = vector.broadcast %cst_59 : f32 to vector<8x128xf32>
    %189 = arith.mulf %188, %187 : vector<8x128xf32>
    %cst_60 = arith.constant 1.000000e+00 : f32
    %190 = vector.broadcast %cst_60 : f32 to vector<8x128xf32>
    %191 = arith.subf %189, %190 : vector<8x128xf32>
    %192 = vector.extract_strided_slice %184 {offsets = [0, 384], sizes = [8, 128], strides = [1, 1]} : vector<8x512xf32> to vector<8x128xf32>
    %193 = arith.mulf %186, %169 : vector<8x128xf32>
    %194 = arith.mulf %185, %191 : vector<8x128xf32>
    %195 = arith.addf %193, %194 : vector<8x128xf32>
    %196 = math.tanh %195 : vector<8x128xf32>
    %197 = arith.mulf %192, %196 : vector<8x128xf32>
    %198 = arith.index_cast %175 : i32 to index
    %c0_61 = arith.constant 0 : index
    %199 = vector.load %arg9[%198, %c0_61] : memref<64x128xf32, #tpu.memory_space<vmem>>, vector<8x128xf32>
    tpu.vector_store %arg9[%198, %c0_61], %197 {strides = array<i32>} : memref<64x128xf32, #tpu.memory_space<vmem>>, vector<8x128xf32>,
    %c7_i32 = arith.constant 7 : i32
    %c8_i32_62 = arith.constant 8 : i32
    %200 = arith.muli %c7_i32, %c8_i32_62 : i32
    %201 = tpu.assume_multiple %200, 8 : i32
    %202 = arith.index_cast %201 : i32 to index
    %c0_63 = arith.constant 0 : index
    %203 = vector.load %arg10[%202, %c0_63] : memref<64x512xf32, #tpu.memory_space<vmem>>, vector<8x512xf32>
    %cst_64 = arith.constant dense<0.000000e+00> : vector<8x512xf32>
    %204 = tpu.matmul %197, %17, %cst_64 {dimension_numbers = #tpu.dot_dimension_numbers<[1], [0], [0], [1], [0, 0, 1, 1], [], []>} : vector<8x128xf32>, vector<128x512xf32>, vector<8x512xf32> -> vector<8x512xf32>
    %205 = arith.addf %203, %204 : vector<8x512xf32>
    %206 = arith.negf %205 : vector<8x512xf32>
    %207 = math.exp %206 : vector<8x512xf32>
    %cst_65 = arith.constant 1.000000e+00 : f32
    %208 = vector.broadcast %cst_65 : f32 to vector<8x512xf32>
    %209 = arith.addf %208, %207 : vector<8x512xf32>
    %210 = arith.divf %208, %209 : vector<8x512xf32>
    %211 = vector.extract_strided_slice %210 {offsets = [0, 0], sizes = [8, 128], strides = [1, 1]} : vector<8x512xf32> to vector<8x128xf32>
    %212 = vector.extract_strided_slice %210 {offsets = [0, 128], sizes = [8, 128], strides = [1, 1]} : vector<8x512xf32> to vector<8x128xf32>
    %213 = vector.extract_strided_slice %210 {offsets = [0, 256], sizes = [8, 128], strides = [1, 1]} : vector<8x512xf32> to vector<8x128xf32>
    %cst_66 = arith.constant 2.000000e+00 : f32
    %214 = vector.broadcast %cst_66 : f32 to vector<8x128xf32>
    %215 = arith.mulf %214, %213 : vector<8x128xf32>
    %cst_67 = arith.constant 1.000000e+00 : f32
    %216 = vector.broadcast %cst_67 : f32 to vector<8x128xf32>
    %217 = arith.subf %215, %216 : vector<8x128xf32>
    %218 = vector.extract_strided_slice %210 {offsets = [0, 384], sizes = [8, 128], strides = [1, 1]} : vector<8x512xf32> to vector<8x128xf32>
    %219 = arith.mulf %212, %195 : vector<8x128xf32>
    %220 = arith.mulf %211, %217 : vector<8x128xf32>
    %221 = arith.addf %219, %220 : vector<8x128xf32>
    %222 = math.tanh %221 : vector<8x128xf32>
    %223 = arith.mulf %218, %222 : vector<8x128xf32>
    %224 = arith.index_cast %201 : i32 to index
    %c0_68 = arith.constant 0 : index
    %225 = vector.load %arg9[%224, %c0_68] : memref<64x128xf32, #tpu.memory_space<vmem>>, vector<8x128xf32>
    tpu.vector_store %arg9[%224, %c0_68], %223 {strides = array<i32>} : memref<64x128xf32, #tpu.memory_space<vmem>>, vector<8x128xf32>,
    %c8_i32_69 = arith.constant 8 : i32
    return
  }
  func.func @transform_0(%arg0: i32) -> (i32, i32) {
    %c0_i32 = arith.constant 0 : i32
    %c0_i32_0 = arith.constant 0 : i32
    %c0_i32_1 = arith.constant 0 : i32
    return %c0_i32, %c0_i32_0 : i32, i32
  }
  func.func @transform_1(%arg0: i32) -> (i32, i32) {
    %c0_i32 = arith.constant 0 : i32
    %c0_i32_0 = arith.constant 0 : i32
    %c0_i32_1 = arith.constant 0 : i32
    return %c0_i32, %c0_i32_0 : i32, i32
  }
  func.func @transform_2(%arg0: i32) -> (i32, i32, i32) {
    %c0_i32 = arith.constant 0 : i32
    %c0_i32_0 = arith.constant 0 : i32
    %c0_i32_1 = arith.constant 0 : i32
    return %arg0, %c0_i32, %c0_i32_0 : i32, i32, i32
  }
  func.func @transform_3(%arg0: i32) -> (i32, i32, i32) {
    %c0_i32 = arith.constant 0 : i32
    %c0_i32_0 = arith.constant 0 : i32
    %c0_i32_1 = arith.constant 0 : i32
    return %arg0, %c0_i32, %c0_i32_0 : i32, i32, i32
  }
  func.func @transform_4(%arg0: i32) -> (i32, i32) {
    %c0_i32 = arith.constant 0 : i32
    %c0_i32_0 = arith.constant 0 : i32
    %c0_i32_1 = arith.constant 0 : i32
    return %c0_i32, %c0_i32_0 : i32, i32
  }
  func.func @transform_5(%arg0: i32) -> (i32, i32, i32) {
    %c1_i32 = arith.constant 1 : i32
    %0 = arith.subi %arg0, %c1_i32 : i32
    %c0_i32 = arith.constant 0 : i32
    %1 = arith.maxsi %0, %c0_i32 : i32
    %c0_i32_0 = arith.constant 0 : i32
    %c0_i32_1 = arith.constant 0 : i32
    %c0_i32_2 = arith.constant 0 : i32
    return %1, %c0_i32_0, %c0_i32_1 : i32, i32, i32
  }
  func.func @transform_6(%arg0: i32) -> (i32, i32, i32) {
    %c0_i32 = arith.constant 0 : i32
    %c0_i32_0 = arith.constant 0 : i32
    %c0_i32_1 = arith.constant 0 : i32
    return %arg0, %c0_i32, %c0_i32_0 : i32, i32, i32
  }
  func.func @transform_7(%arg0: i32) -> (i32, i32, i32) {
    %c0_i32 = arith.constant 0 : i32
    %c0_i32_0 = arith.constant 0 : i32
    %c0_i32_1 = arith.constant 0 : i32
    return %arg0, %c0_i32, %c0_i32_0 : i32, i32, i32
  }
  func.func @transform_8(%arg0: i32) -> (i32, i32) {
    %c0_i32 = arith.constant 0 : i32
    %c0_i32_0 = arith.constant 0 : i32
    %c0_i32_1 = arith.constant 0 : i32
    return %c0_i32, %c0_i32_0 : i32, i32
  }
}

</mosaic_0001>

<bundles_post_ra>
// kernel: tpu_custom_call.1
= control target key start
LH: loop header
LB: loop body
LE: loop exit
PB: predicated region body
PF: predicated region fallthrough
CT: control target
= control target key end

     0   :  { %s5430_s0 = inlined_call_operand.hbm [shape: f32[8,128], index: 0, kind: input, shape index: {}]   ;;  %s5431_s1 = inlined_call_operand.hbm [shape: f32[64,128], index: 1, kind: input, shape index: {}]   ;;  %s5432_s2 = inlined_call_operand.hbm [shape: f32[2,128,256], index: 2, kind: input, shape index: {}]   ;;  %s5433_s3 = inlined_call_operand.vmem [shape: f32[2,1,256], index: 3, kind: input, shape index: {}]   ;;  %s5434_s4 = inlined_call_operand.hbm [shape: f32[128,512], index: 4, kind: input, shape index: {}]   ;;  %s5435_s5 = inlined_call_operand.hbm [shape: f32[1,128,512], index: 5, kind: input, shape index: {}]   ;;  %s5436_s6 = inlined_call_operand.hbm [shape: f32[2,128,512], index: 6, kind: input, shape index: {}]   ;;  %s5437_s7 = inlined_call_operand.vmem [shape: f32[2,1,512], index: 7, kind: input, shape index: {}]   ;;  %s5438_s8 = inlined_call_operand.hbm [shape: f32[64,128], index: 8, kind: output, shape index: {}]  }
   0x1   :  { %5452 = sst [smem:[#allocation24_spill]] %s5430_s0 }
   0x2   :  { %5453 = sst [smem:[#allocation25_spill]] %s5431_s1 }
   0x3   :  { %5454 = sst [smem:[#allocation26_spill]] %s5435_s5 }
   0x4   :  { %13 = vsyncpa [#allocation4], 0 }
   0x5   :  { %14 = vsyncpa [#allocation7], 0 }
   0x6   :  { %15 = vsyncpa [#allocation11], 0 }
   0x7   :  { %17 = vsyncpa [#allocation11 + $0x1], 0 }
   0x8   :  { %18 = vsyncpa [#allocation5], 0  ;;  %s4375_s27 = smov 0   ;;  %s4377_s28 = smov 0  }
   0x9   :  { %s4379_s29 = smov 0   ;;  %s4381_s30 = smov 0  }
   0xa   :  { %s4383_s9 = smov 0   ;;  %s4385_s10 = smov 0  }
   0xb   :  { %s4387_s11 = smov 0  }
   0xc LB: > { %5455 = sst [smem:[#allocation21_spill]] %s4294_s29  ;;  %s4407_s12 = sadd.s32 4294967295, %s4310_s11   ;;  %s4310_s11 = sphi %s4387_s11, %s5486_s11   ;;  %s4306_s10 = sphi %s4385_s10, %s5494_s10   ;;  %s4302_s9 = sphi %s4383_s9, %s5493_s9   ;;  %s4298_s30 = sphi %s4381_s30, %s5492_s30   ;;  %s4294_s29 = sphi %s4379_s29, %s5491_s29   ;;  %s4290_s28 = sphi %s4377_s28, %s5490_s28   ;;  %s4286_s27 = sphi %s4375_s27, %s5489_s27  }
   0xd   : > { %p86_p0 = scmp.ne.s32.totalorder %s4302_s9, %s4298_s30  ;;  %p5439_p1 = scmp.eq.s32.totalorder %s4407_s12, 0 }
   0xe   : > { %p165_p2 = scmp.ne.s32.totalorder %s4290_s28, %s4286_s27  ;;  %p3017_p3 = scmp.ge.s32.totalorder %s4310_s11, 1 }
   0xf   : > { %p249_p4 = scmp.lt.s32.totalorder %s4310_s11, 3  ;;  %p4416_p5 = por %p5439_p1, %p86_p0 }
  0x10   : > { %p4422_p6 = por %p165_p2, %p5439_p1  ;;  %s4312_s16 = smov [#allocation3]  }
  0x11   : > { %s5456_s13 = scalar_select %p4416_p5, 1, 0 }
  0x12   : > { %s5457_s14 = scalar_select %p4422_p6, 1, 0 }
  0x13   : > { %p4426_p7 = pnand %p3017_p3, %p249_p4  ;;  %s262_s17 = sshll.u32 %s4312_s16, 4  ;;  %s263_s17 = int_to_ptr.vmem [resolvable:$true] %s262_s17 }
  0x14   : > { %s4313_s19 = smov [#allocation6]   ;;  %s5460_s0 = sld [smem:[#allocation24_spill]] }
  0x15   : > { %s5458_s15 = scalar_select %p4426_p7, 1, 0 }
  0x16   : > { %p3784_p9 = pneg %p4426_p7  ;;  %s272_s20 = sshll.u32 %s4313_s19, 4  ;;  %s4439_s20 = int_to_ptr.vmem [resolvable:$true] %s272_s20 }
  0x18   : > { %p4435_p10 = pnand %p3784_p9, %p5439_p1 }
  0x1a   : > { %s5459_s18 = scalar_select %p4435_p10, 1, 0 }
  0x1b   : > { %s4028_s23 = scalar_lea.hbm %s5460_s0, 128  ;;  %p4449_p12 = pneg %p4435_p10 }
  0x1c   : > { %p4029_p11 = scmp.ne.s32.totalorder %s5460_s0, %s4028_s23  ;;  %p4035_p2 = scmp.lt.u32.totalorder %s4028_s23, %s5460_s0 }
  0x1e   : > { %p4031_p13 = pnand %p4449_p12, %p4029_p11 }
  0x20   : > { %p4032_p0 = pneg %p4031_p13 }
  0x22   : > { %p4037_p3 = pnand %p4035_p2, %p4032_p0 }
  0x24   : > { %4040 = shalt.err (!%p4037_p3)
}
  0x25   : > { %s4041_s16 = scalar_lea.vmem %s263_s17, 128  ;;  %p4049_p1 = scmp.lt.s32.totalorder %s263_s17, %s263_s17 }
  0x26   : > { %p4042_p4 = scmp.ne.s32.totalorder %s263_s17, %s4041_s16  ;;  %p4050_p6 = scmp.lt.s32.totalorder %s4041_s16, %s4041_s16 }
  0x28   : > { %p4044_p9 = pnand %p4042_p4, %p4449_p12  ;;  %p4051_p5 = por %p4050_p6, %p4049_p1 }
  0x2a   : > { %p4045_p8 = pneg %p4044_p9 }
  0x2c   : > { %p4052_p7 = pnand %p4051_p5, %p4045_p8 }
  0x2e   : > { %4055 = shalt.err (!%p4052_p7)
}
  0x2f   : > { %3787 = dma.hbm_to_vmem [thread:$0]  (!%p4435_p10), %s5460_s0, 128, %s263_s17, [#allocation4]  }
  0x30   : > { %s5462_s1 = sld [smem:[#allocation25_spill]] }
  0x36   : > { %s4056_s24 = scalar_lea.hbm %s5462_s1, 1024 }
  0x37   : > { %p4057_p11 = scmp.ne.s32.totalorder %s5462_s1, %s4056_s24  ;;  %p4063_p5 = scmp.lt.u32.totalorder %s4056_s24, %s5462_s1 }
  0x39   : > { %p4059_p13 = pnand %p4057_p11, %p4449_p12 }
  0x3b   : > { %p4060_p1 = pneg %p4059_p13 }
  0x3d   : > { %p4065_p6 = pnand %p4063_p5, %p4060_p1 }
  0x3f   : > { %4068 = shalt.err (!%p4065_p6)
}
  0x40   : > { %s4069_s17 = scalar_lea.vmem %s4439_s20, 1024  ;;  %p4077_p2 = scmp.lt.s32.totalorder %s4439_s20, %s4439_s20 }
  0x41   : > { %p4070_p7 = scmp.ne.s32.totalorder %s4439_s20, %s4069_s17  ;;  %p4078_p3 = scmp.lt.s32.totalorder %s4069_s17, %s4069_s17 }
  0x43   : > { %p4072_p8 = pnand %p4070_p7, %p4449_p12  ;;  %p4079_p4 = por %p4078_p3, %p4077_p2 }
  0x45   : > { %p4073_p0 = pneg %p4072_p8 }
  0x47   : > { %p4080_p9 = pnand %p4079_p4, %p4073_p0 }
  0x49   : > { %4083 = shalt.err (!%p4080_p9)
}
  0x4a   : > { %s4314_s19 = smov 128   ;;  %s4315_s21 = smov 8  }
  0x4b   : > { %3790 = dma.hbm_to_vmem [thread:$0]  (!%p4435_p10), %s5462_s1, 1024, %s4439_s20, [#allocation7], %s4314_s19, %s4314_s19, %s4315_s21  }
  0x4c   : > { %s4489_s24 = sadd.s32 1, %s4310_s11   ;;  %p5446_p13 = scmp.eq.s32.totalorder %s4310_s11, 0 }
  0x4d   : > { %5463 = sst [smem:[#allocation22_spill]] %s4489_s24  ;;  %s70_s25 = ssub.s32 %s4310_s11, %s4489_s24 }
  0x4e   : > { %p4493_p11 = scmp.eq.s32.totalorder %s70_s25, 0  ;;  %p144_p1 = scmp.gt.s32.totalorder %s4407_s12, 0 }
  0x4f   : > { %s3016_s30 = sadd.s32 4294967295, %s4489_s24  ;;  %s152_s16 = sadd.s32 1, %s4294_s29 }
  0x50   : > { %s5464_s27 = scalar_select %p4493_p11, 1, 0 }
  0x51   : > { %p147_p5 = scmp.gt.s32.totalorder %s3016_s30, 0  ;;  %p159_p6 = scmp.ne.s32.totalorder %s4294_s29, %s4290_s28 }
  0x52   : > { %s145_s17 = scalar_select %p144_p1, %s4407_s12, 0 }
  0x53   : > { %s5496_s30 = smov (!%p147_p5, %s3016_s30), 0  ;;  %p161_p8 = por %p159_p6, %p5446_p13 }
  0x54   : > { %s149_s20 = ssub.s32 %s145_s17, %s5496_s30  ;;  %p5445_p0 = scmp.lt.s32.totalorder %s4310_s11, 2 }
  0x55   : > { %p150_p7 = scmp.eq.s32.totalorder %s149_s20, 0  ;;  %s5448_s19 = sand.u32 1, %s4310_s11  }
  0x56   : > { %s329_s22 = sand.u32 1, %s4294_s29   ;;  %s3088_s23 = sshll.u32 %s145_s17, 13 }
  0x57   : > { %s4509_s21 = scalar_select %p150_p7, %s4294_s29, %s152_s16  }
  0x58   : > { %s3025_s25 = sshll.u32 %s329_s22, 9  ;;  %s5466_s5 = sld [smem:[#allocation26_spill]] }
  0x59   : > { %5465 = sst [smem:[#allocation23_spill]] %s4509_s21  ;;  %p4519_p2 = pnand %p5445_p0, %p161_p8 }
  0x5a   : > { %s331_s16 = scalar_lea.vmem [#allocation10], %s3025_s25  ;;  %s4527_s17 = scalar_lea.sflag [#allocation11], %s5448_s19 }
  0x5b   : > { %s341_s20 = sshll.u32 %s331_s16, 4  ;;  %p4086_p4 = pneg %p4519_p2  ;;  %s4523_s20 = int_to_ptr.vmem [resolvable:$true] %s341_s20 }
  0x5e   : > { %s4515_s24 = scalar_lea.hbm %s5466_s5, %s3088_s23  ;;  %s4089_s23 = scalar_lea.hbm %s5466_s5, 8192 }
  0x5f   : > { %s4084_s0 = scalar_lea.hbm %s4515_s24, 8192  ;;  %p4090_p5 = scmp.lt.u32.totalorder %s4515_s24, %s5466_s5 }
  0x60   : > { %p4085_p3 = scmp.ne.s32.totalorder %s4515_s24, %s4084_s0  ;;  %p4091_p6 = scmp.lt.u32.totalorder %s4089_s23, %s4084_s0 }
  0x61   : > { %p4093_p8 = scmp.lt.u32.totalorder %s4084_s0, %s4515_s24 }
  0x62   : > { %p4087_p9 = pnand %p4086_p4, %p4085_p3  ;;  %p4092_p7 = por %p4091_p6, %p4090_p5 }
  0x64   : > { %p4088_p1 = pneg %p4087_p9  ;;  %p4094_p0 = por %p4093_p8, %p4092_p7 }
  0x66   : > { %p4095_p13 = pnand %p4094_p0, %p4088_p1 }
  0x68   : > { %4098 = shalt.err (!%p4095_p13)
}
  0x69   : > { %s4099_s16 = scalar_lea.vmem %s4523_s20, 8192  ;;  %s4316_s1 = smov [#allocation10]  }
  0x6a   : > { %p4100_p3 = scmp.ne.s32.totalorder %s4523_s20, %s4099_s16  ;;  %s4104_s22 = sshll.u32 %s4316_s1, 4  ;;  %s4105_s22 = int_to_ptr.vmem [resolvable:$false] %s4104_s22 }
  0x6b   : > { %s4106_s21 = scalar_lea.vmem %s4105_s22, 16384  ;;  %p4107_p10 = scmp.lt.s32.totalorder %s4523_s20, %s4105_s22 }
  0x6c   : > { %p4102_p9 = pnand %p4100_p3, %p4086_p4  ;;  %p4108_p5 = scmp.lt.s32.totalorder %s4106_s21, %s4099_s16 }
  0x6e   : > { %p4103_p11 = pneg %p4102_p9  ;;  %p4109_p6 = por %p4108_p5, %p4107_p10 }
  0x70   : > { %p4110_p7 = pnand %p4109_p6, %p4103_p11 }
  0x72   : > { %4113 = shalt.err (!%p4110_p7)
}
  0x73   : > { %s5450_s0 = smov 512   ;;  %s5451_s23 = smov 32  }
  0x74   : > { %3800 = dma.hbm_to_vmem [thread:$0]  (!%p4519_p2), %s4515_s24, 8192, %s4523_s20, %s4527_s17, %s5450_s0, %s5450_s0, %s5451_s23  }
  0x75   : > { %s4319_s25 = smov [#allocation9]   ;;  %s4114_s21 = scalar_lea.hbm %s5434_s4, 8192 }
  0x76   : > { %s285_s1 = sshll.u32 %s4319_s25, 4  ;;  %p4115_p10 = scmp.ne.s32.totalorder %s5434_s4, %s4114_s21  ;;  %s286_s1 = int_to_ptr.vmem [resolvable:$true] %s285_s1 }
  0x77   : > { %p4121_p0 = scmp.lt.u32.totalorder %s4114_s21, %s5434_s4 }
  0x78   : > { %p4117_p11 = pnand %p4115_p10, %p4449_p12 }
  0x7a   : > { %p4118_p13 = pneg %p4117_p11 }
  0x7c   : > { %p4123_p4 = pnand %p4121_p0, %p4118_p13 }
  0x7e   : > { %4126 = shalt.err (!%p4123_p4)
}
  0x7f   : > { %s4127_s24 = scalar_lea.vmem %s286_s1, 8192  ;;  %p4135_p3 = scmp.lt.s32.totalorder %s286_s1, %s286_s1 }
  0x80   : > { %p4128_p2 = scmp.ne.s32.totalorder %s286_s1, %s4127_s24  ;;  %p4136_p9 = scmp.lt.s32.totalorder %s4127_s24, %s4127_s24 }
  0x82   : > { %p4130_p1 = pnand %p4128_p2, %p4449_p12  ;;  %p4137_p5 = por %p4136_p9, %p4135_p3 }
  0x84   : > { %p4131_p8 = pneg %p4130_p1 }
  0x86   : > { %p4138_p6 = pnand %p4137_p5, %p4131_p8 }
  0x88   : > { %4141 = shalt.err (!%p4138_p6)
}
  0x89   : > { %p5468_p7 = scmp.ne.s32.totalorder %s5459_s18, 0  ;;  %s73_s26 = sadd.s32 1, %s4306_s10 }
  0x8a   : > { %p80_p12 = scmp.ne.s32.totalorder %s4306_s10, %s4302_s9  ;;  %p5469_p10 = scmp.ne.s32.totalorder %s5464_s27, 0 }
  0x8b   : > { %3793 = dma.hbm_to_vmem [thread:$0]  (!%p5468_p7), %s5434_s4, 8192, %s286_s1, [#allocation7], %s5450_s0, %s5450_s0, %s5451_s23  }
  0x8c   : > { %s4585_s18 = scalar_select %p5469_p10, %s4306_s10, %s73_s26  }
  0x8d   : > { %p5470_p11 = scmp.eq.s32.totalorder %s4310_s11, 0  ;;  %s301_s19 = sand.u32 1, %s4306_s10  }
  0x8e   : > { %s3022_s20 = sshll.u32 %s301_s19, 8  ;;  %s3087_s25 = sshll.u32 %s4310_s11, 12 }
  0x8f   : > { %p82_p13 = por %p5470_p11, %p80_p12  ;;  %s4596_s21 = scalar_lea.hbm %s5432_s2, %s3087_s25 }
  0x90   : > { %s303_s1 = scalar_lea.vmem [#allocation8], %s3022_s20  ;;  %p5471_p0 = scmp.lt.s32.totalorder %s4310_s11, 2 }
  0x91   : > { %s310_s30 = sshll.u32 %s303_s1, 4  ;;  %s5473_s24 = sand.u32 1, %s4310_s11   ;;  %s4604_s30 = int_to_ptr.vmem [resolvable:$true] %s310_s30 }
  0x92   : > { %p4600_p4 = pnand %p5471_p0, %p82_p13  ;;  %s4608_s5 = scalar_lea.sflag [#allocation4], %s5473_s24 }
  0x93   : > { %s4142_s29 = scalar_lea.hbm %s4596_s21, 4096  ;;  %s4147_s25 = scalar_lea.hbm %s5432_s2, 8192 }
  0x94   : > { %p4143_p2 = scmp.ne.s32.totalorder %s4596_s21, %s4142_s29  ;;  %p4144_p1 = pneg %p4600_p4 }
  0x95   : > { %p4148_p9 = scmp.lt.u32.totalorder %s4596_s21, %s5432_s2  ;;  %p4149_p5 = scmp.lt.u32.totalorder %s4147_s25, %s4142_s29 }
  0x96   : > { %p4145_p8 = pnand %p4144_p1, %p4143_p2  ;;  %p4151_p7 = scmp.lt.u32.totalorder %s4142_s29, %s4596_s21 }
  0x97   : > { %p4150_p6 = por %p4149_p5, %p4148_p9 }
  0x98   : > { %p4146_p3 = pneg %p4145_p8 }
  0x99   : > { %p4152_p12 = por %p4151_p7, %p4150_p6 }
  0x9b   : > { %p4153_p10 = pnand %p4152_p12, %p4146_p3 }
  0x9d   : > { %4156 = shalt.err (!%p4153_p10)
}
  0x9e   : > { %s4157_s1 = scalar_lea.vmem %s4604_s30, 4096  ;;  %s4320_s24 = smov [#allocation8]  }
  0x9f   : > { %p4158_p11 = scmp.ne.s32.totalorder %s4604_s30, %s4157_s1  ;;  %s4162_s26 = sshll.u32 %s4320_s24, 4  ;;  %s4163_s26 = int_to_ptr.vmem [resolvable:$false] %s4162_s26 }
  0xa0   : > { %s4164_s20 = scalar_lea.vmem %s4163_s26, 8192  ;;  %p4165_p2 = scmp.lt.s32.totalorder %s4604_s30, %s4163_s26 }
  0xa1   : > { %p4160_p13 = pnand %p4158_p11, %p4144_p1  ;;  %p4166_p8 = scmp.lt.s32.totalorder %s4164_s20, %s4157_s1 }
  0xa3   : > { %p4161_p0 = pneg %p4160_p13  ;;  %p4167_p9 = por %p4166_p8, %p4165_p2 }
  0xa5   : > { %p4168_p5 = pnand %p4167_p9, %p4161_p0 }
  0xa7   : > { %4171 = shalt.err (!%p4168_p5)
}
  0xa8   : > { %s4321_s29 = smov 256   ;;  %s4322_s25 = smov 16  }
  0xa9   : > { %3797 = dma.hbm_to_vmem [thread:$0]  (!%p4600_p4), %s4596_s21, 4096, %s4604_s30, %s4608_s5, %s4321_s29, %s4321_s29, %s4322_s25  }
  0xaa   : > { %s3029_s22 = sshll.u32 %s301_s19, 9  ;;  %s3089_s16 = sshll.u32 %s4310_s11, 13 }
  0xab   : > { %s4642_s1 = scalar_lea.hbm %s5436_s6, %s3089_s16  ;;  %s355_s20 = scalar_lea.vmem [#allocation12], %s3029_s22 }
  0xac   : > { %s362_s0 = sshll.u32 %s355_s20, 4  ;;  %s4172_s23 = scalar_lea.hbm %s4642_s1, 8192  ;;  %s4644_s0 = int_to_ptr.vmem [resolvable:$true] %s362_s0 }
  0xad   : > { %p4173_p3 = scmp.ne.s32.totalorder %s4642_s1, %s4172_s23  ;;  %s4177_s21 = scalar_lea.hbm %s5436_s6, 16384 }
  0xae   : > { %p4178_p12 = scmp.lt.u32.totalorder %s4642_s1, %s5436_s6  ;;  %p4179_p10 = scmp.lt.u32.totalorder %s4177_s21, %s4172_s23 }
  0xaf   : > { %p4175_p6 = pnand %p4173_p3, %p4144_p1  ;;  %p4181_p13 = scmp.lt.u32.totalorder %s4172_s23, %s4642_s1 }
  0xb0   : > { %p4180_p11 = por %p4179_p10, %p4178_p12 }
  0xb1   : > { %p4176_p7 = pneg %p4175_p6 }
  0xb2   : > { %p4182_p0 = por %p4181_p13, %p4180_p11 }
  0xb4   : > { %p4183_p2 = pnand %p4182_p0, %p4176_p7 }
  0xb6   : > { %4186 = shalt.err (!%p4183_p2)
}
  0xb7   : > { %s4187_s29 = scalar_lea.vmem %s4644_s0, 8192  ;;  %s4323_s25 = smov [#allocation12]  }
  0xb8   : > { %p4188_p8 = scmp.ne.s32.totalorder %s4644_s0, %s4187_s29  ;;  %s4192_s22 = sshll.u32 %s4323_s25, 4  ;;  %s4193_s22 = int_to_ptr.vmem [resolvable:$false] %s4192_s22 }
  0xb9   : > { %s4194_s16 = scalar_lea.vmem %s4193_s22, 16384  ;;  %p4195_p3 = scmp.lt.s32.totalorder %s4644_s0, %s4193_s22 }
  0xba   : > { %p4190_p9 = pnand %p4188_p8, %p4144_p1  ;;  %p4196_p6 = scmp.lt.s32.totalorder %s4194_s16, %s4187_s29 }
  0xbc   : > { %p4191_p5 = pneg %p4190_p9  ;;  %p4197_p12 = por %p4196_p6, %p4195_p3 }
  0xbe   : > { %p4198_p10 = pnand %p4197_p12, %p4191_p5 }
  0xc0   : > { %4201 = shalt.err (!%p4198_p10)
}
  0xc1   : > { %s5474_s23 = smov 32   ;;  %s5475_s24 = smov 512  }
  0xc2   : > { %3803 = dma.hbm_to_vmem [thread:$0]  (!%p4600_p4), %s4642_s1, 8192, %s4644_s0, %s4527_s17, %s5475_s24, %s5475_s24, %s5474_s23  }
  0xc3   : > { %p5476_p1 = scmp.ne.s32.totalorder %s5458_s15, 0 }
  0xc4   : > { %p5477_p7 = scmp.eq.s32.totalorder (!%p5476_p1), %s4407_s12, 0 }
  0xc5   : > { %381 = sbr.rel (%p5476_p1) target bundleno = 3162 (0xc5a), region = 52 }
  0xcc   : > { %4257 = dma.done.wait (%p5477_p7), [#allocation4], 128   ;;  %p5478_p11 = pmov %p5477_p7 }
  0xcd   : > { %p5479_p13 = pmov %p5477_p7 }
  0xce   : > { %4259 = vsyncadd (%p5478_p11), [#allocation4], 4294967168 }
  0xcf   : > { %4261 = dma.done.wait (%p5479_p13), [#allocation7], 1024   ;;  %p5480_p0 = pmov %p5477_p7 }
  0xd0   : > { %s391_s27 = sand.u32 1, %s4407_s12   ;;  %s393_s17 = sand.u32 1, %s4302_s9  }
  0xd1   : > { %4263 = vsyncadd (%p5480_p0), [#allocation7], 4294966272  ;;  %s3035_s0 = sshll.u32 %s393_s17, 8  ;;  %s392_s15 = scalar_lea.sflag [#allocation4], %s391_s27 }
  0xd2   : > { %s4685_s26 = scalar_lea.vmem [#allocation8], %s3035_s0  ;;  %p5481_p4 = scmp.ne.s32.totalorder %s5456_s13, 0 }
  0xd4   : > { %4265 = dma.done.wait (%p5481_p4), %s392_s15, 4096  }
  0xd5   : > { %4267 = vsyncadd (%p5481_p4), %s392_s15, 4294963200  ;;  %p5482_p2 = pmov %p5480_p0 }
  0xd6   : > { %p5483_p8 = pmov %p5480_p0 }
  0xd7   : > { %4269 = dma.done.wait (%p5482_p2), [#allocation7], 8192  }
  0xd8   : > { %4271 = vsyncadd (%p5483_p8), [#allocation7], 4294959104  ;;  %s406_s1 = sand.u32 1, %s4290_s28   ;;  %s405_s11 = scalar_lea.sflag [#allocation11], %s391_s27 }
  0xd9   : > { %s3037_s20 = sshll.u32 %s406_s1, 9  ;;  %p5484_p9 = scmp.ne.s32.totalorder %s5457_s14, 0 }
  0xda   : > { %s4696_s19 = scalar_lea.vmem [#allocation10], %s3037_s20 }
  0xdb   : > { %4273 = dma.done.wait (%p5484_p9), %s405_s11, 8192  }
  0xdc   : > { %4275 = vsyncadd (%p5484_p9), %s405_s11, 4294959104  ;;  %s3038_s21 = sshll.u32 %s393_s17, 9 }
  0xdd   : > { %s4702_s30 = scalar_lea.vmem [#allocation12], %s3038_s21 }
  0xde   : > { %4277 = dma.done.wait (%p5481_p4), %s405_s11, 8192  }
  0xdf   : > { %4279 = vsyncadd (%p5481_p4), %s405_s11, 4294959104  ;;  %p463_p5 = scmp.lt.s32.totalorder %s4407_s12, 1  ;;  %v4324_v0 = vmov 0.0   ;;  %v476_v1 = vld [vmem:[%s4685_s26 + $0x8] sm:$0xff]  ;;  %v478_v2 = vld [vmem:[%s4685_s26 + $0x18] sm:$0xff]  ;;  %v509_v50 = vlaneseq  ;;  %p5485_p3 = scmp.ne.s32.totalorder %s4407_s12, 0 }
  0xe0   : > { %583 = vmatprep.mubr.f32.mxu0 %v4324_v0  ;;  %v475_v3 = vld [vmem:[%s4685_s26] sm:$0xff]  ;;  %v3090_v4 = vpack.c.bf16 %v478_v2, %v476_v1  ;;  %v477_v5 = vld [vmem:[%s4685_s26 + $0x10] sm:$0xff]  ;;  %v480_v6 = vld [vmem:[%s4685_s26 + $0x28] sm:$0xff] }
  0xe1   : > { %s4711_s14 = scalar_select %p463_p5, %s4407_s12, 1  ;;  %v482_v7 = vld [vmem:[%s4685_s26 + $0x38] sm:$0xff]  ;;  %v3092_v8 = vpack.c.bf16 %v477_v5, %v475_v3  ;;  %v479_v10 = vld [vmem:[%s4685_s26 + $0x20] sm:$0xff]  ;;  %v481_v11 = vld [vmem:[%s4685_s26 + $0x30] sm:$0xff]  ;;  %v4752_v51 = vshrl.u32 %v509_v50, 7 }
  0xe2   : > { %v3094_v9 = vpack.c.bf16 %v482_v7, %v480_v6  ;;  %v484_v12 = vld [vmem:[%s4685_s26 + $0x48] sm:$0xff]  ;;  %3091 = vmatprep.subr.bf16.mxu0 %v3090_v4  ;;  %v486_v13 = vld [vmem:[%s4685_s26 + $0x58] sm:$0xff]  ;;  %v3096_v14 = vpack.c.bf16 %v481_v11, %v479_v10  ;;  %v483_v16 = vld [vmem:[%s4685_s26 + $0x40] sm:$0xff]  ;;  %v4325_v5 = vmov (!%p5485_p3), 0.0  }
  0xe3   : > { %s3040_s13 = sshll.u32 %s4711_s14, 2  ;;  %3093 = vmatpush1.bf16.msra.mxu0 %v3092_v8  ;;  %v3098_v15 = vpack.c.bf16 %v486_v13, %v484_v12  ;;  %v485_v17 = vld [vmem:[%s4685_s26 + $0x50] sm:$0xff]  ;;  %v488_v18 = vld [vmem:[%s4685_s26 + $0x68] sm:$0xff]  ;;  %v490_v19 = vld [vmem:[%s4685_s26 + $0x78] sm:$0xff]  ;;  %s3039_s22 = sshll.u32 %s4711_s14, 1  ;;  %v4758_v52 = vsub.s32 0, %v4752_v51  ;;  %865 = vmatprep.mubr.f32.mxu1 (!%p5485_p3), %v4325_v5 }
  0xe4   : > { %s4717_s25 = scalar_lea.vmem %s5437_s7, %s3040_s13  ;;  %3095 = vmatprep.subr.bf16.mxu0 %v3094_v9  ;;  %v3100_v20 = vpack.c.bf16 %v485_v17, %v483_v16  ;;  %v3102_v21 = vpack.c.bf16 %v490_v19, %v488_v18  ;;  %v487_v22 = vld [vmem:[%s4685_s26 + $0x60] sm:$0xff]  ;;  %v489_v23 = vld [vmem:[%s4685_s26 + $0x70] sm:$0xff]  ;;  %v492_v24 = vld [vmem:[%s4685_s26 + $0x88] sm:$0xff]  ;;  %s466_s24 = scalar_lea.vmem %s5433_s3, %s3039_s22  ;;  %v4761_v54 = vsub.s32 1, %v4752_v51 }
  0xe5   : > { %v494_v25 = vld [vmem:[%s4685_s26 + $0x98] sm:$0xff]  ;;  %v3104_v26 = vpack.c.bf16 %v489_v23, %v487_v22  ;;  %v491_v28 = vld [vmem:[%s4685_s26 + $0x80] sm:$0xff]  ;;  %v493_v29 = vld [vmem:[%s4685_s26 + $0x90] sm:$0xff] }
  0xe6   : > { %v3106_v27 = vpack.c.bf16 %v494_v25, %v492_v24  ;;  %v496_v30 = vld [vmem:[%s4685_s26 + $0xa8] sm:$0xff]  ;;  %v498_v31 = vld [vmem:[%s4685_s26 + $0xb8] sm:$0xff]  ;;  %v3108_v32 = vpack.c.bf16 %v493_v29, %v491_v28  ;;  %v495_v34 = vld [vmem:[%s4685_s26 + $0xa0] sm:$0xff] }
  0xe7   : > { %3097 = vmatpush1.bf16.msra.mxu0 %v3096_v14  ;;  %v3110_v33 = vpack.c.bf16 %v498_v31, %v496_v30  ;;  %v497_v35 = vld [vmem:[%s4685_s26 + $0xb0] sm:$0xff]  ;;  %v500_v36 = vld [vmem:[%s4685_s26 + $0xc8] sm:$0xff]  ;;  %v502_v37 = vld [vmem:[%s4685_s26 + $0xd8] sm:$0xff] }
  0xe8   : > { %3099 = vmatprep.subr.bf16.mxu0 %v3098_v15  ;;  %v3112_v38 = vpack.c.bf16 %v497_v35, %v495_v34  ;;  %v3114_v39 = vpack.c.bf16 %v502_v37, %v500_v36  ;;  %v499_v40 = vld [vmem:[%s4685_s26 + $0xc0] sm:$0xff]  ;;  %v501_v41 = vld [vmem:[%s4685_s26 + $0xd0] sm:$0xff]  ;;  %v504_v42 = vld [vmem:[%s4685_s26 + $0xe8] sm:$0xff] }
  0xe9   : > { %v506_v43 = vld [vmem:[%s4685_s26 + $0xf8] sm:$0xff]  ;;  %v3116_v44 = vpack.c.bf16 %v501_v41, %v499_v40  ;;  %v503_v46 = vld [vmem:[%s4685_s26 + $0xe0] sm:$0xff]  ;;  %v505_v47 = vld [vmem:[%s4685_s26 + $0xf0] sm:$0xff] }
  0xea   : > { %v3118_v45 = vpack.c.bf16 %v506_v43, %v504_v42  ;;  %v3120_v48 = vpack.c.bf16 %v505_v47, %v503_v46  ;;  %v474_v49 = vld [vmem:[#allocation3] sm:$0xff]  ;;  %v603_v61 = vld [vmem:[#allocation9 + $0x8] sm:$0xff] (!%p5485_p3)  ;;  %v602_v3 = vld [vmem:[#allocation9] sm:$0xff] (!%p5485_p3) }
  0xeb   : > { %3101 = vmatpush1.bf16.msra.mxu0 %v3100_v20  ;;  %v507_v53 = vld [vmem:[%s466_s24] sm:$0x3]  ;;  %v607_v62 = vld [vmem:[#allocation9 + $0x28] sm:$0xff] (!%p5485_p3)  ;;  %v606_v4 = vld [vmem:[#allocation9 + $0x20] sm:$0xff] (!%p5485_p3) }
  0xec   : > { %3103 = vmatprep.subr.bf16.mxu0 %v3102_v21  ;;  %v512_v55 = vrot.slane %v507_v53, %v4758_v52  ;;  %v516_v56 = vrot.slane %v507_v53, %v4761_v54  ;;  %v605_v63 = vld [vmem:[#allocation9 + $0x18] sm:$0xff] (!%p5485_p3)  ;;  %v3122_v1 = vpack.c.bf16 (!%p5485_p3), %v607_v62, %v603_v61  ;;  %v3124_v7 = vpack.c.bf16 (!%p5485_p3), %v606_v4, %v602_v3  ;;  %v604_v8 = vld [vmem:[#allocation9 + $0x10] sm:$0xff] (!%p5485_p3)  ;;  %v611_v10 = vld [vmem:[#allocation9 + $0x48] sm:$0xff] (!%p5485_p3) }
  0xed   : > { %v609_v2 = vld [vmem:[#allocation9 + $0x38] sm:$0xff] (!%p5485_p3)  ;;  %v608_v9 = vld [vmem:[#allocation9 + $0x30] sm:$0xff] (!%p5485_p3)  ;;  %v615_v12 = vld [vmem:[#allocation9 + $0x68] sm:$0xff] (!%p5485_p3) }
  0xee   : > { %v3154_v6 = vpack.c.bf16 (!%p5485_p3), %v609_v2, %v605_v63  ;;  %v3156_v11 = vpack.c.bf16 (!%p5485_p3), %v608_v9, %v604_v8  ;;  %v613_v13 = vld [vmem:[#allocation9 + $0x58] sm:$0xff] (!%p5485_p3)  ;;  %v3126_v15 = vpack.c.bf16 (!%p5485_p3), %v615_v12, %v611_v10  ;;  %v610_v17 = vld [vmem:[#allocation9 + $0x40] sm:$0xff] (!%p5485_p3)  ;;  %v612_v19 = vld [vmem:[#allocation9 + $0x50] sm:$0xff] (!%p5485_p3) }
  0xef   : > { %3105 = vmatpush1.bf16.msra.mxu0 %v3104_v26  ;;  %v617_v14 = vld [vmem:[#allocation9 + $0x78] sm:$0xff] (!%p5485_p3)  ;;  %v614_v18 = vld [vmem:[#allocation9 + $0x60] sm:$0xff] (!%p5485_p3)  ;;  %v616_v21 = vld [vmem:[#allocation9 + $0x70] sm:$0xff] (!%p5485_p3) }
  0xf0   : > { %3107 = vmatprep.subr.bf16.mxu0 %v3106_v27  ;;  %3155 = vmatprep.subr.bf16.mxu1 (!%p5485_p3), %v3154_v6  ;;  %v3158_v16 = vpack.c.bf16 (!%p5485_p3), %v617_v14, %v613_v13  ;;  %v3128_v20 = vpack.c.bf16 (!%p5485_p3), %v614_v18, %v610_v17  ;;  %v619_v22 = vld [vmem:[#allocation9 + $0x88] sm:$0xff] (!%p5485_p3)  ;;  %v3160_v24 = vpack.c.bf16 (!%p5485_p3), %v616_v21, %v612_v19  ;;  %v621_v26 = vld [vmem:[#allocation9 + $0x98] sm:$0xff] (!%p5485_p3)  ;;  %v618_v28 = vld [vmem:[#allocation9 + $0x80] sm:$0xff] (!%p5485_p3) }
  0xf1   : > { %3157 = vmatpush1.bf16.msra.mxu1 (!%p5485_p3), %v3156_v11  ;;  %v623_v23 = vld [vmem:[#allocation9 + $0xa8] sm:$0xff] (!%p5485_p3)  ;;  %v625_v27 = vld [vmem:[#allocation9 + $0xb8] sm:$0xff] (!%p5485_p3)  ;;  %v622_v30 = vld [vmem:[#allocation9 + $0xa0] sm:$0xff] (!%p5485_p3) }
  0xf2   : > { %3159 = vmatprep.subr.bf16.mxu1 (!%p5485_p3), %v3158_v16  ;;  %v3130_v25 = vpack.c.bf16 (!%p5485_p3), %v623_v23, %v619_v22  ;;  %v3162_v29 = vpack.c.bf16 (!%p5485_p3), %v625_v27, %v621_v26  ;;  %v620_v31 = vld [vmem:[#allocation9 + $0x90] sm:$0xff] (!%p5485_p3)  ;;  %v627_v34 = vld [vmem:[#allocation9 + $0xc8] sm:$0xff] (!%p5485_p3)  ;;  %v629_v36 = vld [vmem:[#allocation9 + $0xd8] sm:$0xff] (!%p5485_p3) }
  0xf3   : > { %3109 = vmatpush1.bf16.msra.mxu0 %v3108_v32  ;;  %v624_v32 = vld [vmem:[#allocation9 + $0xb0] sm:$0xff] (!%p5485_p3)  ;;  %v631_v35 = vld [vmem:[#allocation9 + $0xe8] sm:$0xff] (!%p5485_p3)  ;;  %v626_v40 = vld [vmem:[#allocation9 + $0xc0] sm:$0xff] (!%p5485_p3) }
  0xf4   : > { %3111 = vmatprep.subr.bf16.mxu0 %v3110_v33  ;;  %v3132_v33 = vpack.c.bf16 (!%p5485_p3), %v622_v30, %v618_v28  ;;  %v3164_v37 = vpack.c.bf16 (!%p5485_p3), %v624_v32, %v620_v31  ;;  %v630_v41 = vld [vmem:[#allocation9 + $0xe0] sm:$0xff] (!%p5485_p3)  ;;  %v628_v43 = vld [vmem:[#allocation9 + $0xd0] sm:$0xff] (!%p5485_p3)  ;;  %v639_v46 = vld [vmem:[#allocation9 + $0x128] sm:$0xff] (!%p5485_p3) }
  0xf5   : > { %3161 = vmatpush1.bf16.msra.mxu1 (!%p5485_p3), %v3160_v24  ;;  %v637_v47 = vld [vmem:[#allocation9 + $0x118] sm:$0xff] (!%p5485_p3)  ;;  %v640_v61 = vld [vmem:[#allocation9 + $0x130] sm:$0xff] (!%p5485_p3)  ;;  %v643_v62 = vld [vmem:[#allocation9 + $0x148] sm:$0xff] (!%p5485_p3) }
  0xf6   : > { %3163 = vmatprep.subr.bf16.mxu1 (!%p5485_p3), %v3162_v29  ;;  %v647_v63 = vld [vmem:[#allocation9 + $0x168] sm:$0xff] (!%p5485_p3)  ;;  %v649_v2 = vld [vmem:[#allocation9 + $0x178] sm:$0xff] (!%p5485_p3)  ;;  %v646_v8 = vld [vmem:[#allocation9 + $0x160] sm:$0xff] (!%p5485_p3) }
  0xf7   : > { %3113 = vmatpush1.bf16.msra.mxu0 %v3112_v38  ;;  %v3134_v38 = vpack.c.bf16 (!%p5485_p3), %v631_v35, %v627_v34  ;;  %v3142_v6 = vpack.c.bf16 (!%p5485_p3), %v647_v63, %v643_v62  ;;  %v644_v9 = vld [vmem:[#allocation9 + $0x150] sm:$0xff] (!%p5485_p3)  ;;  %v651_v12 = vld [vmem:[#allocation9 + $0x188] sm:$0xff] (!%p5485_p3)  ;;  %v653_v14 = vld [vmem:[#allocation9 + $0x198] sm:$0xff] (!%p5485_p3) }
  0xf8   : > { %3115 = vmatprep.subr.bf16.mxu0 %v3114_v39  ;;  %v633_v39 = vld [vmem:[#allocation9 + $0xf8] sm:$0xff] (!%p5485_p3)  ;;  %v648_v11 = vld [vmem:[#allocation9 + $0x170] sm:$0xff] (!%p5485_p3)  ;;  %v655_v13 = vld [vmem:[#allocation9 + $0x1a8] sm:$0xff] (!%p5485_p3) }
  0xf9   : > { %v3166_v42 = vpack.c.bf16 (!%p5485_p3), %v633_v39, %v629_v36  ;;  %3165 = vmatpush1.bf16.msra.mxu1 (!%p5485_p3), %v3164_v37  ;;  %v3176_v17 = vpack.c.bf16 (!%p5485_p3), %v648_v11, %v644_v9  ;;  %v3146_v18 = vpack.c.bf16 (!%p5485_p3), %v655_v13, %v651_v12  ;;  %v650_v19 = vld [vmem:[#allocation9 + $0x180] sm:$0xff] (!%p5485_p3)  ;;  %v652_v21 = vld [vmem:[#allocation9 + $0x190] sm:$0xff] (!%p5485_p3)  ;;  %v659_v24 = vld [vmem:[#allocation9 + $0x1c8] sm:$0xff] (!%p5485_p3) }
  0xfa   : > { %v656_v23 = vld [vmem:[#allocation9 + $0x1b0] sm:$0xff] (!%p5485_p3)  ;;  %v661_v26 = vld [vmem:[#allocation9 + $0x1d8] sm:$0xff] (!%p5485_p3)  ;;  %v658_v31 = vld [vmem:[#allocation9 + $0x1c0] sm:$0xff] (!%p5485_p3) }
  0xfb   : > { %3117 = vmatpush1.bf16.msra.mxu0 %v3116_v44  ;;  %v632_v44 = vld [vmem:[#allocation9 + $0xf0] sm:$0xff] (!%p5485_p3)  ;;  %3167 = vmatprep.subr.bf16.mxu1 (!%p5485_p3), %v3166_v42  ;;  %v665_v27 = vld [vmem:[#allocation9 + $0x1f8] sm:$0xff] (!%p5485_p3)  ;;  %v3180_v29 = vpack.c.bf16 (!%p5485_p3), %v656_v23, %v652_v21  ;;  %v662_v32 = vld [vmem:[#allocation9 + $0x1e0] sm:$0xff] (!%p5485_p3) }
  0xfc   : > { %3119 = vmatprep.subr.bf16.mxu0 %v3118_v45  ;;  %v635_v45 = vld [vmem:[#allocation9 + $0x108] sm:$0xff] (!%p5485_p3)  ;;  %v3168_v50 = vpack.c.bf16 (!%p5485_p3), %v632_v44, %v628_v43  ;;  %v660_v34 = vld [vmem:[#allocation9 + $0x1d0] sm:$0xff] (!%p5485_p3)  ;;  %v3152_v36 = vpack.c.bf16 (!%p5485_p3), %v662_v32, %v658_v31  ;;  %v598_v42 = vld [vmem:[#allocation6 + $0x20] sm:$0xff] (!%p5485_p3) }
  0xfd   : > { %v3138_v53 = vpack.c.bf16 (!%p5485_p3), %v639_v46, %v635_v45  ;;  %v664_v35 = vld [vmem:[#allocation9 + $0x1f0] sm:$0xff] (!%p5485_p3)  ;;  %v595_v39 = vld [vmem:[#allocation6 + $0x8] sm:$0xff] (!%p5485_p3)  ;;  %v601_v45 = vld [vmem:[#allocation6 + $0x38] sm:$0xff] (!%p5485_p3) }
  0xfe   : > { %3169 = vmatpush1.bf16.msra.mxu1 (!%p5485_p3), %v3168_v50  ;;  %v3184_v37 = vpack.c.bf16 (!%p5485_p3), %v664_v35, %v660_v34  ;;  %v599_v43 = vld [vmem:[#allocation6 + $0x28] sm:$0xff] (!%p5485_p3)  ;;  %v600_v44 = vld [vmem:[#allocation6 + $0x30] sm:$0xff] (!%p5485_p3)  ;;  %v666_v46 = vld [vmem:[%s4717_s25] sm:$0xf] (!%p5485_p3) }
  0xff   : > { %3121 = vmatpush1.bf16.msra.mxu0 %v3120_v48  ;;  %v641_v48 = vld [vmem:[#allocation9 + $0x138] sm:$0xff] (!%p5485_p3) }
 0x100   : > { %3123 = vmatprep.subr.bf16.mxu0 (!%p5485_p3), %v3122_v1  ;;  %v645_v1 = vld [vmem:[#allocation9 + $0x158] sm:$0xff] (!%p5485_p3) }
 0x101   : > { %v3174_v10 = vpack.c.bf16 (!%p5485_p3), %v649_v2, %v645_v1 }
 0x102   : > { %584 = vmatmul.mubr.f32.vlgmr.msra.gmra.mrb[0].mxu0 %v474_v49  ;;  %v3136_v49 = vpack.c.bf16 (!%p5485_p3), %v630_v41, %v626_v40  ;;  %v596_v40 = vld [vmem:[#allocation6 + $0x10] sm:$0xff] (!%p5485_p3)  ;;  %v597_v41 = vld [vmem:[#allocation6 + $0x18] sm:$0xff] (!%p5485_p3) }
 0x103   : > { %752 = vmatprep.mubr.f32.mxu0 (!%p5485_p3), %v4325_v5  ;;  %3125 = vmatpush1.bf16.msra.mxu0 (!%p5485_p3), %v3124_v7  ;;  %v642_v7 = vld [vmem:[#allocation9 + $0x140] sm:$0xff] (!%p5485_p3) }
 0x104   : > { %3127 = vmatprep.subr.bf16.mxu0 (!%p5485_p3), %v3126_v15  ;;  %v657_v15 = vld [vmem:[#allocation9 + $0x1b8] sm:$0xff] (!%p5485_p3)  ;;  %v3144_v16 = vpack.c.bf16 (!%p5485_p3), %v646_v8, %v642_v7 }
 0x105   : > { %v3178_v22 = vpack.c.bf16 (!%p5485_p3), %v657_v15, %v653_v14 }
 0x107   : > { %3129 = vmatpush1.bf16.msra.mxu0 (!%p5485_p3), %v3128_v20  ;;  %v654_v20 = vld [vmem:[#allocation9 + $0x1a0] sm:$0xff] (!%p5485_p3) }
 0x108   : > { %3131 = vmatprep.subr.bf16.mxu0 (!%p5485_p3), %v3130_v25  ;;  %v663_v25 = vld [vmem:[#allocation9 + $0x1e8] sm:$0xff] (!%p5485_p3)  ;;  %v3148_v28 = vpack.c.bf16 (!%p5485_p3), %v654_v20, %v650_v19 }
 0x109   : > { %v3150_v30 = vpack.c.bf16 (!%p5485_p3), %v663_v25, %v659_v24 }
 0x10b   : > { %3133 = vmatpush1.bf16.msra.mxu0 (!%p5485_p3), %v3132_v33  ;;  %v3182_v33 = vpack.c.bf16 (!%p5485_p3), %v665_v27, %v661_v26 }
 0x10c   : > { %3135 = vmatprep.subr.bf16.mxu0 (!%p5485_p3), %v3134_v38  ;;  %v594_v38 = vld [vmem:[#allocation6] sm:$0xff] (!%p5485_p3) }
 0x10f   : > { %3137 = vmatpush1.bf16.msra.mxu0 (!%p5485_p3), %v3136_v49  ;;  %v4791_v49 = vrot.slane (!%p5485_p3), %v666_v46, %v4758_v52 }
 0x110   : > { %3139 = vmatprep.subr.bf16.mxu0 (!%p5485_p3), %v3138_v53  ;;  %v4796_v53 = vrot.slane (!%p5485_p3), %v666_v46, %v4761_v54 }
 0x1d1   : > { %593 = sbr.rel (%p5485_p3) target bundleno = 733 (0x2dd), region = 80 }
 0x1d5   : > { %v585_v57 = vpop.f32.mrb[0].mxu0 }
 0x1d6   : > { %v4765_v58 = vadd.f32 %v585_v57, %v512_v55  ;;  %v587_v59 = vpop.f32.mrb[1].mxu0  ;;  %v634_v55 = vld [vmem:[#allocation9 + $0x100] sm:$0xff] (!%p5485_p3)  ;;  %v636_v57 = vld [vmem:[#allocation9 + $0x110] sm:$0xff] (!%p5485_p3) }
 0x1d7   : > { %v4767_v60 = vadd.f32 %v587_v59, %v516_v56  ;;  %v638_v56 = vld [vmem:[#allocation9 + $0x120] sm:$0xff] (!%p5485_p3)  ;;  %v3170_v59 = vpack.c.bf16 (!%p5485_p3), %v641_v48, %v637_v47  ;;  %v3172_v4 = vpack.c.bf16 (!%p5485_p3), %v640_v61, %v636_v57  ;;  %v678_v47 = vsub.s32 (!%p5485_p3), 2, %v4752_v51 }
 0x1d8   : > { %v3140_v3 = vpack.c.bf16 %v638_v56, %v634_v55  ;;  %v682_v48 = vsub.s32 3, %v4752_v51 }
 0x1d9   : > { %3171 = vmatprep.subr.bf16.mxu1 %v3170_v59  ;;  %v4793_v50 = vrot.slane %v666_v46, %v678_v47 }
 0x1da   : > { %3141 = vmatpush1.bf16.msra.mxu0 %v3140_v3  ;;  %3173 = vmatpush1.bf16.msra.mxu1 %v3172_v4  ;;  %v4798_v55 = vrot.slane %v666_v46, %v682_v48 }
 0x1db   : > { %3143 = vmatprep.subr.bf16.mxu0 %v3142_v6  ;;  %3175 = vmatprep.subr.bf16.mxu1 %v3174_v10 }
 0x1de   : > { %3145 = vmatpush1.bf16.msra.mxu0 %v3144_v16  ;;  %3177 = vmatpush1.bf16.msra.mxu1 %v3176_v17 }
 0x1df   : > { %3147 = vmatprep.subr.bf16.mxu0 %v3146_v18  ;;  %3179 = vmatprep.subr.bf16.mxu1 %v3178_v22 }
 0x1e2   : > { %3149 = vmatpush1.bf16.msra.mxu0 %v3148_v28  ;;  %3181 = vmatpush1.bf16.msra.mxu1 %v3180_v29 }
 0x1e3   : > { %3151 = vmatprep.subr.bf16.mxu0 %v3150_v30  ;;  %3183 = vmatprep.subr.bf16.mxu1 %v3182_v33 }
 0x1e6   : > { %3153 = vmatpush1.bf16.msra.mxu0 %v3152_v36  ;;  %3185 = vmatpush1.bf16.msra.mxu1 %v3184_v37 }
 0x1e9   : > { %753 = vmatmul.mubr.f32.vlgmr.msra.gmra.mrb[0].mxu0 %v594_v38  ;;  %866 = vmatmul.mubr.f32.vlgmr.msra.gmra.mrb[0].mxu1 %v594_v38 }
 0x1ea   : > { %758 = vmatprep.mubr.f32.mxu0 %v4325_v5  ;;  %871 = vmatprep.mubr.f32.mxu1 %v4325_v5 }
 0x1ed   : > { %759 = vmatmul.mubr.f32.gmra.mrb[2].mxu0 %v595_v39  ;;  %872 = vmatmul.mubr.f32.gmra.mrb[2].mxu1 %v595_v39 }
 0x1ee   : > { %764 = vmatprep.mubr.f32.mxu0 %v4325_v5  ;;  %877 = vmatprep.mubr.f32.mxu1 %v4325_v5 }
 0x1f1   : > { %765 = vmatmul.mubr.f32.gmra.mrb[4].mxu0 %v596_v40  ;;  %878 = vmatmul.mubr.f32.gmra.mrb[4].mxu1 %v596_v40 }
 0x1f2   : > { %770 = vmatprep.mubr.f32.mxu0 %v4325_v5  ;;  %883 = vmatprep.mubr.f32.mxu1 %v4325_v5 }
 0x1f5   : > { %771 = vmatmul.mubr.f32.gmra.mrb[6].mxu0 %v597_v41  ;;  %884 = vmatmul.mubr.f32.gmra.mrb[6].mxu1 %v597_v41 }
 0x1f6   : > { %776 = vmatprep.mubr.f32.mxu0 %v4325_v5  ;;  %889 = vmatprep.mubr.f32.mxu1 %v4325_v5 }
 0x1f9   : > { %777 = vmatmul.mubr.f32.gmra.mrb[8].mxu0 %v598_v42  ;;  %890 = vmatmul.mubr.f32.gmra.mrb[8].mxu1 %v598_v42 }
 0x1fa   : > { %782 = vmatprep.mubr.f32.mxu0 %v4325_v5  ;;  %895 = vmatprep.mubr.f32.mxu1 %v4325_v5 }
 0x1fd   : > { %783 = vmatmul.mubr.f32.gmra.mrb[10].mxu0 %v599_v43  ;;  %896 = vmatmul.mubr.f32.gmra.mrb[10].mxu1 %v599_v43 }
 0x1fe   : > { %788 = vmatprep.mubr.f32.mxu0 %v4325_v5  ;;  %901 = vmatprep.mubr.f32.mxu1 %v4325_v5 }
 0x201   : > { %789 = vmatmul.mubr.f32.gmra.mrb[12].mxu0 %v600_v44  ;;  %902 = vmatmul.mubr.f32.gmra.mrb[12].mxu1 %v600_v44 }
 0x202   : > { %794 = vmatprep.mubr.f32.mxu0 %v4325_v5  ;;  %907 = vmatprep.mubr.f32.mxu1 %v4325_v5 }
 0x205   : > { %795 = vmatmul.mubr.f32.gmra.mrb[14].mxu0 %v601_v45  ;;  %908 = vmatmul.mubr.f32.gmra.mrb[14].mxu1 %v601_v45 }
 0x2bc   : > { %v754_v56 = vpop.f32.mrb[0].mxu0  ;;  %v867_v57 = vpop.f32.mrb[0].mxu1 }
 0x2bd   : > { %v755_v5 = vadd.f32 %v754_v56, %v4791_v49  ;;  %v756_v59 = vpop.f32.mrb[1].mxu0  ;;  %v868_v61 = vadd.f32 %v867_v57, %v4793_v50  ;;  %v869_v63 = vpop.f32.mrb[1].mxu1 }
 0x2be   : > { %v757_v62 = vadd.f32 %v756_v59, %v4796_v53  ;;  %v870_v1 = vadd.f32 %v869_v63, %v4798_v55 }
 0x2bf   : > { %914 = vst [vmem:[#allocation2] sm:$0xff] %v755_v5  ;;  %916 = vst [vmem:[#allocation2 + $0x10] sm:$0xff] %v868_v61 }
 0x2c0   : > { %915 = vst [vmem:[#allocation2 + $0x8] sm:$0xff] %v757_v62  ;;  %v760_v2 = vpop.f32.mrb[2].mxu0  ;;  %917 = vst [vmem:[#allocation2 + $0x18] sm:$0xff] %v870_v1  ;;  %v873_v4 = vpop.f32.mrb[2].mxu1 }
 0x2c1   : > { %v761_v3 = vadd.f32 %v760_v2, %v4791_v49  ;;  %v762_v6 = vpop.f32.mrb[3].mxu0  ;;  %v874_v7 = vadd.f32 %v873_v4, %v4793_v50  ;;  %v875_v9 = vpop.f32.mrb[3].mxu1 }
 0x2c2   : > { %v763_v8 = vadd.f32 %v762_v6, %v4796_v53  ;;  %v876_v10 = vadd.f32 %v875_v9, %v4798_v55 }
 0x2c3   : > { %918 = vst [vmem:[#allocation2 + $0x20] sm:$0xff] %v761_v3  ;;  %920 = vst [vmem:[#allocation2 + $0x30] sm:$0xff] %v874_v7 }
 0x2c4   : > { %919 = vst [vmem:[#allocation2 + $0x28] sm:$0xff] %v763_v8  ;;  %v766_v11 = vpop.f32.mrb[4].mxu0  ;;  %921 = vst [vmem:[#allocation2 + $0x38] sm:$0xff] %v876_v10  ;;  %v879_v13 = vpop.f32.mrb[4].mxu1 }
 0x2c5   : > { %v767_v12 = vadd.f32 %v766_v11, %v4791_v49  ;;  %v768_v14 = vpop.f32.mrb[5].mxu0  ;;  %v880_v15 = vadd.f32 %v879_v13, %v4793_v50  ;;  %v881_v17 = vpop.f32.mrb[5].mxu1 }
 0x2c6   : > { %v769_v16 = vadd.f32 %v768_v14, %v4796_v53  ;;  %v882_v18 = vadd.f32 %v881_v17, %v4798_v55 }
 0x2c7   : > { %922 = vst [vmem:[#allocation2 + $0x40] sm:$0xff] %v767_v12  ;;  %924 = vst [vmem:[#allocation2 + $0x50] sm:$0xff] %v880_v15 }
 0x2c8   : > { %923 = vst [vmem:[#allocation2 + $0x48] sm:$0xff] %v769_v16  ;;  %v772_v19 = vpop.f32.mrb[6].mxu0  ;;  %925 = vst [vmem:[#allocation2 + $0x58] sm:$0xff] %v882_v18  ;;  %v885_v21 = vpop.f32.mrb[6].mxu1 }
 0x2c9   : > { %v773_v20 = vadd.f32 %v772_v19, %v4791_v49  ;;  %v774_v22 = vpop.f32.mrb[7].mxu0  ;;  %v886_v23 = vadd.f32 %v885_v21, %v4793_v50  ;;  %v887_v25 = vpop.f32.mrb[7].mxu1 }
 0x2ca   : > { %v775_v24 = vadd.f32 %v774_v22, %v4796_v53  ;;  %v888_v26 = vadd.f32 %v887_v25, %v4798_v55 }
 0x2cb   : > { %926 = vst [vmem:[#allocation2 + $0x60] sm:$0xff] %v773_v20  ;;  %928 = vst [vmem:[#allocation2 + $0x70] sm:$0xff] %v886_v23 }
 0x2cc   : > { %927 = vst [vmem:[#allocation2 + $0x68] sm:$0xff] %v775_v24  ;;  %v778_v27 = vpop.f32.mrb[8].mxu0  ;;  %929 = vst [vmem:[#allocation2 + $0x78] sm:$0xff] %v888_v26  ;;  %v891_v29 = vpop.f32.mrb[8].mxu1 }
 0x2cd   : > { %v779_v28 = vadd.f32 %v778_v27, %v4791_v49  ;;  %v780_v30 = vpop.f32.mrb[9].mxu0  ;;  %v892_v31 = vadd.f32 %v891_v29, %v4793_v50  ;;  %v893_v33 = vpop.f32.mrb[9].mxu1 }
 0x2ce   : > { %v781_v32 = vadd.f32 %v780_v30, %v4796_v53  ;;  %v894_v34 = vadd.f32 %v893_v33, %v4798_v55 }
 0x2cf   : > { %930 = vst [vmem:[#allocation2 + $0x80] sm:$0xff] %v779_v28  ;;  %932 = vst [vmem:[#allocation2 + $0x90] sm:$0xff] %v892_v31 }
 0x2d0   : > { %931 = vst [vmem:[#allocation2 + $0x88] sm:$0xff] %v781_v32  ;;  %v784_v35 = vpop.f32.mrb[10].mxu0  ;;  %933 = vst [vmem:[#allocation2 + $0x98] sm:$0xff] %v894_v34  ;;  %v897_v37 = vpop.f32.mrb[10].mxu1 }
 0x2d1   : > { %v785_v36 = vadd.f32 %v784_v35, %v4791_v49  ;;  %v786_v38 = vpop.f32.mrb[11].mxu0  ;;  %v898_v39 = vadd.f32 %v897_v37, %v4793_v50  ;;  %v899_v41 = vpop.f32.mrb[11].mxu1 }
 0x2d2   : > { %v787_v40 = vadd.f32 %v786_v38, %v4796_v53  ;;  %v900_v42 = vadd.f32 %v899_v41, %v4798_v55 }
 0x2d3   : > { %934 = vst [vmem:[#allocation2 + $0xa0] sm:$0xff] %v785_v36  ;;  %936 = vst [vmem:[#allocation2 + $0xb0] sm:$0xff] %v898_v39 }
 0x2d4   : > { %935 = vst [vmem:[#allocation2 + $0xa8] sm:$0xff] %v787_v40  ;;  %v790_v43 = vpop.f32.mrb[12].mxu0  ;;  %937 = vst [vmem:[#allocation2 + $0xb8] sm:$0xff] %v900_v42  ;;  %v903_v45 = vpop.f32.mrb[12].mxu1 }
 0x2d5   : > { %v791_v44 = vadd.f32 %v790_v43, %v4791_v49  ;;  %v792_v46 = vpop.f32.mrb[13].mxu0  ;;  %v904_v47 = vadd.f32 %v903_v45, %v4793_v50  ;;  %v905_v56 = vpop.f32.mrb[13].mxu1 }
 0x2d6   : > { %v793_v48 = vadd.f32 %v792_v46, %v4796_v53  ;;  %v906_v5 = vadd.f32 %v905_v56, %v4798_v55 }
 0x2d7   : > { %938 = vst [vmem:[#allocation2 + $0xc0] sm:$0xff] %v791_v44  ;;  %940 = vst [vmem:[#allocation2 + $0xd0] sm:$0xff] %v904_v47 }
 0x2d8   : > { %939 = vst [vmem:[#allocation2 + $0xc8] sm:$0xff] %v793_v48  ;;  %v796_v57 = vpop.f32.mrb[14].mxu0  ;;  %941 = vst [vmem:[#allocation2 + $0xd8] sm:$0xff] %v906_v5  ;;  %v909_v61 = vpop.f32.mrb[14].mxu1 }
 0x2d9   : > { %v797_v59 = vadd.f32 %v796_v57, %v4791_v49  ;;  %v798_v62 = vpop.f32.mrb[15].mxu0  ;;  %v910_v63 = vadd.f32 %v909_v61, %v4793_v50  ;;  %v911_v2 = vpop.f32.mrb[15].mxu1 }
 0x2da   : > { %v799_v1 = vadd.f32 %v798_v62, %v4796_v53  ;;  %v912_v3 = vadd.f32 %v911_v2, %v4798_v55 }
 0x2db   : > { %942 = vst [vmem:[#allocation2 + $0xe0] sm:$0xff] %v797_v59  ;;  %944 = vst [vmem:[#allocation2 + $0xf0] sm:$0xff] %v910_v63 }
 0x2dc   : > { %943 = vst [vmem:[#allocation2 + $0xe8] sm:$0xff] %v799_v1  ;;  %945 = vst [vmem:[#allocation2 + $0xf8] sm:$0xff] %v912_v3 }
 0x2dd PF: > { %p3042_p6 = scmp.le.s32.totalorder %s4407_s12, 0 }
 0x2de   : > { %v959_v49 = vld [vmem:[%s4696_s19 + $0x8] sm:$0xff] (!%p3042_p6)  ;;  %v961_v53 = vld [vmem:[%s4696_s19 + $0x18] sm:$0xff] (!%p3042_p6)  ;;  %v958_v6 = vld [vmem:[%s4696_s19] sm:$0xff] (!%p3042_p6)  ;;  %v4326_v8 = vmov (!%p3042_p6), 0.0  }
 0x2df   : > { %949 = sbr.rel (%p3042_p6) target bundleno = 1015 (0x3f7), region = 84  ;;  %v963_v50 = vld [vmem:[%s4696_s19 + $0x28] sm:$0xff] (!%p3042_p6)  ;;  %v965_v4 = vld [vmem:[%s4696_s19 + $0x38] sm:$0xff] (!%p3042_p6)  ;;  %v962_v7 = vld [vmem:[%s4696_s19 + $0x20] sm:$0xff] (!%p3042_p6)  ;;  %1108 = vmatprep.mubr.f32.mxu0 (!%p3042_p6), %v4326_v8  ;;  %1221 = vmatprep.mubr.f32.mxu1 (!%p3042_p6), %v4326_v8 }
 0x2e0   : > { %v3186_v55 = vpack.c.bf16 (!%p3042_p6), %v963_v50, %v959_v49  ;;  %v3218_v9 = vpack.c.bf16 (!%p3042_p6), %v965_v4, %v961_v53  ;;  %v3188_v10 = vpack.c.bf16 (!%p3042_p6), %v962_v7, %v958_v6  ;;  %v960_v11 = vld [vmem:[%s4696_s19 + $0x10] sm:$0xff] (!%p3042_p6)  ;;  %v967_v13 = vld [vmem:[%s4696_s19 + $0x48] sm:$0xff] (!%p3042_p6)  ;;  %v969_v16 = vld [vmem:[%s4696_s19 + $0x58] sm:$0xff] (!%p3042_p6) }
 0x2e1   : > { %v964_v12 = vld [vmem:[%s4696_s19 + $0x30] sm:$0xff] (!%p3042_p6)  ;;  %v971_v15 = vld [vmem:[%s4696_s19 + $0x68] sm:$0xff] (!%p3042_p6)  ;;  %v973_v17 = vld [vmem:[%s4696_s19 + $0x78] sm:$0xff] (!%p3042_p6) }
 0x2e2   : > { %3187 = vmatprep.subr.bf16.mxu0 (!%p3042_p6), %v3186_v55  ;;  %v3220_v14 = vpack.c.bf16 (!%p3042_p6), %v964_v12, %v960_v11  ;;  %3219 = vmatprep.subr.bf16.mxu1 (!%p3042_p6), %v3218_v9  ;;  %v3190_v18 = vpack.c.bf16 (!%p3042_p6), %v971_v15, %v967_v13  ;;  %v3222_v19 = vpack.c.bf16 (!%p3042_p6), %v973_v17, %v969_v16  ;;  %v966_v20 = vld [vmem:[%s4696_s19 + $0x40] sm:$0xff] (!%p3042_p6)  ;;  %v968_v22 = vld [vmem:[%s4696_s19 + $0x50] sm:$0xff] (!%p3042_p6)  ;;  %v975_v25 = vld [vmem:[%s4696_s19 + $0x88] sm:$0xff] (!%p3042_p6) }
 0x2e3   : > { %3189 = vmatpush1.bf16.msra.mxu0 (!%p3042_p6), %v3188_v10  ;;  %v970_v21 = vld [vmem:[%s4696_s19 + $0x60] sm:$0xff] (!%p3042_p6)  ;;  %v972_v24 = vld [vmem:[%s4696_s19 + $0x70] sm:$0xff] (!%p3042_p6)  ;;  %v979_v26 = vld [vmem:[%s4696_s19 + $0xa8] sm:$0xff] (!%p3042_p6) }
 0x2e4   : > { %3221 = vmatpush1.bf16.msra.mxu1 (!%p3042_p6), %v3220_v14  ;;  %v3192_v23 = vpack.c.bf16 (!%p3042_p6), %v970_v21, %v966_v20  ;;  %3191 = vmatprep.subr.bf16.mxu0 (!%p3042_p6), %v3190_v18  ;;  %v3224_v27 = vpack.c.bf16 (!%p3042_p6), %v972_v24, %v968_v22  ;;  %v3194_v28 = vpack.c.bf16 (!%p3042_p6), %v979_v26, %v975_v25  ;;  %v977_v29 = vld [vmem:[%s4696_s19 + $0x98] sm:$0xff] (!%p3042_p6)  ;;  %v974_v31 = vld [vmem:[%s4696_s19 + $0x80] sm:$0xff] (!%p3042_p6)  ;;  %v976_v34 = vld [vmem:[%s4696_s19 + $0x90] sm:$0xff] (!%p3042_p6) }
 0x2e5   : > { %3223 = vmatprep.subr.bf16.mxu1 (!%p3042_p6), %v3222_v19  ;;  %v981_v30 = vld [vmem:[%s4696_s19 + $0xb8] sm:$0xff] (!%p3042_p6)  ;;  %v978_v33 = vld [vmem:[%s4696_s19 + $0xa0] sm:$0xff] (!%p3042_p6)  ;;  %v980_v35 = vld [vmem:[%s4696_s19 + $0xb0] sm:$0xff] (!%p3042_p6) }
 0x2e6   : > { %v3226_v32 = vpack.c.bf16 %v981_v30, %v977_v29  ;;  %v3196_v36 = vpack.c.bf16 %v978_v33, %v974_v31  ;;  %v983_v37 = vld [vmem:[%s4696_s19 + $0xc8] sm:$0xff]  ;;  %v985_v39 = vld [vmem:[%s4696_s19 + $0xd8] sm:$0xff]  ;;  %v3228_v40 = vpack.c.bf16 %v980_v35, %v976_v34  ;;  %v982_v43 = vld [vmem:[%s4696_s19 + $0xc0] sm:$0xff] }
 0x2e7   : > { %3193 = vmatpush1.bf16.msra.mxu0 %v3192_v23  ;;  %v987_v38 = vld [vmem:[%s4696_s19 + $0xe8] sm:$0xff]  ;;  %v989_v42 = vld [vmem:[%s4696_s19 + $0xf8] sm:$0xff]  ;;  %v986_v44 = vld [vmem:[%s4696_s19 + $0xe0] sm:$0xff] }
 0x2e8   : > { %3225 = vmatpush1.bf16.msra.mxu1 %v3224_v27  ;;  %3195 = vmatprep.subr.bf16.mxu0 %v3194_v28  ;;  %v3198_v41 = vpack.c.bf16 %v987_v38, %v983_v37  ;;  %v3230_v45 = vpack.c.bf16 %v989_v42, %v985_v39  ;;  %v984_v46 = vld [vmem:[%s4696_s19 + $0xd0] sm:$0xff]  ;;  %v991_v48 = vld [vmem:[%s4696_s19 + $0x108] sm:$0xff]  ;;  %v993_v5 = vld [vmem:[%s4696_s19 + $0x118] sm:$0xff]  ;;  %v3200_v59 = vpack.c.bf16 %v986_v44, %v982_v43 }
 0x2e9   : > { %3227 = vmatprep.subr.bf16.mxu1 %v3226_v32  ;;  %v988_v47 = vld [vmem:[%s4696_s19 + $0xf0] sm:$0xff]  ;;  %v995_v56 = vld [vmem:[%s4696_s19 + $0x128] sm:$0xff]  ;;  %v997_v57 = vld [vmem:[%s4696_s19 + $0x138] sm:$0xff] }
 0x2ea   : > { %v3232_v61 = vpack.c.bf16 %v988_v47, %v984_v46  ;;  %v3202_v62 = vpack.c.bf16 %v995_v56, %v991_v48  ;;  %v990_v63 = vld [vmem:[%s4696_s19 + $0x100] sm:$0xff]  ;;  %v992_v2 = vld [vmem:[%s4696_s19 + $0x110] sm:$0xff]  ;;  %v3234_v3 = vpack.c.bf16 %v997_v57, %v993_v5  ;;  %v999_v50 = vld [vmem:[%s4696_s19 + $0x148] sm:$0xff]  ;;  %v1034_v5 = vsub.s32 2, %v4752_v51 }
 0x2eb   : > { %3197 = vmatpush1.bf16.msra.mxu0 %v3196_v36  ;;  %v994_v1 = vld [vmem:[%s4696_s19 + $0x120] sm:$0xff]  ;;  %v996_v49 = vld [vmem:[%s4696_s19 + $0x130] sm:$0xff]  ;;  %v1003_v53 = vld [vmem:[%s4696_s19 + $0x168] sm:$0xff]  ;;  %v1038_v57 = vsub.s32 3, %v4752_v51 }
 0x2ec   : > { %3229 = vmatpush1.bf16.msra.mxu1 %v3228_v40  ;;  %3199 = vmatprep.subr.bf16.mxu0 %v3198_v41  ;;  %v1001_v55 = vld [vmem:[%s4696_s19 + $0x158] sm:$0xff]  ;;  %v3204_v6 = vpack.c.bf16 %v994_v1, %v990_v63  ;;  %v3236_v7 = vpack.c.bf16 %v996_v49, %v992_v2  ;;  %v3206_v9 = vpack.c.bf16 %v1003_v53, %v999_v50  ;;  %v998_v10 = vld [vmem:[%s4696_s19 + $0x140] sm:$0xff]  ;;  %v1000_v12 = vld [vmem:[%s4696_s19 + $0x150] sm:$0xff] }
 0x2ed   : > { %3231 = vmatprep.subr.bf16.mxu1 %v3230_v45  ;;  %v1005_v4 = vld [vmem:[%s4696_s19 + $0x178] sm:$0xff]  ;;  %v1002_v11 = vld [vmem:[%s4696_s19 + $0x160] sm:$0xff]  ;;  %v1004_v14 = vld [vmem:[%s4696_s19 + $0x170] sm:$0xff] }
 0x2ee   : > { %v3238_v13 = vpack.c.bf16 %v1005_v4, %v1001_v55  ;;  %v1007_v15 = vld [vmem:[%s4696_s19 + $0x188] sm:$0xff]  ;;  %v1009_v17 = vld [vmem:[%s4696_s19 + $0x198] sm:$0xff]  ;;  %v3208_v19 = vpack.c.bf16 %v1002_v11, %v998_v10  ;;  %v3240_v20 = vpack.c.bf16 %v1004_v14, %v1000_v12  ;;  %v1006_v22 = vld [vmem:[%s4696_s19 + $0x180] sm:$0xff] }
 0x2ef   : > { %3201 = vmatpush1.bf16.msra.mxu0 %v3200_v59  ;;  %v1011_v16 = vld [vmem:[%s4696_s19 + $0x1a8] sm:$0xff]  ;;  %v1013_v18 = vld [vmem:[%s4696_s19 + $0x1b8] sm:$0xff]  ;;  %v1010_v23 = vld [vmem:[%s4696_s19 + $0x1a0] sm:$0xff] }
 0x2f0   : > { %3233 = vmatpush1.bf16.msra.mxu1 %v3232_v61  ;;  %3203 = vmatprep.subr.bf16.mxu0 %v3202_v62  ;;  %v3210_v21 = vpack.c.bf16 %v1011_v16, %v1007_v15  ;;  %v1008_v24 = vld [vmem:[%s4696_s19 + $0x190] sm:$0xff]  ;;  %v3242_v25 = vpack.c.bf16 %v1013_v18, %v1009_v17  ;;  %v1015_v27 = vld [vmem:[%s4696_s19 + $0x1c8] sm:$0xff]  ;;  %v1017_v29 = vld [vmem:[%s4696_s19 + $0x1d8] sm:$0xff]  ;;  %v3212_v31 = vpack.c.bf16 %v1010_v23, %v1006_v22 }
 0x2f1   : > { %3235 = vmatprep.subr.bf16.mxu1 %v3234_v3  ;;  %v1012_v26 = vld [vmem:[%s4696_s19 + $0x1b0] sm:$0xff]  ;;  %v1019_v28 = vld [vmem:[%s4696_s19 + $0x1e8] sm:$0xff]  ;;  %v1021_v30 = vld [vmem:[%s4696_s19 + $0x1f8] sm:$0xff] }
 0x2f2   : > { %v3244_v32 = vpack.c.bf16 %v1012_v26, %v1008_v24  ;;  %v3214_v33 = vpack.c.bf16 %v1019_v28, %v1015_v27  ;;  %v1014_v34 = vld [vmem:[%s4696_s19 + $0x1c0] sm:$0xff]  ;;  %v3246_v36 = vpack.c.bf16 %v1021_v30, %v1017_v29  ;;  %v1016_v37 = vld [vmem:[%s4696_s19 + $0x1d0] sm:$0xff]  ;;  %v951_v42 = vld [vmem:[#allocation13 + $0x8] sm:$0xff] }
 0x2f3   : > { %3205 = vmatpush1.bf16.msra.mxu0 %v3204_v6  ;;  %v1018_v35 = vld [vmem:[%s4696_s19 + $0x1e0] sm:$0xff]  ;;  %v1020_v38 = vld [vmem:[%s4696_s19 + $0x1f0] sm:$0xff]  ;;  %v953_v44 = vld [vmem:[#allocation13 + $0x18] sm:$0xff] }
 0x2f4   : > { %3237 = vmatpush1.bf16.msra.mxu1 %v3236_v7  ;;  %3207 = vmatprep.subr.bf16.mxu0 %v3206_v9  ;;  %v3216_v39 = vpack.c.bf16 %v1018_v35, %v1014_v34  ;;  %v3248_v40 = vpack.c.bf16 %v1020_v38, %v1016_v37  ;;  %v950_v41 = vld [vmem:[#allocation13] sm:$0xff]  ;;  %v952_v43 = vld [vmem:[#allocation13 + $0x10] sm:$0xff]  ;;  %v955_v46 = vld [vmem:[#allocation13 + $0x28] sm:$0xff] }
 0x2f5   : > { %3239 = vmatprep.subr.bf16.mxu1 %v3238_v13  ;;  %v954_v45 = vld [vmem:[#allocation13 + $0x20] sm:$0xff]  ;;  %v956_v47 = vld [vmem:[#allocation13 + $0x30] sm:$0xff]  ;;  %v957_v48 = vld [vmem:[#allocation13 + $0x38] sm:$0xff] }
 0x2f6   : > { %v1022_v56 = vld [vmem:[%s4717_s25] sm:$0xf] }
 0x2f7   : > { %3209 = vmatpush1.bf16.msra.mxu0 %v3208_v19  ;;  %v4917_v59 = vrot.slane %v1022_v56, %v4758_v52  ;;  %v4919_v61 = vrot.slane %v1022_v56, %v1034_v5  ;;  %v4922_v62 = vrot.slane %v1022_v56, %v4761_v54  ;;  %v4924_v63 = vrot.slane %v1022_v56, %v1038_v57 }
 0x2f8   : > { %3241 = vmatpush1.bf16.msra.mxu1 %v3240_v20  ;;  %3211 = vmatprep.subr.bf16.mxu0 %v3210_v21 }
 0x2f9   : > { %3243 = vmatprep.subr.bf16.mxu1 %v3242_v25 }
 0x2fb   : > { %3213 = vmatpush1.bf16.msra.mxu0 %v3212_v31 }
 0x2fc   : > { %3245 = vmatpush1.bf16.msra.mxu1 %v3244_v32  ;;  %3215 = vmatprep.subr.bf16.mxu0 %v3214_v33 }
 0x2fd   : > { %3247 = vmatprep.subr.bf16.mxu1 %v3246_v36 }
 0x2ff   : > { %3217 = vmatpush1.bf16.msra.mxu0 %v3216_v39 }
 0x300   : > { %3249 = vmatpush1.bf16.msra.mxu1 %v3248_v40 }
 0x302   : > { %1109 = vmatmul.mubr.f32.vlgmr.msra.gmra.mrb[0].mxu0 %v950_v41 }
 0x303   : > { %1222 = vmatmul.mubr.f32.vlgmr.msra.gmra.mrb[0].mxu1 %v950_v41  ;;  %1114 = vmatprep.mubr.f32.mxu0 %v4326_v8 }
 0x304   : > { %1227 = vmatprep.mubr.f32.mxu1 %v4326_v8 }
 0x306   : > { %1115 = vmatmul.mubr.f32.gmra.mrb[2].mxu0 %v951_v42 }
 0x307   : > { %1228 = vmatmul.mubr.f32.gmra.mrb[2].mxu1 %v951_v42  ;;  %1120 = vmatprep.mubr.f32.mxu0 %v4326_v8 }
 0x308   : > { %1233 = vmatprep.mubr.f32.mxu1 %v4326_v8 }
 0x30a   : > { %1121 = vmatmul.mubr.f32.gmra.mrb[4].mxu0 %v952_v43 }
 0x30b   : > { %1234 = vmatmul.mubr.f32.gmra.mrb[4].mxu1 %v952_v43  ;;  %1126 = vmatprep.mubr.f32.mxu0 %v4326_v8 }
 0x30c   : > { %1239 = vmatprep.mubr.f32.mxu1 %v4326_v8 }
 0x30e   : > { %1127 = vmatmul.mubr.f32.gmra.mrb[6].mxu0 %v953_v44 }
 0x30f   : > { %1240 = vmatmul.mubr.f32.gmra.mrb[6].mxu1 %v953_v44  ;;  %1132 = vmatprep.mubr.f32.mxu0 %v4326_v8 }
 0x310   : > { %1245 = vmatprep.mubr.f32.mxu1 %v4326_v8 }
 0x312   : > { %1133 = vmatmul.mubr.f32.gmra.mrb[8].mxu0 %v954_v45 }
 0x313   : > { %1246 = vmatmul.mubr.f32.gmra.mrb[8].mxu1 %v954_v45  ;;  %1138 = vmatprep.mubr.f32.mxu0 %v4326_v8 }
 0x314   : > { %1251 = vmatprep.mubr.f32.mxu1 %v4326_v8 }
 0x316   : > { %1139 = vmatmul.mubr.f32.gmra.mrb[10].mxu0 %v955_v46 }
 0x317   : > { %1252 = vmatmul.mubr.f32.gmra.mrb[10].mxu1 %v955_v46  ;;  %1144 = vmatprep.mubr.f32.mxu0 %v4326_v8 }
 0x318   : > { %1257 = vmatprep.mubr.f32.mxu1 %v4326_v8 }
 0x31a   : > { %1145 = vmatmul.mubr.f32.gmra.mrb[12].mxu0 %v956_v47 }
 0x31b   : > { %1258 = vmatmul.mubr.f32.gmra.mrb[12].mxu1 %v956_v47  ;;  %1150 = vmatprep.mubr.f32.mxu0 %v4326_v8 }
 0x31c   : > { %1263 = vmatprep.mubr.f32.mxu1 %v4326_v8 }
 0x31e   : > { %1151 = vmatmul.mubr.f32.gmra.mrb[14].mxu0 %v957_v48 }
 0x31f   : > { %1264 = vmatmul.mubr.f32.gmra.mrb[14].mxu1 %v957_v48 }
 0x3d5   : > { %v1110_v1 = vpop.f32.mrb[0].mxu0 }
 0x3d6   : > { %v1111_v8 = vadd.f32 %v1110_v1, %v4917_v59  ;;  %v1223_v2 = vpop.f32.mrb[0].mxu1  ;;  %v1112_v3 = vpop.f32.mrb[1].mxu0 }
 0x3d7   : > { %v1224_v49 = vadd.f32 %v1223_v2, %v4919_v61  ;;  %v1113_v50 = vadd.f32 %v1112_v3, %v4922_v62  ;;  %v1225_v51 = vpop.f32.mrb[1].mxu1 }
 0x3d8   : > { %1270 = vst [vmem:[#allocation2] sm:$0xff] %v1111_v8  ;;  %v1226_v52 = vadd.f32 %v1225_v51, %v4924_v63 }
 0x3d9   : > { %1272 = vst [vmem:[#allocation2 + $0x10] sm:$0xff] %v1224_v49  ;;  %1271 = vst [vmem:[#allocation2 + $0x8] sm:$0xff] %v1113_v50  ;;  %v1116_v53 = vpop.f32.mrb[2].mxu0 }
 0x3da   : > { %1273 = vst [vmem:[#allocation2 + $0x18] sm:$0xff] %v1226_v52  ;;  %v1117_v54 = vadd.f32 %v1116_v53, %v4917_v59  ;;  %v1229_v55 = vpop.f32.mrb[2].mxu1  ;;  %v1118_v4 = vpop.f32.mrb[3].mxu0 }
 0x3db   : > { %v1230_v6 = vadd.f32 %v1229_v55, %v4919_v61  ;;  %v1119_v7 = vadd.f32 %v1118_v4, %v4922_v62  ;;  %v1231_v9 = vpop.f32.mrb[3].mxu1 }
 0x3dc   : > { %1274 = vst [vmem:[#allocation2 + $0x20] sm:$0xff] %v1117_v54  ;;  %v1232_v10 = vadd.f32 %v1231_v9, %v4924_v63 }
 0x3dd   : > { %1276 = vst [vmem:[#allocation2 + $0x30] sm:$0xff] %v1230_v6  ;;  %1275 = vst [vmem:[#allocation2 + $0x28] sm:$0xff] %v1119_v7  ;;  %v1122_v11 = vpop.f32.mrb[4].mxu0 }
 0x3de   : > { %1277 = vst [vmem:[#allocation2 + $0x38] sm:$0xff] %v1232_v10  ;;  %v1123_v12 = vadd.f32 %v1122_v11, %v4917_v59  ;;  %v1235_v13 = vpop.f32.mrb[4].mxu1  ;;  %v1124_v14 = vpop.f32.mrb[5].mxu0 }
 0x3df   : > { %v1236_v15 = vadd.f32 %v1235_v13, %v4919_v61  ;;  %v1125_v16 = vadd.f32 %v1124_v14, %v4922_v62  ;;  %v1237_v17 = vpop.f32.mrb[5].mxu1 }
 0x3e0   : > { %1278 = vst [vmem:[#allocation2 + $0x40] sm:$0xff] %v1123_v12  ;;  %v1238_v18 = vadd.f32 %v1237_v17, %v4924_v63 }
 0x3e1   : > { %1280 = vst [vmem:[#allocation2 + $0x50] sm:$0xff] %v1236_v15  ;;  %1279 = vst [vmem:[#allocation2 + $0x48] sm:$0xff] %v1125_v16  ;;  %v1128_v19 = vpop.f32.mrb[6].mxu0 }
 0x3e2   : > { %1281 = vst [vmem:[#allocation2 + $0x58] sm:$0xff] %v1238_v18  ;;  %v1129_v20 = vadd.f32 %v1128_v19, %v4917_v59  ;;  %v1241_v21 = vpop.f32.mrb[6].mxu1  ;;  %v1130_v22 = vpop.f32.mrb[7].mxu0 }
 0x3e3   : > { %v1242_v23 = vadd.f32 %v1241_v21, %v4919_v61  ;;  %v1131_v24 = vadd.f32 %v1130_v22, %v4922_v62  ;;  %v1243_v25 = vpop.f32.mrb[7].mxu1 }
 0x3e4   : > { %1282 = vst [vmem:[#allocation2 + $0x60] sm:$0xff] %v1129_v20  ;;  %v1244_v26 = vadd.f32 %v1243_v25, %v4924_v63 }
 0x3e5   : > { %1284 = vst [vmem:[#allocation2 + $0x70] sm:$0xff] %v1242_v23  ;;  %1283 = vst [vmem:[#allocation2 + $0x68] sm:$0xff] %v1131_v24  ;;  %v1134_v27 = vpop.f32.mrb[8].mxu0 }
 0x3e6   : > { %1285 = vst [vmem:[#allocation2 + $0x78] sm:$0xff] %v1244_v26  ;;  %v1135_v28 = vadd.f32 %v1134_v27, %v4917_v59  ;;  %v1247_v29 = vpop.f32.mrb[8].mxu1  ;;  %v1136_v30 = vpop.f32.mrb[9].mxu0 }
 0x3e7   : > { %v1248_v31 = vadd.f32 %v1247_v29, %v4919_v61  ;;  %v1137_v32 = vadd.f32 %v1136_v30, %v4922_v62  ;;  %v1249_v33 = vpop.f32.mrb[9].mxu1 }
 0x3e8   : > { %1286 = vst [vmem:[#allocation2 + $0x80] sm:$0xff] %v1135_v28  ;;  %v1250_v34 = vadd.f32 %v1249_v33, %v4924_v63 }
 0x3e9   : > { %1288 = vst [vmem:[#allocation2 + $0x90] sm:$0xff] %v1248_v31  ;;  %1287 = vst [vmem:[#allocation2 + $0x88] sm:$0xff] %v1137_v32  ;;  %v1140_v35 = vpop.f32.mrb[10].mxu0 }
 0x3ea   : > { %1289 = vst [vmem:[#allocation2 + $0x98] sm:$0xff] %v1250_v34  ;;  %v1141_v36 = vadd.f32 %v1140_v35, %v4917_v59  ;;  %v1253_v37 = vpop.f32.mrb[10].mxu1  ;;  %v1142_v38 = vpop.f32.mrb[11].mxu0 }
 0x3eb   : > { %v1254_v39 = vadd.f32 %v1253_v37, %v4919_v61  ;;  %v1143_v40 = vadd.f32 %v1142_v38, %v4922_v62  ;;  %v1255_v41 = vpop.f32.mrb[11].mxu1 }
 0x3ec   : > { %1290 = vst [vmem:[#allocation2 + $0xa0] sm:$0xff] %v1141_v36  ;;  %v1256_v42 = vadd.f32 %v1255_v41, %v4924_v63 }
 0x3ed   : > { %1292 = vst [vmem:[#allocation2 + $0xb0] sm:$0xff] %v1254_v39  ;;  %1291 = vst [vmem:[#allocation2 + $0xa8] sm:$0xff] %v1143_v40  ;;  %v1146_v43 = vpop.f32.mrb[12].mxu0 }
 0x3ee   : > { %1293 = vst [vmem:[#allocation2 + $0xb8] sm:$0xff] %v1256_v42  ;;  %v1147_v44 = vadd.f32 %v1146_v43, %v4917_v59  ;;  %v1259_v45 = vpop.f32.mrb[12].mxu1  ;;  %v1148_v46 = vpop.f32.mrb[13].mxu0 }
 0x3ef   : > { %v1260_v47 = vadd.f32 %v1259_v45, %v4919_v61  ;;  %v1149_v48 = vadd.f32 %v1148_v46, %v4922_v62  ;;  %v1261_v56 = vpop.f32.mrb[13].mxu1 }
 0x3f0   : > { %1294 = vst [vmem:[#allocation2 + $0xc0] sm:$0xff] %v1147_v44  ;;  %v1262_v5 = vadd.f32 %v1261_v56, %v4924_v63 }
 0x3f1   : > { %1296 = vst [vmem:[#allocation2 + $0xd0] sm:$0xff] %v1260_v47  ;;  %1295 = vst [vmem:[#allocation2 + $0xc8] sm:$0xff] %v1149_v48  ;;  %v1152_v57 = vpop.f32.mrb[14].mxu0 }
 0x3f2   : > { %1297 = vst [vmem:[#allocation2 + $0xd8] sm:$0xff] %v1262_v5  ;;  %v1153_v1 = vadd.f32 %v1152_v57, %v4917_v59  ;;  %v1265_v8 = vpop.f32.mrb[14].mxu1  ;;  %v1154_v2 = vpop.f32.mrb[15].mxu0 }
 0x3f3   : > { %v1266_v3 = vadd.f32 %v1265_v8, %v4919_v61  ;;  %v1155_v49 = vadd.f32 %v1154_v2, %v4922_v62  ;;  %v1267_v50 = vpop.f32.mrb[15].mxu1 }
 0x3f4   : > { %1298 = vst [vmem:[#allocation2 + $0xe0] sm:$0xff] %v1153_v1  ;;  %v1268_v51 = vadd.f32 %v1267_v50, %v4924_v63 }
 0x3f5   : > { %1300 = vst [vmem:[#allocation2 + $0xf0] sm:$0xff] %v1266_v3  ;;  %1299 = vst [vmem:[#allocation2 + $0xe8] sm:$0xff] %v1155_v49 }
 0x3f6   : > { %1301 = vst [vmem:[#allocation2 + $0xf8] sm:$0xff] %v1268_v51 }
 0x3f7 PF: > { %v1305_v59 = vld [vmem:[%s4702_s30 + $0x18] sm:$0xff]  ;;  %v1304_v62 = vld [vmem:[%s4702_s30 + $0x10] sm:$0xff]  ;;  %1508 = vmatprep.mubr.f32.mxu1 %v4324_v0  ;;  %1437 = vmatprep.mubr.f32.mxu0 %v4324_v0  ;;  %v1303_v53 = vld [vmem:[%s4702_s30 + $0x8] sm:$0xff]  ;;  %s4327_s27 = smov [#allocation13]   ;;  %p3811_p12 = scmp.eq.s32.totalorder %s4407_s12, 1 }
 0x3f8   : > { %v1309_v61 = vld [vmem:[%s4702_s30 + $0x38] sm:$0xff]  ;;  %v1308_v52 = vld [vmem:[%s4702_s30 + $0x30] sm:$0xff]  ;;  %v1307_v54 = vld [vmem:[%s4702_s30 + $0x28] sm:$0xff]  ;;  %s2859_s17 = sshll.u32 %s4327_s27, 4  ;;  %s2860_s17 = int_to_ptr.vmem [resolvable:$true] %s2859_s17 }
 0x3f9   : > { %v4963_v63 = vpack.c.bf16 %v1309_v61, %v1305_v59  ;;  %v4968_v55 = vpack.c.bf16 %v1308_v52, %v1304_v62  ;;  %v4970_v4 = vpack.c.bf16 %v1307_v54, %v1303_v53  ;;  %v1302_v6 = vld [vmem:[%s4702_s30] sm:$0xff]  ;;  %v1313_v9 = vld [vmem:[%s4702_s30 + $0x58] sm:$0xff]  ;;  %v1312_v12 = vld [vmem:[%s4702_s30 + $0x50] sm:$0xff]  ;;  %s4202_s0 = scalar_lea.vmem %s2860_s17, 1024  ;;  %p4209_p11 = scmp.lt.s32.totalorder %s2860_s17, %s2860_s17 }
 0x3fa   : > { %v1306_v7 = vld [vmem:[%s4702_s30 + $0x20] sm:$0xff]  ;;  %v1317_v11 = vld [vmem:[%s4702_s30 + $0x78] sm:$0xff]  ;;  %v1316_v13 = vld [vmem:[%s4702_s30 + $0x70] sm:$0xff]  ;;  %p4203_p10 = scmp.ne.s32.totalorder %s2860_s17, %s4202_s0  ;;  %p4210_p13 = scmp.lt.s32.totalorder %s4202_s0, %s4202_s0 }
 0x3fb   : > { %3283 = vmatprep.subr.bf16.mxu1 %v4963_v63  ;;  %v4976_v10 = vpack.c.bf16 %v1306_v7, %v1302_v6  ;;  %3251 = vmatprep.subr.bf16.mxu0 %v4970_v4  ;;  %v4983_v14 = vpack.c.bf16 %v1317_v11, %v1313_v9  ;;  %v4985_v15 = vpack.c.bf16 %v1316_v13, %v1312_v12  ;;  %v1311_v16 = vld [vmem:[%s4702_s30 + $0x48] sm:$0xff]  ;;  %v1310_v18 = vld [vmem:[%s4702_s30 + $0x40] sm:$0xff]  ;;  %v1321_v21 = vld [vmem:[%s4702_s30 + $0x98] sm:$0xff] }
 0x3fc   : > { %3285 = vmatpush1.bf16.msra.mxu1 %v4968_v55  ;;  %v1315_v17 = vld [vmem:[%s4702_s30 + $0x68] sm:$0xff]  ;;  %v1314_v20 = vld [vmem:[%s4702_s30 + $0x60] sm:$0xff]  ;;  %v1325_v22 = vld [vmem:[%s4702_s30 + $0xb8] sm:$0xff]  ;;  %p4204_p1 = pnand %p4203_p10, %p3811_p12  ;;  %p4211_p0 = por %p4210_p13, %p4209_p11 }
 0x3fd   : > { %3253 = vmatpush1.bf16.msra.mxu0 %v4976_v10  ;;  %v4991_v19 = vpack.c.bf16 %v1315_v17, %v1311_v16  ;;  %3287 = vmatprep.subr.bf16.mxu1 %v4983_v14  ;;  %v4997_v23 = vpack.c.bf16 %v1314_v20, %v1310_v18  ;;  %v4999_v24 = vpack.c.bf16 %v1325_v22, %v1321_v21  ;;  %v1320_v25 = vld [vmem:[%s4702_s30 + $0x90] sm:$0xff]  ;;  %v1319_v27 = vld [vmem:[%s4702_s30 + $0x88] sm:$0xff]  ;;  %v1318_v29 = vld [vmem:[%s4702_s30 + $0x80] sm:$0xff] }
 0x3fe   : > { %v1324_v26 = vld [vmem:[%s4702_s30 + $0xb0] sm:$0xff]  ;;  %v1323_v28 = vld [vmem:[%s4702_s30 + $0xa8] sm:$0xff]  ;;  %v1322_v30 = vld [vmem:[%s4702_s30 + $0xa0] sm:$0xff]  ;;  %p4205_p7 = pneg %p4204_p1 }
 0x3ff   : > { %3255 = vmatprep.subr.bf16.mxu0 %v4991_v19  ;;  %v5009_v31 = vpack.c.bf16 %v1324_v26, %v1320_v25  ;;  %v5011_v32 = vpack.c.bf16 %v1323_v28, %v1319_v27  ;;  %v1329_v33 = vld [vmem:[%s4702_s30 + $0xd8] sm:$0xff]  ;;  %v1328_v35 = vld [vmem:[%s4702_s30 + $0xd0] sm:$0xff]  ;;  %v5018_v36 = vpack.c.bf16 %v1322_v30, %v1318_v29  ;;  %v1327_v39 = vld [vmem:[%s4702_s30 + $0xc8] sm:$0xff] }
 0x400   : > { %3289 = vmatpush1.bf16.msra.mxu1 %v4985_v15  ;;  %v1333_v34 = vld [vmem:[%s4702_s30 + $0xf8] sm:$0xff]  ;;  %v1332_v38 = vld [vmem:[%s4702_s30 + $0xf0] sm:$0xff]  ;;  %v1331_v40 = vld [vmem:[%s4702_s30 + $0xe8] sm:$0xff]  ;;  %p4212_p4 = pnand %p4211_p0, %p4205_p7 }
 0x401   : > { %3257 = vmatpush1.bf16.msra.mxu0 %v4997_v23  ;;  %3291 = vmatprep.subr.bf16.mxu1 %v4999_v24  ;;  %v5020_v37 = vpack.c.bf16 %v1333_v34, %v1329_v33  ;;  %v5026_v41 = vpack.c.bf16 %v1331_v40, %v1327_v39  ;;  %v1326_v42 = vld [vmem:[%s4702_s30 + $0xc0] sm:$0xff]  ;;  %v1337_v44 = vld [vmem:[%s4702_s30 + $0x118] sm:$0xff]  ;;  %v5033_v46 = vpack.c.bf16 %v1332_v38, %v1328_v35  ;;  %v1335_v47 = vld [vmem:[%s4702_s30 + $0x108] sm:$0xff] }
 0x402   : > { %3259 = vmatprep.subr.bf16.mxu0 %v5011_v32  ;;  %v1330_v43 = vld [vmem:[%s4702_s30 + $0xe0] sm:$0xff]  ;;  %v1341_v45 = vld [vmem:[%s4702_s30 + $0x138] sm:$0xff]  ;;  %v1339_v48 = vld [vmem:[%s4702_s30 + $0x128] sm:$0xff] }
 0x403   : > { %v5039_v56 = vpack.c.bf16 %v1330_v43, %v1326_v42  ;;  %v5041_v5 = vpack.c.bf16 %v1341_v45, %v1337_v44  ;;  %v1336_v57 = vld [vmem:[%s4702_s30 + $0x110] sm:$0xff]  ;;  %v1334_v8 = vld [vmem:[%s4702_s30 + $0x100] sm:$0xff]  ;;  %v5047_v2 = vpack.c.bf16 %v1339_v48, %v1335_v47  ;;  %v1345_v49 = vld [vmem:[%s4702_s30 + $0x158] sm:$0xff] }
 0x404   : > { %3293 = vmatpush1.bf16.msra.mxu1 %v5009_v31  ;;  %v1340_v1 = vld [vmem:[%s4702_s30 + $0x130] sm:$0xff]  ;;  %v1338_v3 = vld [vmem:[%s4702_s30 + $0x120] sm:$0xff]  ;;  %v1349_v50 = vld [vmem:[%s4702_s30 + $0x178] sm:$0xff] }
 0x405   : > { %3261 = vmatpush1.bf16.msra.mxu0 %v5018_v36  ;;  %3295 = vmatprep.subr.bf16.mxu1 %v5020_v37  ;;  %v1343_v51 = vld [vmem:[%s4702_s30 + $0x148] sm:$0xff]  ;;  %v5055_v61 = vpack.c.bf16 %v1340_v1, %v1336_v57  ;;  %v5059_v62 = vpack.c.bf16 %v1338_v3, %v1334_v8  ;;  %v5061_v52 = vpack.c.bf16 %v1349_v50, %v1345_v49  ;;  %v1344_v53 = vld [vmem:[%s4702_s30 + $0x150] sm:$0xff]  ;;  %v1342_v6 = vld [vmem:[%s4702_s30 + $0x140] sm:$0xff] }
 0x406   : > { %3263 = vmatprep.subr.bf16.mxu0 %v5026_v41  ;;  %v1347_v59 = vld [vmem:[%s4702_s30 + $0x168] sm:$0xff]  ;;  %v1348_v54 = vld [vmem:[%s4702_s30 + $0x170] sm:$0xff]  ;;  %v1346_v9 = vld [vmem:[%s4702_s30 + $0x160] sm:$0xff] }
 0x407   : > { %v5067_v7 = vpack.c.bf16 %v1347_v59, %v1343_v51  ;;  %v1353_v11 = vld [vmem:[%s4702_s30 + $0x198] sm:$0xff]  ;;  %v1351_v13 = vld [vmem:[%s4702_s30 + $0x188] sm:$0xff]  ;;  %v5075_v17 = vpack.c.bf16 %v1348_v54, %v1344_v53  ;;  %v5079_v18 = vpack.c.bf16 %v1346_v9, %v1342_v6  ;;  %v1352_v21 = vld [vmem:[%s4702_s30 + $0x190] sm:$0xff] }
 0x408   : > { %3297 = vmatpush1.bf16.msra.mxu1 %v5033_v46  ;;  %v1357_v12 = vld [vmem:[%s4702_s30 + $0x1b8] sm:$0xff]  ;;  %v1355_v16 = vld [vmem:[%s4702_s30 + $0x1a8] sm:$0xff]  ;;  %v1356_v22 = vld [vmem:[%s4702_s30 + $0x1b0] sm:$0xff] }
 0x409   : > { %3265 = vmatpush1.bf16.msra.mxu0 %v5039_v56  ;;  %3299 = vmatprep.subr.bf16.mxu1 %v5041_v5  ;;  %v5081_v20 = vpack.c.bf16 %v1357_v12, %v1353_v11  ;;  %v1350_v25 = vld [vmem:[%s4702_s30 + $0x180] sm:$0xff]  ;;  %v5087_v26 = vpack.c.bf16 %v1355_v16, %v1351_v13  ;;  %v1361_v28 = vld [vmem:[%s4702_s30 + $0x1d8] sm:$0xff]  ;;  %v1359_v30 = vld [vmem:[%s4702_s30 + $0x1c8] sm:$0xff]  ;;  %v5095_v34 = vpack.c.bf16 %v1356_v22, %v1352_v21 }
 0x40a   : > { %3267 = vmatprep.subr.bf16.mxu0 %v5047_v2  ;;  %v1354_v27 = vld [vmem:[%s4702_s30 + $0x1a0] sm:$0xff]  ;;  %v1365_v29 = vld [vmem:[%s4702_s30 + $0x1f8] sm:$0xff]  ;;  %v1363_v33 = vld [vmem:[%s4702_s30 + $0x1e8] sm:$0xff] }
 0x40b   : > { %v5099_v35 = vpack.c.bf16 %v1354_v27, %v1350_v25  ;;  %v5101_v38 = vpack.c.bf16 %v1365_v29, %v1361_v28  ;;  %v1360_v39 = vld [vmem:[%s4702_s30 + $0x1d0] sm:$0xff]  ;;  %v5106_v42 = vpack.c.bf16 %v1363_v33, %v1359_v30  ;;  %v1358_v43 = vld [vmem:[%s4702_s30 + $0x1c0] sm:$0xff]  ;;  %v1369_v48 = vld [vmem:[#allocation2] sm:$0xff] }
 0x40c   : > { %3301 = vmatpush1.bf16.msra.mxu1 %v5055_v61  ;;  %v1364_v40 = vld [vmem:[%s4702_s30 + $0x1f0] sm:$0xff]  ;;  %v1362_v44 = vld [vmem:[%s4702_s30 + $0x1e0] sm:$0xff] }
 0x40d   : > { %3269 = vmatpush1.bf16.msra.mxu0 %v5059_v62  ;;  %3303 = vmatprep.subr.bf16.mxu1 %v5061_v52  ;;  %v5111_v45 = vpack.c.bf16 %v1364_v40, %v1360_v39  ;;  %v5115_v47 = vpack.c.bf16 %v1362_v44, %v1358_v43  ;;  %v1370_v1 = vld [vmem:[#allocation2 + $0x8] sm:$0xff]  ;;  %v1372_v9 = vld [vmem:[#allocation2 + $0x18] sm:$0xff] }
 0x40e   : > { %3271 = vmatprep.subr.bf16.mxu0 %v5067_v7 }
 0x410   : > { %3305 = vmatpush1.bf16.msra.mxu1 %v5075_v17 }
 0x411   : > { %3273 = vmatpush1.bf16.msra.mxu0 %v5079_v18  ;;  %3307 = vmatprep.subr.bf16.mxu1 %v5081_v20 }
 0x412   : > { %3275 = vmatprep.subr.bf16.mxu0 %v5087_v26 }
 0x414   : > { %3309 = vmatpush1.bf16.msra.mxu1 %v5095_v34 }
 0x415   : > { %3277 = vmatpush1.bf16.msra.mxu0 %v5099_v35  ;;  %3311 = vmatprep.subr.bf16.mxu1 %v5101_v38 }
 0x416   : > { %3279 = vmatprep.subr.bf16.mxu0 %v5106_v42 }
 0x418   : > { %3313 = vmatpush1.bf16.msra.mxu1 %v5111_v45 }
 0x419   : > { %3281 = vmatpush1.bf16.msra.mxu0 %v5115_v47  ;;  %3347 = vmatprep.subr.bf16.mxu1 %v4963_v63 }
 0x41a   : > { %3315 = vmatprep.subr.bf16.mxu0 %v4970_v4 }
 0x41b   : > { %1509 = vmatmul.mubr.f32.vlgmr.msra.gmra.mrb[0].mxu1 %v4765_v58 }
 0x41c   : > { %1438 = vmatmul.mubr.f32.vlgmr.msra.gmra.mrb[0].mxu0 %v4765_v58  ;;  %3349 = vmatpush1.bf16.msra.mxu1 %v4968_v55  ;;  %v1371_v58 = vld [vmem:[#allocation2 + $0x10] sm:$0xff] }
 0x41d   : > { %3317 = vmatpush1.bf16.msra.mxu0 %v4976_v10  ;;  %3351 = vmatprep.subr.bf16.mxu1 %v4983_v14 }
 0x41e   : > { %3319 = vmatprep.subr.bf16.mxu0 %v4991_v19  ;;  %1622 = vmatprep.mubr.f32.mxu0 %v4324_v0 }
 0x41f   : > { %1693 = vmatprep.mubr.f32.mxu1 %v4324_v0 }
 0x420   : > { %3353 = vmatpush1.bf16.msra.mxu1 %v4985_v15 }
 0x421   : > { %3321 = vmatpush1.bf16.msra.mxu0 %v4997_v23  ;;  %3355 = vmatprep.subr.bf16.mxu1 %v4999_v24 }
 0x422   : > { %3323 = vmatprep.subr.bf16.mxu0 %v5011_v32 }
 0x424   : > { %3357 = vmatpush1.bf16.msra.mxu1 %v5009_v31 }
 0x425   : > { %3325 = vmatpush1.bf16.msra.mxu0 %v5018_v36  ;;  %3359 = vmatprep.subr.bf16.mxu1 %v5020_v37 }
 0x426   : > { %3327 = vmatprep.subr.bf16.mxu0 %v5026_v41 }
 0x428   : > { %3361 = vmatpush1.bf16.msra.mxu1 %v5033_v46 }
 0x429   : > { %3329 = vmatpush1.bf16.msra.mxu0 %v5039_v56  ;;  %3363 = vmatprep.subr.bf16.mxu1 %v5041_v5 }
 0x42a   : > { %3331 = vmatprep.subr.bf16.mxu0 %v5047_v2 }
 0x42c   : > { %3365 = vmatpush1.bf16.msra.mxu1 %v5055_v61 }
 0x42d   : > { %3333 = vmatpush1.bf16.msra.mxu0 %v5059_v62  ;;  %3367 = vmatprep.subr.bf16.mxu1 %v5061_v52 }
 0x42e   : > { %3335 = vmatprep.subr.bf16.mxu0 %v5067_v7 }
 0x430   : > { %3369 = vmatpush1.bf16.msra.mxu1 %v5075_v17 }
 0x431   : > { %3337 = vmatpush1.bf16.msra.mxu0 %v5079_v18  ;;  %3371 = vmatprep.subr.bf16.mxu1 %v5081_v20 }
 0x432   : > { %3339 = vmatprep.subr.bf16.mxu0 %v5087_v26 }
 0x434   : > { %3373 = vmatpush1.bf16.msra.mxu1 %v5095_v34 }
 0x435   : > { %3341 = vmatpush1.bf16.msra.mxu0 %v5099_v35  ;;  %3375 = vmatprep.subr.bf16.mxu1 %v5101_v38 }
 0x436   : > { %3343 = vmatprep.subr.bf16.mxu0 %v5106_v42 }
 0x438   : > { %3377 = vmatpush1.bf16.msra.mxu1 %v5111_v45 }
 0x439   : > { %3345 = vmatpush1.bf16.msra.mxu0 %v5115_v47  ;;  %3411 = vmatprep.subr.bf16.mxu1 %v4963_v63 }
 0x43a   : > { %3379 = vmatprep.subr.bf16.mxu0 %v4970_v4 }
 0x4ee   : > { %v1510_v57 = vpop.f32.mrb[0].mxu1 }
 0x4ef   : > { %v1517_v8 = vadd.f32 %v1510_v57, %v1371_v58  ;;  %v1512_v3 = vpop.f32.mrb[1].mxu1  ;;  %v1439_v49 = vpop.f32.mrb[0].mxu0 }
 0x4f0   : > { %v1515_v50 = vadd.f32 %v1439_v49, %v1369_v48  ;;  %v1441_v51 = vpop.f32.mrb[1].mxu0  ;;  %v1518_v11 = vadd.f32 %v1512_v3, %v1372_v9  ;;  %v1556_v3 = vld [vmem:[#allocation2 + $0x30] sm:$0xff]  ;;  %v1555_v49 = vld [vmem:[#allocation2 + $0x28] sm:$0xff] }
 0x4f1   : > { %v3045_v59 = vmul.f32 -1.442695, %v1517_v8  ;;  %v1516_v53 = vadd.f32 %v1441_v51, %v1370_v1 }
 0x4f2   : > { %v3043_v54 = vmul.f32 -1.442695, %v1515_v50  ;;  %v3046_v13 = vmul.f32 -1.442695, %v1518_v11 }
 0x4f3   : > { %3884 = vpow2.f32 %v3045_v59  ;;  %v3044_v6 = vmul.f32 -1.442695, %v1516_v53 }
 0x4f4   : > { %3886 = vpow2.f32 %v3043_v54 }
 0x4f5   : > { %3888 = vpow2.f32 %v3044_v6 }
 0x4fd   : > { %v3885_v12 = vpop.eup %3884 }
 0x4fe   : > { %v1533_v16 = vadd.f32 1.0, %v3885_v12  ;;  %v3887_v21 = vpop.eup %3886 }
 0x4ff   : > { %v3889_v22 = vpop.eup %3888  ;;  %v1531_v25 = vadd.f32 1.0, %v3887_v21 }
 0x500   : > { %3890 = vrcp.f32 %v1533_v16  ;;  %v1532_v27 = vadd.f32 1.0, %v3889_v22  ;;  %v1557_v16 = vld [vmem:[#allocation2 + $0x38] sm:$0xff] }
 0x501   : > { %3892 = vpow2.f32 %v3046_v13 }
 0x502   : > { %3894 = vrcp.f32 %v1531_v25 }
 0x503   : > { %3896 = vrcp.f32 %v1532_v27 }
 0x50a   : > { %v3891_v28 = vpop.eup %3890 }
 0x50b   : > { %v3893_v29 = vpop.eup %3892  ;;  %v1543_v30 = vmul.f32 2.0, %v3891_v28 }
 0x50c   : > { %v3895_v33 = vpop.eup %3894  ;;  %v1534_v43 = vadd.f32 1.0, %v3893_v29 }
 0x50d   : > { %v3897_v39 = vpop.eup %3896  ;;  %v3047_v40 = vadd.f32 -1.0, %v1543_v30 }
 0x50e   : > { %v1545_v44 = vmul.f32 %v3897_v39, %v4767_v60  ;;  %3898 = vrcp.f32 %v1534_v43  ;;  %v1554_v60 = vld [vmem:[#allocation2 + $0x20] sm:$0xff] }
 0x50f   : > { %v1546_v58 = vmul.f32 %v3895_v33, %v3047_v40 }
 0x511   : > { %v5159_v48 = vadd.f32 %v1546_v58, %v1545_v44 }
 0x513   : > { %3900 = vtanh.f32 %v5159_v48 }
 0x518   : > { %v3899_v57 = vpop.eup %3898 }
 0x51d   : > { %v3901_v1 = vpop.eup %3900 }
 0x51e   : > { %v1549_v8 = vmul.f32 %v3901_v1, %v3899_v57 }
 0x520   : > { %1550 = vst [vmem:[#allocation13] sm:$0xff] %v1549_v8  ;;  %1623 = vmatmul.mubr.f32.vlgmr.msra.gmra.mrb[2].mxu0 %v1549_v8  ;;  %1694 = vmatmul.mubr.f32.vlgmr.msra.gmra.mrb[2].mxu1 %v1549_v8 }
 0x521   : > { %3381 = vmatpush1.bf16.msra.mxu0 %v4976_v10  ;;  %3413 = vmatpush1.bf16.msra.mxu1 %v4968_v55 }
 0x522   : > { %3383 = vmatprep.subr.bf16.mxu0 %v4991_v19  ;;  %3415 = vmatprep.subr.bf16.mxu1 %v4983_v14 }
 0x523   : > { %1808 = vmatprep.mubr.f32.mxu0 %v4324_v0  ;;  %1879 = vmatprep.mubr.f32.mxu1 %v4324_v0 }
 0x525   : > { %3385 = vmatpush1.bf16.msra.mxu0 %v4997_v23  ;;  %3417 = vmatpush1.bf16.msra.mxu1 %v4985_v15 }
 0x526   : > { %3387 = vmatprep.subr.bf16.mxu0 %v5011_v32  ;;  %3419 = vmatprep.subr.bf16.mxu1 %v4999_v24 }
 0x529   : > { %3389 = vmatpush1.bf16.msra.mxu0 %v5018_v36  ;;  %3421 = vmatpush1.bf16.msra.mxu1 %v5009_v31 }
 0x52a   : > { %3391 = vmatprep.subr.bf16.mxu0 %v5026_v41  ;;  %3423 = vmatprep.subr.bf16.mxu1 %v5020_v37 }
 0x52d   : > { %3393 = vmatpush1.bf16.msra.mxu0 %v5039_v56  ;;  %3425 = vmatpush1.bf16.msra.mxu1 %v5033_v46 }
 0x52e   : > { %3395 = vmatprep.subr.bf16.mxu0 %v5047_v2  ;;  %3427 = vmatprep.subr.bf16.mxu1 %v5041_v5 }
 0x531   : > { %3397 = vmatpush1.bf16.msra.mxu0 %v5059_v62  ;;  %3429 = vmatpush1.bf16.msra.mxu1 %v5055_v61 }
 0x532   : > { %3399 = vmatprep.subr.bf16.mxu0 %v5067_v7  ;;  %3431 = vmatprep.subr.bf16.mxu1 %v5061_v52 }
 0x535   : > { %3401 = vmatpush1.bf16.msra.mxu0 %v5079_v18  ;;  %3433 = vmatpush1.bf16.msra.mxu1 %v5075_v17 }
 0x536   : > { %3403 = vmatprep.subr.bf16.mxu0 %v5087_v26  ;;  %3435 = vmatprep.subr.bf16.mxu1 %v5081_v20 }
 0x539   : > { %3405 = vmatpush1.bf16.msra.mxu0 %v5099_v35  ;;  %3437 = vmatpush1.bf16.msra.mxu1 %v5095_v34 }
 0x53a   : > { %3407 = vmatprep.subr.bf16.mxu0 %v5106_v42  ;;  %3439 = vmatprep.subr.bf16.mxu1 %v5101_v38 }
 0x53d   : > { %3409 = vmatpush1.bf16.msra.mxu0 %v5115_v47  ;;  %3441 = vmatpush1.bf16.msra.mxu1 %v5111_v45 }
 0x53e   : > { %3443 = vmatprep.subr.bf16.mxu0 %v4970_v4  ;;  %3475 = vmatprep.subr.bf16.mxu1 %v4963_v63 }
 0x5f3   : > { %v1624_v50 = vpop.f32.mrb[2].mxu0  ;;  %v1695_v51 = vpop.f32.mrb[2].mxu1 }
 0x5f4   : > { %v1700_v59 = vadd.f32 %v1624_v50, %v1554_v60  ;;  %v1702_v53 = vadd.f32 %v1695_v51, %v1556_v3  ;;  %v1626_v54 = vpop.f32.mrb[3].mxu0  ;;  %v1697_v6 = vpop.f32.mrb[3].mxu1 }
 0x5f5   : > { %v1701_v9 = vadd.f32 %v1626_v54, %v1555_v49  ;;  %v1703_v21 = vadd.f32 %v1697_v6, %v1557_v16 }
 0x5f6   : > { %v3048_v11 = vmul.f32 -1.442695, %v1700_v59  ;;  %v3050_v12 = vmul.f32 -1.442695, %v1702_v53  ;;  %v1742_v59 = vld [vmem:[#allocation2 + $0x50] sm:$0xff]  ;;  %v1741_v53 = vld [vmem:[#allocation2 + $0x48] sm:$0xff] }
 0x5f7   : > { %v3049_v13 = vmul.f32 -1.442695, %v1701_v9  ;;  %v3051_v27 = vmul.f32 -1.442695, %v1703_v21 }
 0x5f8   : > { %3902 = vpow2.f32 %v3048_v11 }
 0x5f9   : > { %3904 = vpow2.f32 %v3050_v12 }
 0x5fa   : > { %3906 = vpow2.f32 %v3049_v13 }
 0x602   : > { %v3903_v22 = vpop.eup %3902 }
 0x603   : > { %v3905_v25 = vpop.eup %3904  ;;  %v1716_v33 = vadd.f32 1.0, %v3903_v22 }
 0x604   : > { %v3907_v28 = vpop.eup %3906  ;;  %v1718_v29 = vadd.f32 1.0, %v3905_v25 }
 0x605   : > { %v1717_v30 = vadd.f32 1.0, %v3907_v28 }
 0x606   : > { %3908 = vrcp.f32 %v1718_v29 }
 0x607   : > { %3910 = vpow2.f32 %v3051_v27  ;;  %v1743_v27 = vld [vmem:[#allocation2 + $0x58] sm:$0xff] }
 0x608   : > { %3912 = vrcp.f32 %v1717_v30 }
 0x609   : > { %3914 = vrcp.f32 %v1716_v33 }
 0x610   : > { %v3909_v39 = vpop.eup %3908 }
 0x611   : > { %v3911_v40 = vpop.eup %3910  ;;  %v1728_v43 = vmul.f32 2.0, %v3909_v39 }
 0x612   : > { %v3913_v44 = vpop.eup %3912  ;;  %v1719_v1 = vadd.f32 1.0, %v3911_v40 }
 0x613   : > { %v3052_v58 = vadd.f32 -1.0, %v1728_v43  ;;  %v3915_v57 = vpop.eup %3914  ;;  %v1730_v60 = vmul.f32 %v3913_v44, %v5159_v48  ;;  %v1740_v48 = vld [vmem:[#allocation2 + $0x40] sm:$0xff] }
 0x614   : > { %3916 = vrcp.f32 %v1719_v1 }
 0x615   : > { %v1731_v8 = vmul.f32 %v3915_v57, %v3052_v58 }
 0x617   : > { %v5197_v3 = vadd.f32 %v1731_v8, %v1730_v60 }
 0x619   : > { %3918 = vtanh.f32 %v5197_v3 }
 0x61e   : > { %v3917_v49 = vpop.eup %3916 }
 0x623   : > { %v3919_v50 = vpop.eup %3918 }
 0x624   : > { %v1734_v51 = vmul.f32 %v3919_v50, %v3917_v49 }
 0x626   : > { %1736 = vst [vmem:[#allocation13 + $0x8] sm:$0xff] %v1734_v51  ;;  %1809 = vmatmul.mubr.f32.vlgmr.msra.gmra.mrb[4].mxu0 %v1734_v51  ;;  %1880 = vmatmul.mubr.f32.vlgmr.msra.gmra.mrb[4].mxu1 %v1734_v51 }
 0x627   : > { %3445 = vmatpush1.bf16.msra.mxu0 %v4976_v10  ;;  %3477 = vmatpush1.bf16.msra.mxu1 %v4968_v55 }
 0x628   : > { %3447 = vmatprep.subr.bf16.mxu0 %v4991_v19  ;;  %3479 = vmatprep.subr.bf16.mxu1 %v4983_v14 }
 0x629   : > { %1994 = vmatprep.mubr.f32.mxu0 %v4324_v0  ;;  %2065 = vmatprep.mubr.f32.mxu1 %v4324_v0 }
 0x62b   : > { %3449 = vmatpush1.bf16.msra.mxu0 %v4997_v23  ;;  %3481 = vmatpush1.bf16.msra.mxu1 %v4985_v15 }
 0x62c   : > { %3451 = vmatprep.subr.bf16.mxu0 %v5011_v32  ;;  %3483 = vmatprep.subr.bf16.mxu1 %v4999_v24 }
 0x62f   : > { %3453 = vmatpush1.bf16.msra.mxu0 %v5018_v36  ;;  %3485 = vmatpush1.bf16.msra.mxu1 %v5009_v31 }
 0x630   : > { %3455 = vmatprep.subr.bf16.mxu0 %v5026_v41  ;;  %3487 = vmatprep.subr.bf16.mxu1 %v5020_v37 }
 0x633   : > { %3457 = vmatpush1.bf16.msra.mxu0 %v5039_v56  ;;  %3489 = vmatpush1.bf16.msra.mxu1 %v5033_v46 }
 0x634   : > { %3459 = vmatprep.subr.bf16.mxu0 %v5047_v2  ;;  %3491 = vmatprep.subr.bf16.mxu1 %v5041_v5 }
 0x637   : > { %3461 = vmatpush1.bf16.msra.mxu0 %v5059_v62  ;;  %3493 = vmatpush1.bf16.msra.mxu1 %v5055_v61 }
 0x638   : > { %3463 = vmatprep.subr.bf16.mxu0 %v5067_v7  ;;  %3495 = vmatprep.subr.bf16.mxu1 %v5061_v52 }
 0x63b   : > { %3465 = vmatpush1.bf16.msra.mxu0 %v5079_v18  ;;  %3497 = vmatpush1.bf16.msra.mxu1 %v5075_v17 }
 0x63c   : > { %3467 = vmatprep.subr.bf16.mxu0 %v5087_v26  ;;  %3499 = vmatprep.subr.bf16.mxu1 %v5081_v20 }
 0x63f   : > { %3469 = vmatpush1.bf16.msra.mxu0 %v5099_v35  ;;  %3501 = vmatpush1.bf16.msra.mxu1 %v5095_v34 }
 0x640   : > { %3471 = vmatprep.subr.bf16.mxu0 %v5106_v42  ;;  %3503 = vmatprep.subr.bf16.mxu1 %v5101_v38 }
 0x643   : > { %3473 = vmatpush1.bf16.msra.mxu0 %v5115_v47  ;;  %3505 = vmatpush1.bf16.msra.mxu1 %v5111_v45 }
 0x644   : > { %3507 = vmatprep.subr.bf16.mxu0 %v4970_v4  ;;  %3539 = vmatprep.subr.bf16.mxu1 %v4963_v63 }
 0x6f9   : > { %v1810_v54 = vpop.f32.mrb[4].mxu0  ;;  %v1881_v6 = vpop.f32.mrb[4].mxu1 }
 0x6fa   : > { %v1886_v9 = vadd.f32 %v1810_v54, %v1740_v48  ;;  %v1888_v11 = vadd.f32 %v1881_v6, %v1742_v59  ;;  %v1812_v12 = vpop.f32.mrb[5].mxu0  ;;  %v1883_v13 = vpop.f32.mrb[5].mxu1 }
 0x6fb   : > { %v1887_v16 = vadd.f32 %v1812_v12, %v1741_v53  ;;  %v1889_v28 = vadd.f32 %v1883_v13, %v1743_v27 }
 0x6fc   : > { %v3053_v21 = vmul.f32 -1.442695, %v1886_v9  ;;  %v3055_v22 = vmul.f32 -1.442695, %v1888_v11  ;;  %v1928_v9 = vld [vmem:[#allocation2 + $0x70] sm:$0xff]  ;;  %v1927_v11 = vld [vmem:[#allocation2 + $0x68] sm:$0xff] }
 0x6fd   : > { %v3054_v25 = vmul.f32 -1.442695, %v1887_v16  ;;  %v3056_v33 = vmul.f32 -1.442695, %v1889_v28 }
 0x6fe   : > { %3920 = vpow2.f32 %v3053_v21 }
 0x6ff   : > { %3922 = vpow2.f32 %v3055_v22 }
 0x700   : > { %3924 = vpow2.f32 %v3054_v25 }
 0x708   : > { %v3921_v29 = vpop.eup %3920 }
 0x709   : > { %v3923_v30 = vpop.eup %3922  ;;  %v1902_v44 = vadd.f32 1.0, %v3921_v29 }
 0x70a   : > { %v3925_v39 = vpop.eup %3924  ;;  %v1904_v40 = vadd.f32 1.0, %v3923_v30 }
 0x70b   : > { %v1903_v43 = vadd.f32 1.0, %v3925_v39 }
 0x70c   : > { %3926 = vrcp.f32 %v1904_v40 }
 0x70d   : > { %3928 = vpow2.f32 %v3056_v33  ;;  %v1929_v33 = vld [vmem:[#allocation2 + $0x78] sm:$0xff] }
 0x70e   : > { %3930 = vrcp.f32 %v1903_v43 }
 0x70f   : > { %3932 = vrcp.f32 %v1902_v44 }
 0x716   : > { %v3927_v58 = vpop.eup %3926 }
 0x717   : > { %v3929_v57 = vpop.eup %3928  ;;  %v1914_v1 = vmul.f32 2.0, %v3927_v58 }
 0x718   : > { %v3931_v8 = vpop.eup %3930  ;;  %v1905_v50 = vadd.f32 1.0, %v3929_v57 }
 0x719   : > { %v3057_v60 = vadd.f32 -1.0, %v1914_v1  ;;  %v3933_v49 = vpop.eup %3932  ;;  %v1916_v48 = vmul.f32 %v3931_v8, %v5197_v3  ;;  %v1926_v3 = vld [vmem:[#allocation2 + $0x60] sm:$0xff] }
 0x71a   : > { %3934 = vrcp.f32 %v1905_v50 }
 0x71b   : > { %v1917_v51 = vmul.f32 %v3933_v49, %v3057_v60 }
 0x71d   : > { %v5235_v59 = vadd.f32 %v1917_v51, %v1916_v48 }
 0x71f   : > { %3936 = vtanh.f32 %v5235_v59 }
 0x724   : > { %v3935_v53 = vpop.eup %3934 }
 0x729   : > { %v3937_v54 = vpop.eup %3936 }
 0x72a   : > { %v1920_v6 = vmul.f32 %v3937_v54, %v3935_v53 }
 0x72c   : > { %1922 = vst [vmem:[#allocation13 + $0x10] sm:$0xff] %v1920_v6  ;;  %1995 = vmatmul.mubr.f32.vlgmr.msra.gmra.mrb[6].mxu0 %v1920_v6  ;;  %2066 = vmatmul.mubr.f32.vlgmr.msra.gmra.mrb[6].mxu1 %v1920_v6 }
 0x72d   : > { %3509 = vmatpush1.bf16.msra.mxu0 %v4976_v10  ;;  %3541 = vmatpush1.bf16.msra.mxu1 %v4968_v55 }
 0x72e   : > { %3511 = vmatprep.subr.bf16.mxu0 %v4991_v19  ;;  %3543 = vmatprep.subr.bf16.mxu1 %v4983_v14 }
 0x72f   : > { %2180 = vmatprep.mubr.f32.mxu0 %v4324_v0  ;;  %2251 = vmatprep.mubr.f32.mxu1 %v4324_v0 }
 0x731   : > { %3513 = vmatpush1.bf16.msra.mxu0 %v4997_v23  ;;  %3545 = vmatpush1.bf16.msra.mxu1 %v4985_v15 }
 0x732   : > { %3515 = vmatprep.subr.bf16.mxu0 %v5011_v32  ;;  %3547 = vmatprep.subr.bf16.mxu1 %v4999_v24 }
 0x735   : > { %3517 = vmatpush1.bf16.msra.mxu0 %v5018_v36  ;;  %3549 = vmatpush1.bf16.msra.mxu1 %v5009_v31 }
 0x736   : > { %3519 = vmatprep.subr.bf16.mxu0 %v5026_v41  ;;  %3551 = vmatprep.subr.bf16.mxu1 %v5020_v37 }
 0x739   : > { %3521 = vmatpush1.bf16.msra.mxu0 %v5039_v56  ;;  %3553 = vmatpush1.bf16.msra.mxu1 %v5033_v46 }
 0x73a   : > { %3523 = vmatprep.subr.bf16.mxu0 %v5047_v2  ;;  %3555 = vmatprep.subr.bf16.mxu1 %v5041_v5 }
 0x73d   : > { %3525 = vmatpush1.bf16.msra.mxu0 %v5059_v62  ;;  %3557 = vmatpush1.bf16.msra.mxu1 %v5055_v61 }
 0x73e   : > { %3527 = vmatprep.subr.bf16.mxu0 %v5067_v7  ;;  %3559 = vmatprep.subr.bf16.mxu1 %v5061_v52 }
 0x741   : > { %3529 = vmatpush1.bf16.msra.mxu0 %v5079_v18  ;;  %3561 = vmatpush1.bf16.msra.mxu1 %v5075_v17 }
 0x742   : > { %3531 = vmatprep.subr.bf16.mxu0 %v5087_v26  ;;  %3563 = vmatprep.subr.bf16.mxu1 %v5081_v20 }
 0x745   : > { %3533 = vmatpush1.bf16.msra.mxu0 %v5099_v35  ;;  %3565 = vmatpush1.bf16.msra.mxu1 %v5095_v34 }
 0x746   : > { %3535 = vmatprep.subr.bf16.mxu0 %v5106_v42  ;;  %3567 = vmatprep.subr.bf16.mxu1 %v5101_v38 }
 0x749   : > { %3537 = vmatpush1.bf16.msra.mxu0 %v5115_v47  ;;  %3569 = vmatpush1.bf16.msra.mxu1 %v5111_v45 }
 0x74a   : > { %3571 = vmatprep.subr.bf16.mxu0 %v4970_v4  ;;  %3603 = vmatprep.subr.bf16.mxu1 %v4963_v63 }
 0x7ff   : > { %v1996_v12 = vpop.f32.mrb[6].mxu0  ;;  %v2067_v13 = vpop.f32.mrb[6].mxu1 }
 0x800   : > { %v2072_v16 = vadd.f32 %v1996_v12, %v1926_v3  ;;  %v2074_v21 = vadd.f32 %v2067_v13, %v1928_v9  ;;  %v1998_v22 = vpop.f32.mrb[7].mxu0  ;;  %v2069_v25 = vpop.f32.mrb[7].mxu1 }
 0x801   : > { %v2073_v27 = vadd.f32 %v1998_v22, %v1927_v11  ;;  %v2075_v39 = vadd.f32 %v2069_v25, %v1929_v33 }
 0x802   : > { %v3058_v28 = vmul.f32 -1.442695, %v2072_v16  ;;  %v3060_v29 = vmul.f32 -1.442695, %v2074_v21  ;;  %v2114_v16 = vld [vmem:[#allocation2 + $0x90] sm:$0xff]  ;;  %v2113_v21 = vld [vmem:[#allocation2 + $0x88] sm:$0xff] }
 0x803   : > { %v3059_v30 = vmul.f32 -1.442695, %v2073_v27  ;;  %v3061_v44 = vmul.f32 -1.442695, %v2075_v39 }
 0x804   : > { %3938 = vpow2.f32 %v3058_v28 }
 0x805   : > { %3940 = vpow2.f32 %v3060_v29 }
 0x806   : > { %3942 = vpow2.f32 %v3059_v30 }
 0x80e   : > { %v3939_v40 = vpop.eup %3938 }
 0x80f   : > { %v3941_v43 = vpop.eup %3940  ;;  %v2088_v8 = vadd.f32 1.0, %v3939_v40 }
 0x810   : > { %v3943_v58 = vpop.eup %3942  ;;  %v2090_v57 = vadd.f32 1.0, %v3941_v43 }
 0x811   : > { %v2089_v1 = vadd.f32 1.0, %v3943_v58 }
 0x812   : > { %3944 = vrcp.f32 %v2090_v57 }
 0x813   : > { %3946 = vpow2.f32 %v3061_v44  ;;  %v2115_v44 = vld [vmem:[#allocation2 + $0x98] sm:$0xff] }
 0x814   : > { %3948 = vrcp.f32 %v2089_v1 }
 0x815   : > { %3950 = vrcp.f32 %v2088_v8 }
 0x81c   : > { %v3945_v60 = vpop.eup %3944 }
 0x81d   : > { %v3947_v49 = vpop.eup %3946  ;;  %v2100_v50 = vmul.f32 2.0, %v3945_v60 }
 0x81e   : > { %v3949_v51 = vpop.eup %3948  ;;  %v2091_v54 = vadd.f32 1.0, %v3947_v49 }
 0x81f   : > { %v3062_v48 = vadd.f32 -1.0, %v2100_v50  ;;  %v3951_v53 = vpop.eup %3950  ;;  %v2102_v3 = vmul.f32 %v3949_v51, %v5235_v59  ;;  %v2112_v59 = vld [vmem:[#allocation2 + $0x80] sm:$0xff] }
 0x820   : > { %3952 = vrcp.f32 %v2091_v54 }
 0x821   : > { %v2103_v6 = vmul.f32 %v3951_v53, %v3062_v48 }
 0x823   : > { %v5273_v9 = vadd.f32 %v2103_v6, %v2102_v3 }
 0x825   : > { %3954 = vtanh.f32 %v5273_v9 }
 0x82a   : > { %v3953_v11 = vpop.eup %3952 }
 0x82f   : > { %v3955_v12 = vpop.eup %3954 }
 0x830   : > { %v2106_v13 = vmul.f32 %v3955_v12, %v3953_v11 }
 0x832   : > { %2108 = vst [vmem:[#allocation13 + $0x18] sm:$0xff] %v2106_v13  ;;  %2181 = vmatmul.mubr.f32.vlgmr.msra.gmra.mrb[8].mxu0 %v2106_v13  ;;  %2252 = vmatmul.mubr.f32.vlgmr.msra.gmra.mrb[8].mxu1 %v2106_v13 }
 0x833   : > { %3573 = vmatpush1.bf16.msra.mxu0 %v4976_v10  ;;  %3605 = vmatpush1.bf16.msra.mxu1 %v4968_v55 }
 0x834   : > { %3575 = vmatprep.subr.bf16.mxu0 %v4991_v19  ;;  %3607 = vmatprep.subr.bf16.mxu1 %v4983_v14 }
 0x835   : > { %2366 = vmatprep.mubr.f32.mxu0 %v4324_v0  ;;  %2437 = vmatprep.mubr.f32.mxu1 %v4324_v0 }
 0x837   : > { %3577 = vmatpush1.bf16.msra.mxu0 %v4997_v23  ;;  %3609 = vmatpush1.bf16.msra.mxu1 %v4985_v15 }
 0x838   : > { %3579 = vmatprep.subr.bf16.mxu0 %v5011_v32  ;;  %3611 = vmatprep.subr.bf16.mxu1 %v4999_v24 }
 0x83b   : > { %3581 = vmatpush1.bf16.msra.mxu0 %v5018_v36  ;;  %3613 = vmatpush1.bf16.msra.mxu1 %v5009_v31 }
 0x83c   : > { %3583 = vmatprep.subr.bf16.mxu0 %v5026_v41  ;;  %3615 = vmatprep.subr.bf16.mxu1 %v5020_v37 }
 0x83f   : > { %3585 = vmatpush1.bf16.msra.mxu0 %v5039_v56  ;;  %3617 = vmatpush1.bf16.msra.mxu1 %v5033_v46 }
 0x840   : > { %3587 = vmatprep.subr.bf16.mxu0 %v5047_v2  ;;  %3619 = vmatprep.subr.bf16.mxu1 %v5041_v5 }
 0x843   : > { %3589 = vmatpush1.bf16.msra.mxu0 %v5059_v62  ;;  %3621 = vmatpush1.bf16.msra.mxu1 %v5055_v61 }
 0x844   : > { %3591 = vmatprep.subr.bf16.mxu0 %v5067_v7  ;;  %3623 = vmatprep.subr.bf16.mxu1 %v5061_v52 }
 0x847   : > { %3593 = vmatpush1.bf16.msra.mxu0 %v5079_v18  ;;  %3625 = vmatpush1.bf16.msra.mxu1 %v5075_v17 }
 0x848   : > { %3595 = vmatprep.subr.bf16.mxu0 %v5087_v26  ;;  %3627 = vmatprep.subr.bf16.mxu1 %v5081_v20 }
 0x84b   : > { %3597 = vmatpush1.bf16.msra.mxu0 %v5099_v35  ;;  %3629 = vmatpush1.bf16.msra.mxu1 %v5095_v34 }
 0x84c   : > { %3599 = vmatprep.subr.bf16.mxu0 %v5106_v42  ;;  %3631 = vmatprep.subr.bf16.mxu1 %v5101_v38 }
 0x84f   : > { %3601 = vmatpush1.bf16.msra.mxu0 %v5115_v47  ;;  %3633 = vmatpush1.bf16.msra.mxu1 %v5111_v45 }
 0x850   : > { %3635 = vmatprep.subr.bf16.mxu0 %v4970_v4  ;;  %3667 = vmatprep.subr.bf16.mxu1 %v4963_v63 }
 0x905   : > { %v2182_v22 = vpop.f32.mrb[8].mxu0  ;;  %v2253_v25 = vpop.f32.mrb[8].mxu1 }
 0x906   : > { %v2258_v27 = vadd.f32 %v2182_v22, %v2112_v59  ;;  %v2260_v28 = vadd.f32 %v2253_v25, %v2114_v16  ;;  %v2184_v29 = vpop.f32.mrb[9].mxu0  ;;  %v2255_v30 = vpop.f32.mrb[9].mxu1 }
 0x907   : > { %v2259_v33 = vadd.f32 %v2184_v29, %v2113_v21  ;;  %v2261_v58 = vadd.f32 %v2255_v30, %v2115_v44 }
 0x908   : > { %v3063_v39 = vmul.f32 -1.442695, %v2258_v27  ;;  %v3065_v40 = vmul.f32 -1.442695, %v2260_v28  ;;  %v2300_v27 = vld [vmem:[#allocation2 + $0xb0] sm:$0xff]  ;;  %v2299_v28 = vld [vmem:[#allocation2 + $0xa8] sm:$0xff] }
 0x909   : > { %v3064_v43 = vmul.f32 -1.442695, %v2259_v33  ;;  %v3066_v8 = vmul.f32 -1.442695, %v2261_v58 }
 0x90a   : > { %3956 = vpow2.f32 %v3063_v39 }
 0x90b   : > { %3958 = vpow2.f32 %v3065_v40 }
 0x90c   : > { %3960 = vpow2.f32 %v3064_v43 }
 0x914   : > { %v3957_v57 = vpop.eup %3956 }
 0x915   : > { %v3959_v1 = vpop.eup %3958  ;;  %v2274_v51 = vadd.f32 1.0, %v3957_v57 }
 0x916   : > { %v3961_v60 = vpop.eup %3960  ;;  %v2276_v49 = vadd.f32 1.0, %v3959_v1 }
 0x917   : > { %v2275_v50 = vadd.f32 1.0, %v3961_v60 }
 0x918   : > { %3962 = vrcp.f32 %v2276_v49 }
 0x919   : > { %3964 = vpow2.f32 %v3066_v8  ;;  %v2301_v8 = vld [vmem:[#allocation2 + $0xb8] sm:$0xff] }
 0x91a   : > { %3966 = vrcp.f32 %v2275_v50 }
 0x91b   : > { %3968 = vrcp.f32 %v2274_v51 }
 0x922   : > { %v3963_v48 = vpop.eup %3962 }
 0x923   : > { %v3965_v53 = vpop.eup %3964  ;;  %v2286_v54 = vmul.f32 2.0, %v3963_v48 }
 0x924   : > { %v3967_v6 = vpop.eup %3966  ;;  %v2277_v12 = vadd.f32 1.0, %v3965_v53 }
 0x925   : > { %v3067_v3 = vadd.f32 -1.0, %v2286_v54  ;;  %v3969_v11 = vpop.eup %3968  ;;  %v2288_v59 = vmul.f32 %v3967_v6, %v5273_v9  ;;  %v2298_v9 = vld [vmem:[#allocation2 + $0xa0] sm:$0xff] }
 0x926   : > { %3970 = vrcp.f32 %v2277_v12 }
 0x927   : > { %v2289_v13 = vmul.f32 %v3969_v11, %v3067_v3 }
 0x929   : > { %v5311_v16 = vadd.f32 %v2289_v13, %v2288_v59 }
 0x92b   : > { %3972 = vtanh.f32 %v5311_v16 }
 0x930   : > { %v3971_v21 = vpop.eup %3970 }
 0x935   : > { %v3973_v22 = vpop.eup %3972 }
 0x936   : > { %v2292_v25 = vmul.f32 %v3973_v22, %v3971_v21 }
 0x938   : > { %2294 = vst [vmem:[#allocation13 + $0x20] sm:$0xff] %v2292_v25  ;;  %2367 = vmatmul.mubr.f32.vlgmr.msra.gmra.mrb[10].mxu0 %v2292_v25  ;;  %2438 = vmatmul.mubr.f32.vlgmr.msra.gmra.mrb[10].mxu1 %v2292_v25 }
 0x939   : > { %3637 = vmatpush1.bf16.msra.mxu0 %v4976_v10  ;;  %3669 = vmatpush1.bf16.msra.mxu1 %v4968_v55 }
 0x93a   : > { %3639 = vmatprep.subr.bf16.mxu0 %v4991_v19  ;;  %3671 = vmatprep.subr.bf16.mxu1 %v4983_v14 }
 0x93b   : > { %2552 = vmatprep.mubr.f32.mxu0 %v4324_v0  ;;  %2623 = vmatprep.mubr.f32.mxu1 %v4324_v0 }
 0x93d   : > { %3641 = vmatpush1.bf16.msra.mxu0 %v4997_v23  ;;  %3673 = vmatpush1.bf16.msra.mxu1 %v4985_v15 }
 0x93e   : > { %3643 = vmatprep.subr.bf16.mxu0 %v5011_v32  ;;  %3675 = vmatprep.subr.bf16.mxu1 %v4999_v24 }
 0x941   : > { %3645 = vmatpush1.bf16.msra.mxu0 %v5018_v36  ;;  %3677 = vmatpush1.bf16.msra.mxu1 %v5009_v31 }
 0x942   : > { %3647 = vmatprep.subr.bf16.mxu0 %v5026_v41  ;;  %3679 = vmatprep.subr.bf16.mxu1 %v5020_v37 }
 0x945   : > { %3649 = vmatpush1.bf16.msra.mxu0 %v5039_v56  ;;  %3681 = vmatpush1.bf16.msra.mxu1 %v5033_v46 }
 0x946   : > { %3651 = vmatprep.subr.bf16.mxu0 %v5047_v2  ;;  %3683 = vmatprep.subr.bf16.mxu1 %v5041_v5 }
 0x949   : > { %3653 = vmatpush1.bf16.msra.mxu0 %v5059_v62  ;;  %3685 = vmatpush1.bf16.msra.mxu1 %v5055_v61 }
 0x94a   : > { %3655 = vmatprep.subr.bf16.mxu0 %v5067_v7  ;;  %3687 = vmatprep.subr.bf16.mxu1 %v5061_v52 }
 0x94d   : > { %3657 = vmatpush1.bf16.msra.mxu0 %v5079_v18  ;;  %3689 = vmatpush1.bf16.msra.mxu1 %v5075_v17 }
 0x94e   : > { %3659 = vmatprep.subr.bf16.mxu0 %v5087_v26  ;;  %3691 = vmatprep.subr.bf16.mxu1 %v5081_v20 }
 0x951   : > { %3661 = vmatpush1.bf16.msra.mxu0 %v5099_v35  ;;  %3693 = vmatpush1.bf16.msra.mxu1 %v5095_v34 }
 0x952   : > { %3663 = vmatprep.subr.bf16.mxu0 %v5106_v42  ;;  %3695 = vmatprep.subr.bf16.mxu1 %v5101_v38 }
 0x955   : > { %3665 = vmatpush1.bf16.msra.mxu0 %v5115_v47  ;;  %3697 = vmatpush1.bf16.msra.mxu1 %v5111_v45 }
 0x956   : > { %3699 = vmatprep.subr.bf16.mxu0 %v4970_v4  ;;  %3731 = vmatprep.subr.bf16.mxu1 %v4963_v63 }
 0xa0b   : > { %v2368_v29 = vpop.f32.mrb[10].mxu0  ;;  %v2439_v30 = vpop.f32.mrb[10].mxu1 }
 0xa0c   : > { %v2444_v33 = vadd.f32 %v2368_v29, %v2298_v9  ;;  %v2446_v39 = vadd.f32 %v2439_v30, %v2300_v27  ;;  %v2370_v40 = vpop.f32.mrb[11].mxu0  ;;  %v2441_v43 = vpop.f32.mrb[11].mxu1 }
 0xa0d   : > { %v2445_v44 = vadd.f32 %v2370_v40, %v2299_v28  ;;  %v2447_v4 = vadd.f32 %v2441_v43, %v2301_v8  ;;  %v2672_v40 = vld [vmem:[#allocation2 + $0xf0] sm:$0xff]  ;;  %v2671_v43 = vld [vmem:[#allocation2 + $0xe8] sm:$0xff] }
 0xa0e   : > { %v3068_v58 = vmul.f32 -1.442695, %v2444_v33  ;;  %v3070_v57 = vmul.f32 -1.442695, %v2446_v39  ;;  %v2670_v39 = vld [vmem:[#allocation2 + $0xe0] sm:$0xff] }
 0xa0f   : > { %v3069_v1 = vmul.f32 -1.442695, %v2445_v44  ;;  %v3071_v49 = vmul.f32 -1.442695, %v2447_v4 }
 0xa10   : > { %3974 = vpow2.f32 %v3068_v58 }
 0xa11   : > { %3976 = vpow2.f32 %v3070_v57 }
 0xa12   : > { %3978 = vpow2.f32 %v3069_v1 }
 0xa1a   : > { %v3975_v60 = vpop.eup %3974 }
 0xa1b   : > { %v3977_v63 = vpop.eup %3976  ;;  %v2460_v53 = vadd.f32 1.0, %v3975_v60 }
 0xa1c   : > { %v3979_v50 = vpop.eup %3978  ;;  %v2462_v51 = vadd.f32 1.0, %v3977_v63 }
 0xa1d   : > { %v2461_v48 = vadd.f32 1.0, %v3979_v50 }
 0xa1e   : > { %3980 = vrcp.f32 %v2462_v51  ;;  %v2673_v51 = vld [vmem:[#allocation2 + $0xf8] sm:$0xff] }
 0xa1f   : > { %3982 = vpow2.f32 %v3071_v49 }
 0xa20   : > { %3984 = vrcp.f32 %v2461_v48 }
 0xa21   : > { %3986 = vrcp.f32 %v2460_v53 }
 0xa28   : > { %v3981_v54 = vpop.eup %3980 }
 0xa29   : > { %v3983_v6 = vpop.eup %3982  ;;  %v2472_v3 = vmul.f32 2.0, %v3981_v54 }
 0xa2a   : > { %v3985_v11 = vpop.eup %3984  ;;  %v2463_v59 = vadd.f32 1.0, %v3983_v6 }
 0xa2b   : > { %v3072_v12 = vadd.f32 -1.0, %v2472_v3  ;;  %v3987_v13 = vpop.eup %3986  ;;  %v2474_v22 = vmul.f32 %v3985_v11, %v5311_v16 }
 0xa2c   : > { %3988 = vrcp.f32 %v2463_v59 }
 0xa2d   : > { %v2475_v21 = vmul.f32 %v3987_v13, %v3072_v12 }
 0xa2f   : > { %v5349_v25 = vadd.f32 %v2475_v21, %v2474_v22 }
 0xa31   : > { %3990 = vtanh.f32 %v5349_v25 }
 0xa36   : > { %v3989_v9 = vpop.eup %3988 }
 0xa3b   : > { %v3991_v27 = vpop.eup %3990 }
 0xa3c   : > { %v2478_v28 = vmul.f32 %v3991_v27, %v3989_v9 }
 0xa3e   : > { %2480 = vst [vmem:[#allocation13 + $0x28] sm:$0xff] %v2478_v28  ;;  %2553 = vmatmul.mubr.f32.vlgmr.msra.gmra.mrb[12].mxu0 %v2478_v28  ;;  %2624 = vmatmul.mubr.f32.vlgmr.msra.gmra.mrb[12].mxu1 %v2478_v28 }
 0xa3f   : > { %3701 = vmatpush1.bf16.msra.mxu0 %v4976_v10  ;;  %3733 = vmatpush1.bf16.msra.mxu1 %v4968_v55  ;;  %v2486_v55 = vld [vmem:[#allocation2 + $0xd0] sm:$0xff]  ;;  %v2485_v10 = vld [vmem:[#allocation2 + $0xc8] sm:$0xff] }
 0xa40   : > { %3703 = vmatprep.subr.bf16.mxu0 %v4991_v19  ;;  %3735 = vmatprep.subr.bf16.mxu1 %v4983_v14 }
 0xa41   : > { %2738 = vmatprep.mubr.f32.mxu0 %v4324_v0  ;;  %2809 = vmatprep.mubr.f32.mxu1 %v4324_v0  ;;  %v2484_v0 = vld [vmem:[#allocation2 + $0xc0] sm:$0xff] }
 0xa43   : > { %3705 = vmatpush1.bf16.msra.mxu0 %v4997_v23  ;;  %3737 = vmatpush1.bf16.msra.mxu1 %v4985_v15 }
 0xa44   : > { %3707 = vmatprep.subr.bf16.mxu0 %v5011_v32  ;;  %3739 = vmatprep.subr.bf16.mxu1 %v4999_v24 }
 0xa47   : > { %3709 = vmatpush1.bf16.msra.mxu0 %v5018_v36  ;;  %3741 = vmatpush1.bf16.msra.mxu1 %v5009_v31 }
 0xa48   : > { %3711 = vmatprep.subr.bf16.mxu0 %v5026_v41  ;;  %3743 = vmatprep.subr.bf16.mxu1 %v5020_v37 }
 0xa4b   : > { %3713 = vmatpush1.bf16.msra.mxu0 %v5039_v56  ;;  %3745 = vmatpush1.bf16.msra.mxu1 %v5033_v46  ;;  %v2487_v46 = vld [vmem:[#allocation2 + $0xd8] sm:$0xff] }
 0xa4c   : > { %3715 = vmatprep.subr.bf16.mxu0 %v5047_v2  ;;  %3747 = vmatprep.subr.bf16.mxu1 %v5041_v5 }
 0xa4f   : > { %3717 = vmatpush1.bf16.msra.mxu0 %v5059_v62  ;;  %3749 = vmatpush1.bf16.msra.mxu1 %v5055_v61 }
 0xa50   : > { %3719 = vmatprep.subr.bf16.mxu0 %v5067_v7  ;;  %3751 = vmatprep.subr.bf16.mxu1 %v5061_v52 }
 0xa53   : > { %3721 = vmatpush1.bf16.msra.mxu0 %v5079_v18  ;;  %3753 = vmatpush1.bf16.msra.mxu1 %v5075_v17 }
 0xa54   : > { %3723 = vmatprep.subr.bf16.mxu0 %v5087_v26  ;;  %3755 = vmatprep.subr.bf16.mxu1 %v5081_v20 }
 0xa57   : > { %3725 = vmatpush1.bf16.msra.mxu0 %v5099_v35  ;;  %3757 = vmatpush1.bf16.msra.mxu1 %v5095_v34 }
 0xa58   : > { %3727 = vmatprep.subr.bf16.mxu0 %v5106_v42  ;;  %3759 = vmatprep.subr.bf16.mxu1 %v5101_v38 }
 0xa5b   : > { %3729 = vmatpush1.bf16.msra.mxu0 %v5115_v47  ;;  %3761 = vmatpush1.bf16.msra.mxu1 %v5111_v45 }
 0xb11   : > { %v2554_v14 = vpop.f32.mrb[12].mxu0  ;;  %v2625_v15 = vpop.f32.mrb[12].mxu1 }
 0xb12   : > { %v2630_v19 = vadd.f32 %v2554_v14, %v2484_v0  ;;  %v2632_v23 = vadd.f32 %v2625_v15, %v2486_v55  ;;  %v2556_v24 = vpop.f32.mrb[13].mxu0  ;;  %v2627_v31 = vpop.f32.mrb[13].mxu1 }
 0xb13   : > { %v2631_v32 = vadd.f32 %v2556_v24, %v2485_v10  ;;  %v2633_v56 = vadd.f32 %v2627_v31, %v2487_v46 }
 0xb14   : > { %v3073_v36 = vmul.f32 -1.442695, %v2630_v19  ;;  %v3075_v37 = vmul.f32 -1.442695, %v2632_v23 }
 0xb15   : > { %v3074_v41 = vmul.f32 -1.442695, %v2631_v32  ;;  %v3076_v61 = vmul.f32 -1.442695, %v2633_v56 }
 0xb16   : > { %3992 = vpow2.f32 %v3073_v36 }
 0xb17   : > { %3994 = vpow2.f32 %v3075_v37 }
 0xb18   : > { %3996 = vpow2.f32 %v3074_v41 }
 0xb20   : > { %v3993_v5 = vpop.eup %3992 }
 0xb21   : > { %v3995_v2 = vpop.eup %3994  ;;  %v2646_v17 = vadd.f32 1.0, %v3993_v5 }
 0xb22   : > { %v3997_v62 = vpop.eup %3996  ;;  %v2648_v52 = vadd.f32 1.0, %v3995_v2 }
 0xb23   : > { %v2647_v7 = vadd.f32 1.0, %v3997_v62 }
 0xb24   : > { %3998 = vrcp.f32 %v2648_v52 }
 0xb25   : > { %4000 = vpow2.f32 %v3076_v61 }
 0xb26   : > { %4002 = vrcp.f32 %v2647_v7 }
 0xb27   : > { %4004 = vrcp.f32 %v2646_v17 }
 0xb2e   : > { %v3999_v18 = vpop.eup %3998 }
 0xb2f   : > { %v4001_v20 = vpop.eup %4000  ;;  %v2658_v26 = vmul.f32 2.0, %v3999_v18 }
 0xb30   : > { %v4003_v34 = vpop.eup %4002  ;;  %v2649_v42 = vadd.f32 1.0, %v4001_v20 }
 0xb31   : > { %v3077_v35 = vadd.f32 -1.0, %v2658_v26  ;;  %v4005_v38 = vpop.eup %4004  ;;  %v2660_v47 = vmul.f32 %v4003_v34, %v5349_v25 }
 0xb32   : > { %4006 = vrcp.f32 %v2649_v42 }
 0xb33   : > { %v2661_v45 = vmul.f32 %v4005_v38, %v3077_v35 }
 0xb35   : > { %v2662_v16 = vadd.f32 %v2661_v45, %v2660_v47 }
 0xb37   : > { %4008 = vtanh.f32 %v2662_v16 }
 0xb3c   : > { %v4007_v29 = vpop.eup %4006 }
 0xb41   : > { %v4009_v30 = vpop.eup %4008 }
 0xb42   : > { %v2664_v33 = vmul.f32 %v4009_v30, %v4007_v29 }
 0xb44   : > { %2666 = vst [vmem:[#allocation13 + $0x30] sm:$0xff] %v2664_v33  ;;  %2739 = vmatmul.mubr.f32.vlgmr.msra.gmra.mrb[14].mxu0 %v2664_v33  ;;  %2810 = vmatmul.mubr.f32.vlgmr.msra.gmra.mrb[14].mxu1 %v2664_v33 }
 0xc17   : > { %v2740_v44 = vpop.f32.mrb[14].mxu0  ;;  %v2811_v58 = vpop.f32.mrb[14].mxu1 }
 0xc18   : > { %v2816_v57 = vadd.f32 %v2740_v44, %v2670_v39  ;;  %v2818_v1 = vadd.f32 %v2811_v58, %v2672_v40  ;;  %v2742_v8 = vpop.f32.mrb[15].mxu0  ;;  %v2813_v4 = vpop.f32.mrb[15].mxu1 }
 0xc19   : > { %v2817_v60 = vadd.f32 %v2742_v8, %v2671_v43  ;;  %v2819_v48 = vadd.f32 %v2813_v4, %v2673_v51 }
 0xc1a   : > { %v3078_v63 = vmul.f32 -1.442695, %v2816_v57  ;;  %v3080_v49 = vmul.f32 -1.442695, %v2818_v1 }
 0xc1b   : > { %v3079_v50 = vmul.f32 -1.442695, %v2817_v60  ;;  %v3081_v6 = vmul.f32 -1.442695, %v2819_v48 }
 0xc1c   : > { %4010 = vpow2.f32 %v3078_v63 }
 0xc1d   : > { %4012 = vpow2.f32 %v3080_v49 }
 0xc1e   : > { %4014 = vpow2.f32 %v3079_v50 }
 0xc26   : > { %v4011_v53 = vpop.eup %4010 }
 0xc27   : > { %v4013_v54 = vpop.eup %4012  ;;  %v2832_v13 = vadd.f32 1.0, %v4011_v53 }
 0xc28   : > { %v4015_v3 = vpop.eup %4014  ;;  %v2834_v11 = vadd.f32 1.0, %v4013_v54 }
 0xc29   : > { %v2833_v12 = vadd.f32 1.0, %v4015_v3 }
 0xc2a   : > { %4016 = vrcp.f32 %v2834_v11 }
 0xc2b   : > { %4018 = vpow2.f32 %v3081_v6 }
 0xc2c   : > { %4020 = vrcp.f32 %v2833_v12 }
 0xc2d   : > { %4022 = vrcp.f32 %v2832_v13 }
 0xc34   : > { %v4017_v59 = vpop.eup %4016 }
 0xc35   : > { %v4019_v21 = vpop.eup %4018  ;;  %v2844_v22 = vmul.f32 2.0, %v4017_v59 }
 0xc36   : > { %v4021_v25 = vpop.eup %4020  ;;  %v2835_v28 = vadd.f32 1.0, %v4019_v21 }
 0xc37   : > { %v3082_v9 = vadd.f32 -1.0, %v2844_v22  ;;  %v4023_v27 = vpop.eup %4022  ;;  %v2846_v55 = vmul.f32 %v4021_v25, %v2662_v16 }
 0xc38   : > { %4024 = vrcp.f32 %v2835_v28 }
 0xc39   : > { %v2847_v0 = vmul.f32 %v4023_v27, %v3082_v9 }
 0xc3b   : > { %v2848_v10 = vadd.f32 %v2847_v0, %v2846_v55 }
 0xc3d   : > { %4026 = vtanh.f32 %v2848_v10 }
 0xc42   : > { %v4025_v14 = vpop.eup %4024 }
 0xc47   : > { %v4027_v15 = vpop.eup %4026 }
 0xc48   : > { %v2850_v19 = vmul.f32 %v4027_v15, %v4025_v14 }
 0xc4a   : > { %2852 = vst [vmem:[#allocation13 + $0x38] sm:$0xff] %v2850_v19 }
 0xc4b   : > { %4215 = shalt.err (!%p4212_p4)
}
 0xc4c   : > { %s4216_s1 = scalar_lea.hbm %s5438_s8, 1024 }
 0xc4d   : > { %p4217_p2 = scmp.ne.s32.totalorder %s5438_s8, %s4216_s1  ;;  %p4222_p5 = scmp.lt.u32.totalorder %s4216_s1, %s5438_s8 }
 0xc4f   : > { %p4218_p8 = pnand %p4217_p2, %p3811_p12 }
 0xc51   : > { %p4219_p9 = pneg %p4218_p8 }
 0xc53   : > { %p4224_p3 = pnand %p4222_p5, %p4219_p9 }
 0xc55   : > { %4227 = shalt.err (!%p4224_p3)
}
 0xc56   : > { %s4328_s30 = smov 128   ;;  %s4329_s14 = smov 8  }
 0xc57   : > { %3781 = dma.vmem_to_hbm [thread:$0]  (%p3811_p12), %s2860_s17, 1024, %s5438_s8, [#allocation5], %s4328_s30, %s4328_s30, %s4329_s14  }
 0xc58   : > { %4281 = dma.done.wait (%p3811_p12), [#allocation5], 1024  }
 0xc59   : > { %4283 = vsyncadd (%p3811_p12), [#allocation5], 4294966272 }
 0xc5a PF: > { %s5486_s11 = sld [smem:[#allocation22_spill]]  ;;  %s5487_s29 = sld [smem:[#allocation21_spill]] }
 0xc5b   : > { %s5488_s25 = sld [smem:[#allocation23_spill]]  ;;  %s5489_s27 = smov %s4290_s28 }
 0xc5c   : > { %s5492_s30 = smov %s4302_s9  ;;  %s5493_s9 = smov %s4306_s10 }
 0xc5d   : > { %s5494_s10 = smov %s4585_s18 }
 0xc60   : > { %p21_p6 = scmp.ge.s32.totalorder %s5486_s11, 4   ;;  %s5490_s28 = smov %s5487_s29 }
 0xc61   : > { %s5491_s29 = smov %s5488_s25 }
 0xc62   :  { %23 = sbr.rel (!%p21_p6) target bundleno = 12 (0xc), region = 153 }
 0xc69   :  { %2875 = vsyncpa [#allocation4], 1 }
 0xc6a   :  { %2877 = vsyncpa [#allocation4 + $0x1], 1 }
 0xc6b   :  { %2878 = vsyncpa [#allocation7], 1 }
 0xc6c   :  { %2879 = vsyncpa [#allocation11], 1 }
 0xc6d   :  { %2881 = vsyncpa [#allocation11 + $0x1], 1 }
 0xc6e   :  { %2882 = vsyncpa [#allocation5], 1 }
 0xc6f   :  { %2884 = vsyncpa [#allocation5 + $0x1], 1 }

</bundles_post_ra>
